<compile_context>
chip_gen: v5e
topology: v5e:2x2
jax: 0.10.0
libtpu: 0.0.40
codegen_flags: <defaults>
</compile_context>

<pallas_src>
import functools

import jax
import jax.numpy as jnp
from jax import lax
from jax.experimental import pallas as pl
from jax.experimental.pallas import tpu as pltpu

LANE = 128


def _round_up(x, m):
    return (x + m - 1) // m * m


# ----------------------------- Pallas kernel ------------------------------ #
def _basic_block_kernel(H, W, C, RB,
                        x_ref, w1_ref, w2_ref, b1_ref, b2_ref,
                        o_ref, pad_ref, shift_ref):
    """One image per grid step.  C is the lane-padded channel count
    (inplanes == planes on the downsample=None path, so in == out width)."""
    Ho, Wo = H, W          # stride == 1 only (wrapper asserts)
    C3 = 3 * C

    # --- halo init: zero the 1-px perimeter EVERY step (megacore-safe). ----
    pad_ref[0:1, :, :] = jnp.zeros((1, W + 2, C), jnp.float32)
    pad_ref[H + 1:H + 2, :, :] = jnp.zeros((1, W + 2, C), jnp.float32)
    pad_ref[1:H + 1, 0:1, :] = jnp.zeros((H, 1, C), jnp.float32)
    pad_ref[1:H + 1, W + 1:W + 2, :] = jnp.zeros((H, 1, C), jnp.float32)

    # relu(x) -> interior of the f32 staging buffer.
    pad_ref[1:H + 1, 1:W + 1, :] = jnp.maximum(x_ref[0], 0.0)

    # Pack the 3 kw-shifted windows side by side along lanes (bf16 MXU LHS):
    #   shift[:, :, kw*C:(kw+1)*C] = pad[:, kw:kw+Wo, :]
    # Sublane-offset reads stay on the f32 buffer; the bf16 slab is written at
    # lane-aligned (kw*C) offsets only.
    def build_shift():
        for kw in range(3):
            shift_ref[:, :, kw * C:(kw + 1) * C] = (
                pad_ref[:, kw:kw + Wo, :].astype(jnp.bfloat16))

    # 3x3 conv (BN scale folded into w_ref) = 3 accumulating dots, K = 3*C.
    def conv(w_ref, r0, rb):
        acc = None
        for kh in range(3):
            lhs = shift_ref[kh + r0:kh + r0 + rb, :, :].reshape(rb * Wo, C3)
            d = jnp.dot(lhs, w_ref[kh], preferred_element_type=jnp.float32)
            acc = d if acc is None else acc + d
        return acc

    bias1 = b1_ref[...]        # hoisted: load the (1, C) biases once
    bias2 = b2_ref[...]

    # ---- conv1 + bn1 + relu -> back into pad interior (feeds conv2) -------
    build_shift()
    for r0 in range(0, Ho, RB):
        rb = min(RB, Ho - r0)
        y = jnp.maximum(conv(w1_ref, r0, rb) + bias1, 0.0)
        pad_ref[1 + r0:1 + r0 + rb, 1:Wo + 1, :] = y.reshape(rb, Wo, C)

    # ---- conv2 + bn2 + residual (identity = relu(x), kept f32) ------------
    build_shift()
    for r0 in range(0, Ho, RB):
        rb = min(RB, Ho - r0)
        y = (conv(w2_ref, r0, rb) + bias2).reshape(rb, Wo, C)
        identity = jnp.maximum(x_ref[0, r0:r0 + rb], 0.0)
        o_ref[0, r0:r0 + rb] = y + identity


# ------------------------------ JAX wrapper -------------------------------- #
def basic_block_forward(x_nchw, w1_oihw, w2_oihw, sb1, sb2, stride=1):
    """x_nchw: [N, Cin, H, W] f32; w*_oihw: effective DiracConv weights (OIHW);
    sb*: stacked (scale, bias) rows from fold_bn.  Returns [N, planes, H, W]."""
    N, Cin, H, W = x_nchw.shape
    P = w1_oihw.shape[0]
    # TODO(synk): stride>1 / downsample branch (channel change) not implemented;
    # this covers the downsample=None BasicBlock path only.
    assert stride == 1 and Cin == P, "covers the downsample=None path only"
    Ho, Wo = H, W

    # NOTE: channels are padded to the 128-lane width; at tiny demo widths
    # (C=4 -> Cp=128) everything is ~32x padding-dominated — benchmark at real
    # ResNet widths (>=64) where the tiling/VMEM decisions actually bind.
    Cp = _round_up(Cin, LANE)
    Pp = _round_up(P, LANE)
    assert Cp == Pp

    # NCHW -> NHWC, zero-pad channels to the lane width.
    x = jnp.transpose(x_nchw, (0, 2, 3, 1))
    x = jnp.pad(x, ((0, 0), (0, 0), (0, 0), (0, Cp - Cin)))

    # Fold the BN scale into the conv output channels (exact, conv is linear),
    # and lay the weights out as (kh, kw*Ci + ci, co) so each kh tap is one
    # K = 3*Ci bf16 matmul against the kw-packed LHS slab.
    def prep_w(w_oihw, scale, ci, ci_p, co_p):
        w = w_oihw * scale[:, None, None, None]            # scale on O
        w = jnp.transpose(w, (2, 3, 1, 0))                  # OIHW -> (kh,kw,ci,co)
        w = jnp.pad(w, ((0, 0), (0, 0), (0, ci_p - ci), (0, co_p - w.shape[3])))
        return w.reshape(3, 3 * ci_p, co_p).astype(jnp.bfloat16)

    w1f = prep_w(w1_oihw, sb1[0], Cin, Cp, Pp)
    w2f = prep_w(w2_oihw, sb2[0], P, Pp, Pp)
    b1 = jnp.pad(sb1[1], (0, Pp - P)).reshape(1, Pp).astype(jnp.float32)
    b2 = jnp.pad(sb2[1], (0, Pp - P)).reshape(1, Pp).astype(jnp.float32)

    # Matmul M-block <= ~256 rows: accumulator + epilogue stay vreg-resident.
    RB = max(1, min(Ho, 256 // max(Wo, 1)))

    # Explicit VMEM budget: scratch + double-buffered I/O blocks + weights.
    scratch_bytes = ((H + 2) * (W + 2) * Cp * 4          # f32 padded staging buf
                     + (H + 2) * Wo * 3 * Cp * 2)        # bf16 kw-packed slab
    io_bytes = 2 * (H * W * Cp * 4                       # x block (double-buffered)
                    + Ho * Wo * Pp * 4                   # out block
                    + 2 * 9 * Cp * Pp * 2                # w1 + w2
                    + 2 * Pp * 4)                        # biases
    vmem_limit = int(max(32 << 20,
                         min(1.5 * (scratch_bytes + io_bytes) + (2 << 20),
                             60 << 20)))                 # stay under v7x 64 MiB

    kernel = functools.partial(_basic_block_kernel, H, W, Cp, RB)

    out_nhwc = pl.pallas_call(
        kernel,
        out_shape=jax.ShapeDtypeStruct((N, Ho, Wo, Pp), jnp.float32),
        grid_spec=pltpu.PrefetchScalarGridSpec(
            num_scalar_prefetch=0,
            # TODO(synk): add a second 'parallel' output-row-strip grid axis
            # (strip+2-row halo) so both v7x TensorCores are fed at small N.
            grid=(N,),
            in_specs=[
                pl.BlockSpec((1, H, W, Cp), lambda n: (n, 0, 0, 0)),
                # TODO(synk): single-buffer these constant-index blocks via
                # pipeline_mode=pl.Buffered(1) once verified on this JAX.
                pl.BlockSpec((3, 3 * Cp, Pp), lambda n: (0, 0, 0)),
                pl.BlockSpec((3, 3 * Pp, Pp), lambda n: (0, 0, 0)),
                pl.BlockSpec((1, Pp), lambda n: (0, 0)),
                pl.BlockSpec((1, Pp), lambda n: (0, 0)),
            ],
            out_specs=pl.BlockSpec((1, Ho, Wo, Pp), lambda n: (n, 0, 0, 0)),
            scratch_shapes=[
                pltpu.VMEM((H + 2, W + 2, Cp), jnp.float32),     # padded staging
                pltpu.VMEM((H + 2, Wo, 3 * Cp), jnp.bfloat16),   # kw-packed LHS
            ],
        ),
        compiler_params=pltpu.CompilerParams(
            dimension_semantics=("parallel",),
            vmem_limit_bytes=vmem_limit),
    )(x, w1f, w2f, b1, b2)

    return jnp.transpose(out_nhwc[..., :P], (0, 3, 1, 2))   # back to NCHW


# --------------------- parameter construction (glue) ----------------------- #
def dirac_weight(raw_w_oihw, alpha, beta):
    """DiracConv2d effective weight: alpha*delta + beta*normalize(W). OIHW."""
    O, I, KH, KW = raw_w_oihw.shape
    delta = jnp.zeros_like(raw_w_oihw)
    m = min(O, I)
    delta = delta.at[jnp.arange(m), jnp.arange(m), KH // 2, KW // 2].set(1.0)
    flat = raw_w_oihw.reshape(O, -1)
    norm = jnp.maximum(jnp.linalg.norm(flat, axis=1, keepdims=True), 1e-12)
    normalized = (flat / norm).reshape(raw_w_oihw.shape)
    return (alpha[:, None, None, None] * delta
            + beta[:, None, None, None] * normalized)


def fold_bn(gamma, beta, mean, var, eps=1e-5):
    # TODO(synk): training-mode (batch-statistic) BatchNorm not implemented;
    # this folds inference-mode running stats into scale/bias.
    scale = gamma / jnp.sqrt(var + eps)
    bias = beta - mean * scale
    return jnp.stack([scale, bias], axis=0)    # (2, C)


# --------------------------- pure-JAX reference ---------------------------- #
def reference_forward(x, w1_oihw, w2_oihw, sb1, sb2, stride):
    # Convs use bf16 operands / f32 accumulation to match the kernel's declared
    # matmul precision; BN, relu and residual stay in f32.
    dn = ('NCHW', 'OIHW', 'NCHW')
    r = jnp.maximum(x, 0.0)
    out = lax.conv_general_dilated(
        r.astype(jnp.bfloat16), w1_oihw.astype(jnp.bfloat16), (stride, stride),
        ((1, 1), (1, 1)), dimension_numbers=dn,
        preferred_element_type=jnp.float32)
    out = out * sb1[0][None, :, None, None] + sb1[1][None, :, None, None]
    out = jnp.maximum(out, 0.0)
    out = lax.conv_general_dilated(
        out.astype(jnp.bfloat16), w2_oihw.astype(jnp.bfloat16), (1, 1),
        ((1, 1), (1, 1)), dimension_numbers=dn,
        preferred_element_type=jnp.float32)
    out = out * sb2[0][None, :, None, None] + sb2[1][None, :, None, None]
    return out + r


# ----------------------------------- main ----------------------------------- #
if __name__ == "__main__":
    key = jax.random.PRNGKey(0)
    N, C, H, W = 2, 4, 16, 16      # batch=2, inplanes=planes=4, spatial=16
    planes, stride = C, 1
    ks = jax.random.split(key, 12)

    x = jax.random.normal(ks[0], (N, C, H, W), jnp.float32)

    # DiracConv2d params (alpha=1, beta=0.1 as in DiracNets init)
    raw_w1 = 0.1 * jax.random.normal(ks[1], (planes, C, 3, 3), jnp.float32)
    raw_w2 = 0.1 * jax.random.normal(ks[2], (planes, planes, 3, 3), jnp.float32)
    w1_oihw = dirac_weight(raw_w1, jnp.ones((planes,)), jnp.full((planes,), 0.1))
    w2_oihw = dirac_weight(raw_w2, jnp.ones((planes,)), jnp.full((planes,), 0.1))

    # BatchNorm2d (affine=True, inference mode) — deterministic, non-trivial
    g1 = 1.0 + 0.1 * jax.random.normal(ks[3], (planes,), jnp.float32)
    b1 = 0.1 * jax.random.normal(ks[4], (planes,), jnp.float32)
    m1 = 0.1 * jax.random.normal(ks[5], (planes,), jnp.float32)
    v1 = 1.0 + 0.1 * jax.random.uniform(ks[6], (planes,), jnp.float32)
    g2 = 1.0 + 0.1 * jax.random.normal(ks[7], (planes,), jnp.float32)
    b2 = 0.1 * jax.random.normal(ks[8], (planes,), jnp.float32)
    m2 = 0.1 * jax.random.normal(ks[9], (planes,), jnp.float32)
    v2 = 1.0 + 0.1 * jax.random.uniform(ks[10], (planes,), jnp.float32)
    sb1 = fold_bn(g1, b1, m1, v1)
    sb2 = fold_bn(g2, b2, m2, v2)

    out = basic_block_forward(x, w1_oihw, w2_oihw, sb1, sb2, stride=stride)
    out = jax.block_until_ready(out)

    ref = reference_forward(x, w1_oihw, w2_oihw, sb1, sb2, stride)
    assert out.shape == ref.shape, (out.shape, ref.shape)
    max_err = float(jnp.max(jnp.abs(out - ref)))
    # Tolerance covers bf16 weight/activation rounding on the matmul path.
    if not jnp.allclose(out, ref, rtol=2e-2, atol=2e-2):
        raise AssertionError(f"Pallas/ref mismatch, max abs err = {max_err}")

    print("KERNEL_OK")
</pallas_src>

<mosaic_0001>
module attributes {stable_mosaic.version = 11 : i64} {
  func.func @_basic_block_kernel(%arg0: i32, %arg1: memref<1x16x16x128xf32, #tpu.memory_space<vmem>>, %arg2: memref<3x384x128xbf16, #tpu.memory_space<vmem>>, %arg3: memref<3x384x128xbf16, #tpu.memory_space<vmem>>, %arg4: memref<1x128xf32, #tpu.memory_space<vmem>>, %arg5: memref<1x128xf32, #tpu.memory_space<vmem>>, %arg6: memref<1x16x16x128xf32, #tpu.memory_space<vmem>>, %arg7: memref<18x18x128xf32, #tpu.memory_space<vmem>>, %arg8: memref<18x16x384xbf16, #tpu.memory_space<vmem>>) attributes {dimension_semantics = [#tpu.dimension_semantics<parallel>], iteration_bounds = array<i64: 2>, scalar_prefetch = 0 : i64, scratch_operands = 2 : i64, tpu.core_type = #tpu.core_type<tc>, window_params = [{transform_indices = @transform_0, window_bounds = array<i64: 1, 16, 16, 128>}, {pipeline_mode = #tpu.pipeline_mode<synchronous>, transform_indices = @transform_1, window_bounds = array<i64: 3, 384, 128>}, {pipeline_mode = #tpu.pipeline_mode<synchronous>, transform_indices = @transform_2, window_bounds = array<i64: 3, 384, 128>}, {pipeline_mode = #tpu.pipeline_mode<synchronous>, transform_indices = @transform_3, window_bounds = array<i64: 1, 128>}, {pipeline_mode = #tpu.pipeline_mode<synchronous>, transform_indices = @transform_4, window_bounds = array<i64: 1, 128>}, {transform_indices = @transform_5, window_bounds = array<i64: 1, 16, 16, 128>}]} {
    %cst = arith.constant 0.000000e+00 : f32
    %0 = vector.broadcast %cst : f32 to vector<1x18x128xf32>
    %c0 = arith.constant 0 : index
    %c0_0 = arith.constant 0 : index
    %c0_1 = arith.constant 0 : index
    %1 = vector.load %arg7[%c0, %c0_0, %c0_1] : memref<18x18x128xf32, #tpu.memory_space<vmem>>, vector<1x18x128xf32>
    tpu.vector_store %arg7[%c0, %c0_0, %c0_1], %0 {strides = array<i32>} : memref<18x18x128xf32, #tpu.memory_space<vmem>>, vector<1x18x128xf32>,
    %cst_2 = arith.constant 0.000000e+00 : f32
    %2 = vector.broadcast %cst_2 : f32 to vector<1x18x128xf32>
    %c17 = arith.constant 17 : index
    %c0_3 = arith.constant 0 : index
    %c0_4 = arith.constant 0 : index
    %3 = vector.load %arg7[%c17, %c0_3, %c0_4] : memref<18x18x128xf32, #tpu.memory_space<vmem>>, vector<1x18x128xf32>
    tpu.vector_store %arg7[%c17, %c0_3, %c0_4], %2 {strides = array<i32>} : memref<18x18x128xf32, #tpu.memory_space<vmem>>, vector<1x18x128xf32>,
    %cst_5 = arith.constant 0.000000e+00 : f32
    %4 = vector.broadcast %cst_5 : f32 to vector<16x1x128xf32>
    %c1 = arith.constant 1 : index
    %c0_6 = arith.constant 0 : index
    %c0_7 = arith.constant 0 : index
    %5 = vector.load %arg7[%c1, %c0_6, %c0_7] : memref<18x18x128xf32, #tpu.memory_space<vmem>>, vector<16x1x128xf32>
    tpu.vector_store %arg7[%c1, %c0_6, %c0_7], %4 {strides = array<i32>} : memref<18x18x128xf32, #tpu.memory_space<vmem>>, vector<16x1x128xf32>,
    %cst_8 = arith.constant 0.000000e+00 : f32
    %6 = vector.broadcast %cst_8 : f32 to vector<16x1x128xf32>
    %c1_9 = arith.constant 1 : index
    %c17_10 = arith.constant 17 : index
    %c0_11 = arith.constant 0 : index
    %7 = vector.load %arg7[%c1_9, %c17_10, %c0_11] : memref<18x18x128xf32, #tpu.memory_space<vmem>>, vector<16x1x128xf32>
    tpu.vector_store %arg7[%c1_9, %c17_10, %c0_11], %6 {strides = array<i32>} : memref<18x18x128xf32, #tpu.memory_space<vmem>>, vector<16x1x128xf32>,
    %c0_12 = arith.constant 0 : index
    %c0_13 = arith.constant 0 : index
    %c0_14 = arith.constant 0 : index
    %c0_15 = arith.constant 0 : index
    %8 = vector.load %arg1[%c0_12, %c0_13, %c0_14, %c0_15] : memref<1x16x16x128xf32, #tpu.memory_space<vmem>>, vector<1x16x16x128xf32>
    %9 = vector.shape_cast %8 : vector<1x16x16x128xf32> to vector<16x16x128xf32>
    %cst_16 = arith.constant 0.000000e+00 : f32
    %10 = vector.broadcast %cst_16 : f32 to vector<16x16x128xf32>
    %11 = arith.maximumf %9, %10 : vector<16x16x128xf32>
    %c1_17 = arith.constant 1 : index
    %c1_18 = arith.constant 1 : index
    %c0_19 = arith.constant 0 : index
    %12 = vector.load %arg7[%c1_17, %c1_18, %c0_19] : memref<18x18x128xf32, #tpu.memory_space<vmem>>, vector<16x16x128xf32>
    tpu.vector_store %arg7[%c1_17, %c1_18, %c0_19], %11 {strides = array<i32>} : memref<18x18x128xf32, #tpu.memory_space<vmem>>, vector<16x16x128xf32>,
    %c0_20 = arith.constant 0 : index
    %c0_21 = arith.constant 0 : index
    %13 = vector.load %arg4[%c0_20, %c0_21] : memref<1x128xf32, #tpu.memory_space<vmem>>, vector<1x128xf32>
    %c0_22 = arith.constant 0 : index
    %c0_23 = arith.constant 0 : index
    %14 = vector.load %arg5[%c0_22, %c0_23] : memref<1x128xf32, #tpu.memory_space<vmem>>, vector<1x128xf32>
    %c0_24 = arith.constant 0 : index
    %c0_25 = arith.constant 0 : index
    %c0_26 = arith.constant 0 : index
    %15 = vector.load %arg7[%c0_24, %c0_25, %c0_26] : memref<18x18x128xf32, #tpu.memory_space<vmem>>, vector<18x16x128xf32>
    %16 = arith.truncf %15 : vector<18x16x128xf32> to vector<18x16x128xbf16>
    %c0_27 = arith.constant 0 : index
    %c0_28 = arith.constant 0 : index
    %c0_29 = arith.constant 0 : index
    %17 = vector.load %arg8[%c0_27, %c0_28, %c0_29] : memref<18x16x384xbf16, #tpu.memory_space<vmem>>, vector<18x16x128xbf16>
    tpu.vector_store %arg8[%c0_27, %c0_28, %c0_29], %16 {strides = array<i32>} : memref<18x16x384xbf16, #tpu.memory_space<vmem>>, vector<18x16x128xbf16>,
    %c0_30 = arith.constant 0 : index
    %c1_31 = arith.constant 1 : index
    %c0_32 = arith.constant 0 : index
    %18 = vector.load %arg7[%c0_30, %c1_31, %c0_32] : memref<18x18x128xf32, #tpu.memory_space<vmem>>, vector<18x16x128xf32>
    %19 = arith.truncf %18 : vector<18x16x128xf32> to vector<18x16x128xbf16>
    %c0_33 = arith.constant 0 : index
    %c0_34 = arith.constant 0 : index
    %c128 = arith.constant 128 : index
    %20 = vector.load %arg8[%c0_33, %c0_34, %c128] : memref<18x16x384xbf16, #tpu.memory_space<vmem>>, vector<18x16x128xbf16>
    tpu.vector_store %arg8[%c0_33, %c0_34, %c128], %19 {strides = array<i32>} : memref<18x16x384xbf16, #tpu.memory_space<vmem>>, vector<18x16x128xbf16>,
    %c0_35 = arith.constant 0 : index
    %c2 = arith.constant 2 : index
    %c0_36 = arith.constant 0 : index
    %21 = vector.load %arg7[%c0_35, %c2, %c0_36] : memref<18x18x128xf32, #tpu.memory_space<vmem>>, vector<18x16x128xf32>
    %22 = arith.truncf %21 : vector<18x16x128xf32> to vector<18x16x128xbf16>
    %c0_37 = arith.constant 0 : index
    %c0_38 = arith.constant 0 : index
    %c256 = arith.constant 256 : index
    %23 = vector.load %arg8[%c0_37, %c0_38, %c256] : memref<18x16x384xbf16, #tpu.memory_space<vmem>>, vector<18x16x128xbf16>
    tpu.vector_store %arg8[%c0_37, %c0_38, %c256], %22 {strides = array<i32>} : memref<18x16x384xbf16, #tpu.memory_space<vmem>>, vector<18x16x128xbf16>,
    %c0_39 = arith.constant 0 : index
    %c0_40 = arith.constant 0 : index
    %c0_41 = arith.constant 0 : index
    %24 = vector.load %arg8[%c0_39, %c0_40, %c0_41] : memref<18x16x384xbf16, #tpu.memory_space<vmem>>, vector<16x16x384xbf16>
    %25 = vector.shape_cast %24 : vector<16x16x384xbf16> to vector<256x384xbf16>
    %c0_42 = arith.constant 0 : index
    %c0_43 = arith.constant 0 : index
    %c0_44 = arith.constant 0 : index
    %26 = vector.load %arg2[%c0_42, %c0_43, %c0_44] : memref<3x384x128xbf16, #tpu.memory_space<vmem>>, vector<1x384x128xbf16>
    %27 = vector.shape_cast %26 : vector<1x384x128xbf16> to vector<384x128xbf16>
    %cst_45 = arith.constant dense<0.000000e+00> : vector<256x128xf32>
    %28 = tpu.matmul %25, %27, %cst_45 {dimension_numbers = #tpu.dot_dimension_numbers<[1], [0], [0], [1], [0, 0, 1, 1], [], []>} : vector<256x384xbf16>, vector<384x128xbf16>, vector<256x128xf32> -> vector<256x128xf32>
    %c1_46 = arith.constant 1 : index
    %c0_47 = arith.constant 0 : index
    %c0_48 = arith.constant 0 : index
    %29 = vector.load %arg8[%c1_46, %c0_47, %c0_48] : memref<18x16x384xbf16, #tpu.memory_space<vmem>>, vector<16x16x384xbf16>
    %30 = vector.shape_cast %29 : vector<16x16x384xbf16> to vector<256x384xbf16>
    %c1_49 = arith.constant 1 : index
    %c0_50 = arith.constant 0 : index
    %c0_51 = arith.constant 0 : index
    %31 = vector.load %arg2[%c1_49, %c0_50, %c0_51] : memref<3x384x128xbf16, #tpu.memory_space<vmem>>, vector<1x384x128xbf16>
    %32 = vector.shape_cast %31 : vector<1x384x128xbf16> to vector<384x128xbf16>
    %cst_52 = arith.constant dense<0.000000e+00> : vector<256x128xf32>
    %33 = tpu.matmul %30, %32, %cst_52 {dimension_numbers = #tpu.dot_dimension_numbers<[1], [0], [0], [1], [0, 0, 1, 1], [], []>} : vector<256x384xbf16>, vector<384x128xbf16>, vector<256x128xf32> -> vector<256x128xf32>
    %34 = arith.addf %28, %33 : vector<256x128xf32>
    %c2_53 = arith.constant 2 : index
    %c0_54 = arith.constant 0 : index
    %c0_55 = arith.constant 0 : index
    %35 = vector.load %arg8[%c2_53, %c0_54, %c0_55] : memref<18x16x384xbf16, #tpu.memory_space<vmem>>, vector<16x16x384xbf16>
    %36 = vector.shape_cast %35 : vector<16x16x384xbf16> to vector<256x384xbf16>
    %c2_56 = arith.constant 2 : index
    %c0_57 = arith.constant 0 : index
    %c0_58 = arith.constant 0 : index
    %37 = vector.load %arg2[%c2_56, %c0_57, %c0_58] : memref<3x384x128xbf16, #tpu.memory_space<vmem>>, vector<1x384x128xbf16>
    %38 = vector.shape_cast %37 : vector<1x384x128xbf16> to vector<384x128xbf16>
    %cst_59 = arith.constant dense<0.000000e+00> : vector<256x128xf32>
    %39 = tpu.matmul %36, %38, %cst_59 {dimension_numbers = #tpu.dot_dimension_numbers<[1], [0], [0], [1], [0, 0, 1, 1], [], []>} : vector<256x384xbf16>, vector<384x128xbf16>, vector<256x128xf32> -> vector<256x128xf32>
    %40 = arith.addf %34, %39 : vector<256x128xf32>
    %41 = vector.broadcast %13 : vector<1x128xf32> to vector<256x128xf32>
    %42 = arith.addf %40, %41 : vector<256x128xf32>
    %cst_60 = arith.constant 0.000000e+00 : f32
    %43 = vector.broadcast %cst_60 : f32 to vector<256x128xf32>
    %44 = arith.maximumf %42, %43 : vector<256x128xf32>
    %45 = vector.shape_cast %44 : vector<256x128xf32> to vector<16x16x128xf32>
    %c1_61 = arith.constant 1 : index
    %c1_62 = arith.constant 1 : index
    %c0_63 = arith.constant 0 : index
    %46 = vector.load %arg7[%c1_61, %c1_62, %c0_63] : memref<18x18x128xf32, #tpu.memory_space<vmem>>, vector<16x16x128xf32>
    tpu.vector_store %arg7[%c1_61, %c1_62, %c0_63], %45 {strides = array<i32>} : memref<18x18x128xf32, #tpu.memory_space<vmem>>, vector<16x16x128xf32>,
    %c0_64 = arith.constant 0 : index
    %c0_65 = arith.constant 0 : index
    %c0_66 = arith.constant 0 : index
    %47 = vector.load %arg7[%c0_64, %c0_65, %c0_66] : memref<18x18x128xf32, #tpu.memory_space<vmem>>, vector<18x16x128xf32>
    %48 = arith.truncf %47 : vector<18x16x128xf32> to vector<18x16x128xbf16>
    %c0_67 = arith.constant 0 : index
    %c0_68 = arith.constant 0 : index
    %c0_69 = arith.constant 0 : index
    %49 = vector.load %arg8[%c0_67, %c0_68, %c0_69] : memref<18x16x384xbf16, #tpu.memory_space<vmem>>, vector<18x16x128xbf16>
    tpu.vector_store %arg8[%c0_67, %c0_68, %c0_69], %48 {strides = array<i32>} : memref<18x16x384xbf16, #tpu.memory_space<vmem>>, vector<18x16x128xbf16>,
    %c0_70 = arith.constant 0 : index
    %c1_71 = arith.constant 1 : index
    %c0_72 = arith.constant 0 : index
    %50 = vector.load %arg7[%c0_70, %c1_71, %c0_72] : memref<18x18x128xf32, #tpu.memory_space<vmem>>, vector<18x16x128xf32>
    %51 = arith.truncf %50 : vector<18x16x128xf32> to vector<18x16x128xbf16>
    %c0_73 = arith.constant 0 : index
    %c0_74 = arith.constant 0 : index
    %c128_75 = arith.constant 128 : index
    %52 = vector.load %arg8[%c0_73, %c0_74, %c128_75] : memref<18x16x384xbf16, #tpu.memory_space<vmem>>, vector<18x16x128xbf16>
    tpu.vector_store %arg8[%c0_73, %c0_74, %c128_75], %51 {strides = array<i32>} : memref<18x16x384xbf16, #tpu.memory_space<vmem>>, vector<18x16x128xbf16>,
    %c0_76 = arith.constant 0 : index
    %c2_77 = arith.constant 2 : index
    %c0_78 = arith.constant 0 : index
    %53 = vector.load %arg7[%c0_76, %c2_77, %c0_78] : memref<18x18x128xf32, #tpu.memory_space<vmem>>, vector<18x16x128xf32>
    %54 = arith.truncf %53 : vector<18x16x128xf32> to vector<18x16x128xbf16>
    %c0_79 = arith.constant 0 : index
    %c0_80 = arith.constant 0 : index
    %c256_81 = arith.constant 256 : index
    %55 = vector.load %arg8[%c0_79, %c0_80, %c256_81] : memref<18x16x384xbf16, #tpu.memory_space<vmem>>, vector<18x16x128xbf16>
    tpu.vector_store %arg8[%c0_79, %c0_80, %c256_81], %54 {strides = array<i32>} : memref<18x16x384xbf16, #tpu.memory_space<vmem>>, vector<18x16x128xbf16>,
    %c0_82 = arith.constant 0 : index
    %c0_83 = arith.constant 0 : index
    %c0_84 = arith.constant 0 : index
    %56 = vector.load %arg8[%c0_82, %c0_83, %c0_84] : memref<18x16x384xbf16, #tpu.memory_space<vmem>>, vector<16x16x384xbf16>
    %57 = vector.shape_cast %56 : vector<16x16x384xbf16> to vector<256x384xbf16>
    %c0_85 = arith.constant 0 : index
    %c0_86 = arith.constant 0 : index
    %c0_87 = arith.constant 0 : index
    %58 = vector.load %arg3[%c0_85, %c0_86, %c0_87] : memref<3x384x128xbf16, #tpu.memory_space<vmem>>, vector<1x384x128xbf16>
    %59 = vector.shape_cast %58 : vector<1x384x128xbf16> to vector<384x128xbf16>
    %cst_88 = arith.constant dense<0.000000e+00> : vector<256x128xf32>
    %60 = tpu.matmul %57, %59, %cst_88 {dimension_numbers = #tpu.dot_dimension_numbers<[1], [0], [0], [1], [0, 0, 1, 1], [], []>} : vector<256x384xbf16>, vector<384x128xbf16>, vector<256x128xf32> -> vector<256x128xf32>
    %c1_89 = arith.constant 1 : index
    %c0_90 = arith.constant 0 : index
    %c0_91 = arith.constant 0 : index
    %61 = vector.load %arg8[%c1_89, %c0_90, %c0_91] : memref<18x16x384xbf16, #tpu.memory_space<vmem>>, vector<16x16x384xbf16>
    %62 = vector.shape_cast %61 : vector<16x16x384xbf16> to vector<256x384xbf16>
    %c1_92 = arith.constant 1 : index
    %c0_93 = arith.constant 0 : index
    %c0_94 = arith.constant 0 : index
    %63 = vector.load %arg3[%c1_92, %c0_93, %c0_94] : memref<3x384x128xbf16, #tpu.memory_space<vmem>>, vector<1x384x128xbf16>
    %64 = vector.shape_cast %63 : vector<1x384x128xbf16> to vector<384x128xbf16>
    %cst_95 = arith.constant dense<0.000000e+00> : vector<256x128xf32>
    %65 = tpu.matmul %62, %64, %cst_95 {dimension_numbers = #tpu.dot_dimension_numbers<[1], [0], [0], [1], [0, 0, 1, 1], [], []>} : vector<256x384xbf16>, vector<384x128xbf16>, vector<256x128xf32> -> vector<256x128xf32>
    %66 = arith.addf %60, %65 : vector<256x128xf32>
    %c2_96 = arith.constant 2 : index
    %c0_97 = arith.constant 0 : index
    %c0_98 = arith.constant 0 : index
    %67 = vector.load %arg8[%c2_96, %c0_97, %c0_98] : memref<18x16x384xbf16, #tpu.memory_space<vmem>>, vector<16x16x384xbf16>
    %68 = vector.shape_cast %67 : vector<16x16x384xbf16> to vector<256x384xbf16>
    %c2_99 = arith.constant 2 : index
    %c0_100 = arith.constant 0 : index
    %c0_101 = arith.constant 0 : index
    %69 = vector.load %arg3[%c2_99, %c0_100, %c0_101] : memref<3x384x128xbf16, #tpu.memory_space<vmem>>, vector<1x384x128xbf16>
    %70 = vector.shape_cast %69 : vector<1x384x128xbf16> to vector<384x128xbf16>
    %cst_102 = arith.constant dense<0.000000e+00> : vector<256x128xf32>
    %71 = tpu.matmul %68, %70, %cst_102 {dimension_numbers = #tpu.dot_dimension_numbers<[1], [0], [0], [1], [0, 0, 1, 1], [], []>} : vector<256x384xbf16>, vector<384x128xbf16>, vector<256x128xf32> -> vector<256x128xf32>
    %72 = arith.addf %66, %71 : vector<256x128xf32>
    %73 = vector.broadcast %14 : vector<1x128xf32> to vector<256x128xf32>
    %74 = arith.addf %72, %73 : vector<256x128xf32>
    %75 = vector.shape_cast %74 : vector<256x128xf32> to vector<16x16x128xf32>
    %c0_103 = arith.constant 0 : index
    %c0_104 = arith.constant 0 : index
    %c0_105 = arith.constant 0 : index
    %c0_106 = arith.constant 0 : index
    %76 = vector.load %arg1[%c0_103, %c0_104, %c0_105, %c0_106] : memref<1x16x16x128xf32, #tpu.memory_space<vmem>>, vector<1x16x16x128xf32>
    %77 = vector.shape_cast %76 : vector<1x16x16x128xf32> to vector<16x16x128xf32>
    %cst_107 = arith.constant 0.000000e+00 : f32
    %78 = vector.broadcast %cst_107 : f32 to vector<16x16x128xf32>
    %79 = arith.maximumf %77, %78 : vector<16x16x128xf32>
    %80 = arith.addf %75, %79 : vector<16x16x128xf32>
    %c0_108 = arith.constant 0 : index
    %c0_109 = arith.constant 0 : index
    %c0_110 = arith.constant 0 : index
    %c0_111 = arith.constant 0 : index
    %81 = vector.load %arg6[%c0_108, %c0_109, %c0_110, %c0_111] : memref<1x16x16x128xf32, #tpu.memory_space<vmem>>, vector<1x16x16x128xf32>
    %82 = vector.shape_cast %81 : vector<1x16x16x128xf32> to vector<16x16x128xf32>
    %83 = vector.shape_cast %80 : vector<16x16x128xf32> to vector<1x16x16x128xf32>
    tpu.vector_store %arg6[%c0_108, %c0_109, %c0_110, %c0_111], %83 {strides = array<i32>} : memref<1x16x16x128xf32, #tpu.memory_space<vmem>>, vector<1x16x16x128xf32>,
    return
  }
  func.func @transform_0(%arg0: i32) -> (i32, i32, i32, i32) {
    %c0_i32 = arith.constant 0 : i32
    %c0_i32_0 = arith.constant 0 : i32
    %c0_i32_1 = arith.constant 0 : i32
    %c0_i32_2 = arith.constant 0 : i32
    return %arg0, %c0_i32, %c0_i32_0, %c0_i32_1 : i32, i32, i32, i32
  }
  func.func @transform_1(%arg0: i32) -> (i32, i32, i32) {
    %c0_i32 = arith.constant 0 : i32
    %c0_i32_0 = arith.constant 0 : i32
    %c0_i32_1 = arith.constant 0 : i32
    %c0_i32_2 = arith.constant 0 : i32
    return %c0_i32, %c0_i32_0, %c0_i32_1 : i32, i32, i32
  }
  func.func @transform_2(%arg0: i32) -> (i32, i32, i32) {
    %c0_i32 = arith.constant 0 : i32
    %c0_i32_0 = arith.constant 0 : i32
    %c0_i32_1 = arith.constant 0 : i32
    %c0_i32_2 = arith.constant 0 : i32
    return %c0_i32, %c0_i32_0, %c0_i32_1 : i32, i32, i32
  }
  func.func @transform_3(%arg0: i32) -> (i32, i32) {
    %c0_i32 = arith.constant 0 : i32
    %c0_i32_0 = arith.constant 0 : i32
    %c0_i32_1 = arith.constant 0 : i32
    return %c0_i32, %c0_i32_0 : i32, i32
  }
  func.func @transform_4(%arg0: i32) -> (i32, i32) {
    %c0_i32 = arith.constant 0 : i32
    %c0_i32_0 = arith.constant 0 : i32
    %c0_i32_1 = arith.constant 0 : i32
    return %c0_i32, %c0_i32_0 : i32, i32
  }
  func.func @transform_5(%arg0: i32) -> (i32, i32, i32, i32) {
    %c0_i32 = arith.constant 0 : i32
    %c0_i32_0 = arith.constant 0 : i32
    %c0_i32_1 = arith.constant 0 : i32
    %c0_i32_2 = arith.constant 0 : i32
    return %arg0, %c0_i32, %c0_i32_0, %c0_i32_1 : i32, i32, i32, i32
  }
}

</mosaic_0001>

<bundles_post_ra>
// kernel: tpu_custom_call.1
= control target key start
LH: loop header
LB: loop body
LE: loop exit
PB: predicated region body
PF: predicated region fallthrough
CT: control target
= control target key end

     0   :  { %10 = vsyncpa [#allocation5], 0  ;;  %s9800_s0 = inlined_call_operand.hbm [shape: f32[2,16,16,128], index: 0, kind: input, shape index: {}]   ;;  %s9801_s1 = inlined_call_operand.hbm [shape: bf16[3,384,128], index: 1, kind: input, shape index: {}]   ;;  %s9802_s2 = inlined_call_operand.hbm [shape: bf16[3,384,128], index: 2, kind: input, shape index: {}]   ;;  %s9803_s3 = inlined_call_operand.vmem [shape: f32[1,128], index: 3, kind: input, shape index: {}]   ;;  %s9804_s4 = inlined_call_operand.vmem [shape: f32[1,128], index: 4, kind: input, shape index: {}]   ;;  %s9805_s5 = inlined_call_operand.hbm [shape: f32[2,16,16,128], index: 5, kind: output, shape index: {}]  }
   0x1   :  { %12 = vsyncpa [#allocation5 + $0x1], 0 }
   0x2   :  { %13 = vsyncpa [#allocation8], 0 }
   0x3   :  { %14 = vsyncpa [#allocation6], 0 }
   0x4   :  { %16 = vsyncpa [#allocation6 + $0x1], 0  ;;  %s8654_s18 = smov 0   ;;  %s8656_s19 = smov 0  }
   0x5   :  { %s8658_s20 = smov 0   ;;  %s8660_s21 = smov 0  }
   0x6 LB: > { %s8675_s22 = sadd.s32 4294967295, %s8612_s21   ;;  %s6178_s23 = sadd.s32 4294967294, %s8612_s21   ;;  %s8612_s21 = sphi %s8660_s21, %s9821_s21   ;;  %s8608_s20 = sphi %s8658_s20, %s9820_s20   ;;  %s8604_s19 = sphi %s8656_s19, %s9819_s19   ;;  %s8600_s18 = sphi %s8654_s18, %s9818_s18  }
   0x7   : > { %p42_p0 = scmp.ne.s32.totalorder %s8604_s19, %s8600_s18  ;;  %p43_p1 = scmp.eq.s32.totalorder %s8675_s22, 0 }
   0x8   : > { %p150_p2 = scmp.eq.s32.totalorder %s8675_s22, 1  ;;  %p156_p3 = scmp.eq.s32.totalorder %s6178_s23, 1 }
   0x9   : > { %p8684_p4 = por %p43_p1, %p42_p0  ;;  %p6179_p5 = scmp.ge.s32.totalorder %s8612_s21, 1 }
   0xa   : > { %p8689_p6 = por %p156_p3, %p42_p0  ;;  %p163_p7 = scmp.lt.s32.totalorder %s8612_s21, 3 }
   0xb   : > { %s174_s28 = sshll.u32 %s9801_s1, 4  ;;  %s8614_s30 = smov [#allocation7]   ;;  %s175_s28 = int_to_ptr.hbm [resolvable:$true] %s174_s28 }
   0xc   : > { %p8697_p8 = pnand %p6179_p5, %p163_p7  ;;  %s176_s6 = sshll.u32 %s8614_s30, 4  ;;  %s177_s6 = int_to_ptr.vmem [resolvable:$true] %s176_s6 }
   0xd   : > { %s188_s9 = sshll.u32 %s9802_s2, 4  ;;  %s8615_s10 = smov 64   ;;  %s189_s9 = int_to_ptr.hbm [resolvable:$true] %s188_s9 }
   0xe   : > { %p8386_p9 = pneg %p8697_p8  ;;  %s8616_s11 = smov 4  }
   0xf   : > { %s8617_s12 = smov [#allocation9]   ;;  %s8710_s14 = sadd.s32 1, %s8612_s21  }
  0x10   : > { %p8387_p10 = pnand %p8386_p9, %p43_p1  ;;  %s190_s13 = sshll.u32 %s8617_s12, 4  ;;  %s191_s13 = int_to_ptr.vmem [resolvable:$true] %s190_s13 }
  0x11   : > { %s29_s15 = sadd.s32 1, %s8608_s20  ;;  %s26_s16 = ssub.s32 %s8612_s21, %s8710_s14 }
  0x12   : > { %8389 = dma.hbm_to_vmem [thread:$0]  (!%p8387_p10), %s175_s28, 9216, %s177_s6, [#allocation8], %s8615_s10, %s8615_s10, %s8616_s11  }
  0x13   : > { %8392 = dma.hbm_to_vmem [thread:$0]  (!%p8387_p10), %s189_s9, 9216, %s191_s13, [#allocation8], %s8615_s10, %s8615_s10, %s8616_s11  }
  0x14   : > { %p36_p12 = scmp.ne.s32.totalorder %s8608_s20, %s8604_s19  ;;  %p27_p13 = scmp.eq.s32.totalorder %s26_s16, 0 }
  0x15   : > { %p37_p0 = scmp.eq.s32.totalorder %s8612_s21, 0  ;;  %p8403_p5 = scmp.lt.s32.totalorder %s8612_s21, 2 }
  0x16   : > { %p8720_p3 = por %p150_p2, %p36_p12  ;;  %s210_s26 = sand.u32 1, %s8608_s20  }
  0x17   : > { %s8726_s23 = scalar_select %p27_p13, %s8608_s20, %s29_s15  }
  0x18   : > { %p38_p7 = por %p37_p0, %p36_p12  ;;  %s6183_s27 = sshll.u32 %s210_s26, 8 }
  0x19   : > { %s7924_s28 = sshll.u32 %s8612_s21, 8  ;;  %s214_s8 = scalar_lea.vmem [#allocation4], %s6183_s27 }
  0x1a   : > { %s219_s7 = scalar_lea.hbm %s9800_s0, %s7924_s28  ;;  %s222_s9 = sshll.u32 %s214_s8, 4  ;;  %s223_s9 = int_to_ptr.vmem [resolvable:$true] %s222_s9 }
  0x1b   : > { %s220_s10 = sshll.u32 %s219_s7, 4  ;;  %p8733_p2 = pnand %p8403_p5, %p38_p7  ;;  %s221_s10 = int_to_ptr.hbm [resolvable:$true] %s220_s10 }
  0x1c   : > { %s211_s12 = scalar_lea.sflag [#allocation5], %s210_s26  ;;  %s8512_s13 = sshra.s32 %s221_s10, 4  ;;  %s8513_s13 = int_to_ptr.hbm [resolvable:$true] %s8512_s13 }
  0x1d   : > { %s8514_s15 = scalar_lea.hbm %s8513_s13, 256  ;;  %p8516_p10 = pneg %p8733_p2 }
  0x1e   : > { %p8515_p9 = scmp.ne.s32.totalorder %s8513_s13, %s8514_s15  ;;  %s8519_s28 = scalar_lea.hbm %s9800_s0, 512 }
  0x1f   : > { %p8520_p0 = scmp.lt.s32.totalorder %s8513_s13, %s9800_s0  ;;  %p8521_p5 = scmp.lt.s32.totalorder %s8519_s28, %s8514_s15 }
  0x20   : > { %p8517_p12 = pnand %p8516_p10, %p8515_p9 }
  0x21   : > { %p8522_p7 = por %p8521_p5, %p8520_p0 }
  0x22   : > { %p8518_p13 = pneg %p8517_p12 }
  0x24   : > { %p8523_p11 = pnand %p8522_p7, %p8518_p13 }
  0x26   : > { %8526 = shalt.err (!%p8523_p11)
}
  0x27   : > { %s8618_s26 = smov 128   ;;  %s8619_s7 = smov 8  }
  0x28   : > { %8396 = dma.hbm_to_vmem [thread:$0]  (!%p8733_p2), %s221_s10, 4096, %s223_s9, %s211_s12, %s8618_s26, %s8618_s26, %s8619_s7  }
  0x29   : > { %234 = sbr.rel (%p8697_p8) target bundleno = 1568 (0x620), region = 40 }
  0x2e   : > { %s8750_s8 = sand.u32 1, %s8604_s19  }
  0x2f   : > { %s6187_s13 = sshll.u32 %s8750_s8, 8  ;;  %s237_s15 = scalar_lea.sflag [#allocation5], %s8750_s8 }
  0x30   : > { %s8756_s16 = scalar_lea.vmem [#allocation4], %s6187_s13 }
  0x31   : > { %8587 = dma.done.wait (%p8684_p4), %s237_s15, 4096  }
  0x32   : > { %8589 = vsyncadd (%p8684_p4), %s237_s15, 4294963200 }
  0x33   : > { %8591 = dma.done.wait (%p43_p1), [#allocation8], 18432  }
  0x34   : > { %8593 = vsyncadd (%p43_p1), [#allocation8], 4294948864  ;;  %v8620_v0 = vmov 0.0   ;;  %v8052_v1 = vld [vmem:[#allocation7 + $0xf8] sm:$0xff]  ;;  %v8051_v3 = vld [vmem:[#allocation7 + $0xf0] sm:$0xff]  ;;  %s9568_s27 = scalar_lea.vmem [#allocation10], %s6187_s13 }
  0x35   : > { %286 = vst [vmem:[#allocation2 + $0x18] sm:$0x1] %v8620_v0  ;;  %v8060_v2 = vld [vmem:[#allocation7 + $0x138] sm:$0xff]  ;;  %1366 = vmatpush.bf16.msra.mxu0 %v8052_v1  ;;  %8358 = vmatpush.bf16.msra.mxu2 %v8052_v1  ;;  %v8059_v4 = vld [vmem:[#allocation7 + $0x130] sm:$0xff]  ;;  %v318_v5 = vld [vmem:[%s8756_s16] sm:$0xff]  ;;  %s8357_s28 = sshll.u32 %s8675_s22, 8 }
  0x36   : > { %278 = vst [vmem:[#allocation2] sm:$0xff] %v8620_v0  ;;  %1455 = vmatpush.bf16.msra.mxu1 %v8060_v2  ;;  %8366 = vmatpush.bf16.msra.mxu3 %v8060_v2  ;;  %v319_v6 = vld [vmem:[%s8756_s16 + $0x8] sm:$0xff]  ;;  %v8780_v8 = vmax.f32 %v318_v5, 0.0  ;;  %v8049_v11 = vld [vmem:[#allocation7 + $0xe0] sm:$0xff]  ;;  %v8048_v13 = vld [vmem:[#allocation7 + $0xd8] sm:$0xff]  ;;  %s6082_s26 = scalar_lea.hbm %s9805_s5, %s8357_s28  ;;  %s6083_s7 = sshll.u32 %s9568_s27, 4  ;;  %s6084_s7 = int_to_ptr.vmem [resolvable:$true] %s6083_s7 }
  0x37   : > { %279 = vst [vmem:[#allocation2 + $0x8] sm:$0xff] %v8620_v0  ;;  %v8050_v7 = vld [vmem:[#allocation7 + $0xe8] sm:$0xff]  ;;  %v8782_v9 = vmax.f32 %v319_v6, 0.0  ;;  %v8057_v12 = vld [vmem:[#allocation7 + $0x120] sm:$0xff]  ;;  %v8056_v14 = vld [vmem:[#allocation7 + $0x118] sm:$0xff]  ;;  %s6085_s22 = sshll.u32 %s6082_s26, 4  ;;  %s6086_s22 = int_to_ptr.hbm [resolvable:$true] %s6085_s22 }
  0x38   : > { %280 = vst [vmem:[#allocation2 + $0x10] sm:$0x3] %v8620_v0  ;;  %v8058_v10 = vld [vmem:[#allocation7 + $0x128] sm:$0xff]  ;;  %v8047_v19 = vld [vmem:[#allocation7 + $0xd0] sm:$0xff]  ;;  %v8045_v23 = vld [vmem:[#allocation7 + $0xc0] sm:$0xff]  ;;  %v562_v35 = vpack.c.bf16 %v8780_v8, %v8780_v8  ;;  %s6071_s13 = scalar_lea.sflag [#allocation6], %s8750_s8 }
  0x39   : > { %282 = vst [vmem:[#allocation2 + $0x198] sm:$0xff] %v8620_v0  ;;  %1367 = vmatpush.bf16.msra.mxu0 %v8051_v3  ;;  %8359 = vmatpush.bf16.msra.mxu2 %v8051_v3  ;;  %v8055_v20 = vld [vmem:[#allocation7 + $0x110] sm:$0xff]  ;;  %v8046_v21 = vld [vmem:[#allocation7 + $0xc8] sm:$0xff]  ;;  %v8053_v26 = vld [vmem:[#allocation7 + $0x100] sm:$0xff]  ;;  %v563_v36 = vpack.c.bf16 %v8782_v9, %v8782_v9  ;;  %s8556_s15 = sshra.s32 %s6086_s22, 4  ;;  %s8562_s9 = scalar_lea.hbm %s9805_s5, 512  ;;  %s8557_s15 = int_to_ptr.hbm [resolvable:$true] %s8556_s15 }
  0x3a   : > { %283 = vst [vmem:[#allocation2 + $0x1a0] sm:$0xff] %v8620_v0  ;;  %1456 = vmatpush.bf16.msra.mxu1 %v8059_v4  ;;  %8367 = vmatpush.bf16.msra.mxu3 %v8059_v4  ;;  %v8054_v22 = vld [vmem:[#allocation7 + $0x108] sm:$0xff]  ;;  %v8068_v27 = vld [vmem:[#allocation7 + $0x178] sm:$0xff]  ;;  %v334_v30 = vld [vmem:[%s8756_s16 + $0x80] sm:$0xff]  ;;  %p8563_p11 = scmp.lt.s32.totalorder %s8557_s15, %s9805_s5 }
  0x3b   : > { %284 = vst [vmem:[#allocation2 + $0x1a8] sm:$0x3] %v8620_v0  ;;  %v7980_v28 = vld [vmem:[#allocation7 + $0x38] sm:$0xff]  ;;  %v335_v31 = vld [vmem:[%s8756_s16 + $0x88] sm:$0xff]  ;;  %v366_v33 = vmax.f32 %v334_v30, 0.0  ;;  %v320_v37 = vld [vmem:[%s8756_s16 + $0x10] sm:$0xff] }
  0x3c   : > { %287 = vst [vmem:[#allocation2 + $0x30] sm:$0x1] %v8620_v0  ;;  %v7988_v32 = vld [vmem:[#allocation7 + $0x78] sm:$0xff]  ;;  %v367_v34 = vmax.f32 %v335_v31, 0.0  ;;  %v336_v41 = vld [vmem:[%s8756_s16 + $0x90] sm:$0xff]  ;;  %v352_v42 = vmax.f32 %v320_v37, 0.0 }
  0x3d   : > { %288 = vst [vmem:[#allocation2 + $0x48] sm:$0x1] %v8620_v0  ;;  %1368 = vmatpush.bf16.msra.mxu0 %v8050_v7  ;;  %8360 = vmatpush.bf16.msra.mxu2 %v8050_v7  ;;  %v578_v38 = vpack.c.bf16 %v366_v33, %v366_v33  ;;  %v321_v39 = vld [vmem:[%s8756_s16 + $0x18] sm:$0xff]  ;;  %v368_v45 = vmax.f32 %v336_v41, 0.0  ;;  %v8067_v47 = vld [vmem:[#allocation7 + $0x170] sm:$0xff]  ;;  %v322_v1 = vld [vmem:[%s8756_s16 + $0x20] sm:$0xff] }
  0x3e   : > { %289 = vst [vmem:[#allocation2 + $0x60] sm:$0x1] %v8620_v0  ;;  %1457 = vmatpush.bf16.msra.mxu1 %v8058_v10  ;;  %8368 = vmatpush.bf16.msra.mxu3 %v8058_v10  ;;  %v579_v40 = vpack.c.bf16 %v367_v34, %v367_v34  ;;  %v337_v43 = vld [vmem:[%s8756_s16 + $0x98] sm:$0xff]  ;;  %v353_v44 = vmax.f32 %v321_v39, 0.0  ;;  %v7979_v48 = vld [vmem:[#allocation7 + $0x30] sm:$0xff]  ;;  %v564_v53 = vpack.c.bf16 %v352_v42, %v352_v42  ;;  %v323_v4 = vld [vmem:[%s8756_s16 + $0x28] sm:$0xff] }
  0x3f   : > { %290 = vst [vmem:[#allocation2 + $0x78] sm:$0x1] %v8620_v0  ;;  %v369_v46 = vmax.f32 %v337_v43, 0.0  ;;  %v7987_v49 = vld [vmem:[#allocation7 + $0x70] sm:$0xff]  ;;  %v580_v58 = vpack.c.bf16 %v368_v45, %v368_v45  ;;  %v338_v7 = vld [vmem:[%s8756_s16 + $0xa0] sm:$0xff]  ;;  %v354_v10 = vmax.f32 %v322_v1, 0.0 }
  0x40   : > { %291 = vst [vmem:[#allocation2 + $0x90] sm:$0x1] %v8620_v0  ;;  %v565_v56 = vpack.c.bf16 %v353_v44, %v353_v44  ;;  %v341_v43 = vld [vmem:[%s8756_s16 + $0xb8] sm:$0xff] }
  0x41   : > { %292 = vst [vmem:[#allocation2 + $0xa8] sm:$0x1] %v8620_v0  ;;  %1369 = vmatpush.bf16.msra.mxu0 %v8049_v11  ;;  %8361 = vmatpush.bf16.msra.mxu2 %v8049_v11  ;;  %v581_v61 = vpack.c.bf16 %v369_v46, %v369_v46  ;;  %v339_v11 = vld [vmem:[%s8756_s16 + $0xa8] sm:$0xff] }
  0x42   : > { %293 = vst [vmem:[#allocation2 + $0xc0] sm:$0x1] %v8620_v0  ;;  %1458 = vmatpush.bf16.msra.mxu1 %v8057_v12  ;;  %8369 = vmatpush.bf16.msra.mxu3 %v8057_v12 }
  0x43   : > { %382 = vst [vmem:[#allocation2 + $0x19] sm:$0xff] %v8780_v8 }
  0x44   : > { %383 = vst [vmem:[#allocation2 + $0x21] sm:$0xff] %v8782_v9 }
  0x45   : > { %294 = vst [vmem:[#allocation2 + $0xd8] sm:$0x1] %v8620_v0  ;;  %1370 = vmatpush.bf16.msra.mxu0 %v8048_v13  ;;  %8362 = vmatpush.bf16.msra.mxu2 %v8048_v13 }
  0x46   : > { %295 = vst [vmem:[#allocation2 + $0xf0] sm:$0x1] %v8620_v0  ;;  %1459 = vmatpush.bf16.msra.mxu1 %v8056_v14  ;;  %8370 = vmatpush.bf16.msra.mxu3 %v8056_v14  ;;  %v355_v14 = vmax.f32 %v323_v4, 0.0  ;;  %v7977_v4 = vld [vmem:[#allocation7 + $0x20] sm:$0xff] }
  0x47   : > { %296 = vst [vmem:[#allocation2 + $0x108] sm:$0x1] %v8620_v0 }
  0x48   : > { %297 = vst [vmem:[#allocation2 + $0x120] sm:$0x1] %v8620_v0 }
  0x49   : > { %298 = vst [vmem:[#allocation2 + $0x138] sm:$0x1] %v8620_v0  ;;  %1371 = vmatpush.bf16.msra.mxu0 %v8047_v19  ;;  %8363 = vmatpush.bf16.msra.mxu2 %v8047_v19  ;;  %v566_v19 = vpack.c.bf16 %v354_v10, %v354_v10 }
  0x4a   : > { %v418_v15 = vld [vmem:[#allocation2 + $0x18] sm:$0xff]  ;;  %299 = vst [vmem:[#allocation2 + $0x150] sm:$0x1] %v8620_v0  ;;  %1460 = vmatpush.bf16.msra.mxu1 %v8055_v20  ;;  %8371 = vmatpush.bf16.msra.mxu3 %v8055_v20  ;;  %v324_v20 = vld [vmem:[%s8756_s16 + $0x30] sm:$0xff] }
  0x4b   : > { %v419_v16 = vld [vmem:[#allocation2 + $0x20] sm:$0xff]  ;;  %v454_v17 = vpack.c.bf16 %v418_v15, %v418_v15  ;;  %300 = vst [vmem:[#allocation2 + $0x168] sm:$0x1] %v8620_v0 }
  0x4c   : > { %v455_v18 = vpack.c.bf16 %v419_v16, %v419_v16  ;;  %301 = vst [vmem:[#allocation2 + $0x180] sm:$0x1] %v8620_v0  ;;  %v370_v16 = vmax.f32 %v338_v7, 0.0 }
  0x4d   : > { %490 = vst [vmem:[#allocation3 + $0x18] sm:$0xf] %v454_v17  ;;  %1372 = vmatpush.bf16.msra.mxu0 %v8046_v21  ;;  %8364 = vmatpush.bf16.msra.mxu2 %v8046_v21  ;;  %v567_v21 = vpack.c.bf16 %v355_v14, %v355_v14 }
  0x4e   : > { %491 = vst [vmem:[#allocation3 + $0x24] sm:$0xf] %v455_v18  ;;  %1461 = vmatpush.bf16.msra.mxu1 %v8054_v22  ;;  %8372 = vmatpush.bf16.msra.mxu3 %v8054_v22  ;;  %v371_v18 = vmax.f32 %v339_v11, 0.0  ;;  %v8066_v22 = vld [vmem:[#allocation7 + $0x168] sm:$0xff] }
  0x4f   : > { %302 = vst [vmem:[#allocation2 + $0x29] sm:$0x1] %v8620_v0  ;;  %v343_v11 = vld [vmem:[%s8756_s16 + $0xc8] sm:$0xff] }
  0x50   : > { %303 = vst [vmem:[#allocation2 + $0x41] sm:$0x1] %v8620_v0  ;;  %v583_v31 = vpack.c.bf16 %v371_v18, %v371_v18 }
  0x51   : > { %304 = vst [vmem:[#allocation2 + $0x59] sm:$0x1] %v8620_v0  ;;  %1373 = vmatpush.bf16.msra.mxu0 %v8045_v23  ;;  %8365 = vmatpush.bf16.msra.mxu2 %v8045_v23  ;;  %v7978_v23 = vld [vmem:[#allocation7 + $0x28] sm:$0xff] }
  0x52   : > { %305 = vst [vmem:[#allocation2 + $0x71] sm:$0x1] %v8620_v0  ;;  %1462 = vmatpush.bf16.msra.mxu1 %v8053_v26  ;;  %8373 = vmatpush.bf16.msra.mxu3 %v8053_v26 }
  0x53   : > { %306 = vst [vmem:[#allocation2 + $0x89] sm:$0x1] %v8620_v0 }
  0x54   : > { %307 = vst [vmem:[#allocation2 + $0xa1] sm:$0x1] %v8620_v0  ;;  %v6193_v24 = vld [vmem:[#allocation3 + $0x18] sm:$0xf] }
  0x55   : > { %v7998_v25 = vld [vmem:[#allocation3 + $0x20] sm:$0xf0]  ;;  %308 = vst [vmem:[#allocation2 + $0xb9] sm:$0x1] %v8620_v0  ;;  %1544 = vmatpush.bf16.msrb.mxu2 %v8068_v27  ;;  %2122 = vmatpush.bf16.msrb.mxu0 %v7988_v32  ;;  %v582_v27 = vpack.c.bf16 %v370_v16, %v370_v16  ;;  %v356_v32 = vmax.f32 %v324_v20, 0.0 }
  0x56   : > { %309 = vst [vmem:[#allocation2 + $0xd1] sm:$0x1] %v8620_v0  ;;  %v6194_v29 = vor.u32 %v7998_v25, %v6193_v24  ;;  %2033 = vmatpush.bf16.msrb.mxu3 %v7980_v28  ;;  %v325_v24 = vld [vmem:[%s8756_s16 + $0x38] sm:$0xff]  ;;  %v7986_v28 = vld [vmem:[#allocation7 + $0x68] sm:$0xff] }
  0x57   : > { %310 = vst [vmem:[#allocation2 + $0xe9] sm:$0x1] %v8620_v0  ;;  %v357_v37 = vmax.f32 %v325_v24, 0.0 }
  0x58   : > { %311 = vst [vmem:[#allocation2 + $0x101] sm:$0x1] %v8620_v0  ;;  %1374 = vmatmul.bf16.vlgmr.msra.gmra.mxu0 %v6194_v29 }
  0x59   : > { %312 = vst [vmem:[#allocation2 + $0x119] sm:$0x1] %v8620_v0  ;;  %1545 = vmatpush.bf16.msrb.mxu2 %v8067_v47  ;;  %2123 = vmatpush.bf16.msrb.mxu0 %v7987_v49 }
  0x5a   : > { %313 = vst [vmem:[#allocation2 + $0x131] sm:$0x1] %v8620_v0  ;;  %2034 = vmatpush.bf16.msrb.mxu3 %v7979_v48 }
  0x5b   : > { %314 = vst [vmem:[#allocation2 + $0x149] sm:$0x1] %v8620_v0 }
  0x5c   : > { %315 = vst [vmem:[#allocation2 + $0x161] sm:$0x1] %v8620_v0 }
  0x5d   : > { %316 = vst [vmem:[#allocation2 + $0x179] sm:$0x1] %v8620_v0  ;;  %1546 = vmatpush.bf16.msrb.mxu2 %v8066_v22  ;;  %2124 = vmatpush.bf16.msrb.mxu0 %v7986_v28  ;;  %v328_v28 = vld [vmem:[%s8756_s16 + $0x50] sm:$0xff] }
  0x5e   : > { %317 = vst [vmem:[#allocation2 + $0x191] sm:$0x1] %v8620_v0  ;;  %2035 = vmatpush.bf16.msrb.mxu3 %v7978_v23 }
  0x5f   : > { %398 = vst [vmem:[#allocation2 + $0xd9] sm:$0xff] %v366_v33 }
  0x60   : > { %399 = vst [vmem:[#allocation2 + $0xe1] sm:$0xff] %v367_v34 }
  0x61   : > { %598 = vst [vmem:[#allocation3 + $0x1c] sm:$0xf] %v562_v35 }
  0x62   : > { %599 = vst [vmem:[#allocation3 + $0x28] sm:$0xf] %v563_v36  ;;  %2036 = vmatpush.bf16.msrb.mxu3 %v7977_v4 }
  0x63   : > { %614 = vst [vmem:[#allocation3 + $0xdc] sm:$0xf] %v578_v38 }
  0x64   : > { %615 = vst [vmem:[#allocation3 + $0xe8] sm:$0xf] %v579_v40  ;;  %v340_v40 = vld [vmem:[%s8756_s16 + $0xb0] sm:$0xff] }
  0x65   : > { %384 = vst [vmem:[#allocation2 + $0x31] sm:$0xff] %v352_v42 }
  0x66   : > { %v434_v50 = vld [vmem:[#allocation2 + $0xd8] sm:$0xff]  ;;  %385 = vst [vmem:[#allocation2 + $0x39] sm:$0xff] %v353_v44 }
  0x67   : > { %v435_v51 = vld [vmem:[#allocation2 + $0xe0] sm:$0xff]  ;;  %v470_v52 = vpack.c.bf16 %v434_v50, %v434_v50  ;;  %400 = vst [vmem:[#allocation2 + $0xf1] sm:$0xff] %v368_v45  ;;  %v372_v50 = vmax.f32 %v340_v40, 0.0 }
  0x68   : > { %v471_v54 = vpack.c.bf16 %v435_v51, %v435_v51  ;;  %v7997_v55 = vld [vmem:[#allocation3 + $0x1c] sm:$0xf]  ;;  %401 = vst [vmem:[#allocation2 + $0xf9] sm:$0xff] %v369_v46 }
  0x69   : > { %506 = vst [vmem:[#allocation3 + $0xd8] sm:$0xf] %v470_v52  ;;  %v6195_v57 = vld [vmem:[#allocation3 + $0x24] sm:$0xf0]  ;;  %v373_v52 = vmax.f32 %v341_v43, 0.0 }
  0x6a   : > { %507 = vst [vmem:[#allocation3 + $0xe4] sm:$0xf] %v471_v54  ;;  %v6198_v59 = vor.u32 %v7997_v55, %v6195_v57  ;;  %v8021_v60 = vld [vmem:[#allocation3 + $0xdc] sm:$0xf]  ;;  %v569_v55 = vpack.c.bf16 %v357_v37, %v357_v37  ;;  %v326_v57 = vld [vmem:[%s8756_s16 + $0x40] sm:$0xff]  ;;  %v8064_v43 = vld [vmem:[#allocation7 + $0x158] sm:$0xff] }
  0x6b   : > { %v6291_v62 = vld [vmem:[#allocation3 + $0xe4] sm:$0xf0]  ;;  %600 = vst [vmem:[#allocation3 + $0x34] sm:$0xf] %v564_v53  ;;  %v568_v53 = vpack.c.bf16 %v356_v32, %v356_v32  ;;  %v358_v7 = vmax.f32 %v326_v57, 0.0 }
  0x6c   : > { %1463 = vmatmul.bf16.vlgmr.msra.gmra.mxu1 %v6198_v59  ;;  %v6294_v63 = vor.u32 %v8021_v60, %v6291_v62  ;;  %v420_v0 = vld [vmem:[#allocation2 + $0x30] sm:$0xff]  ;;  %601 = vst [vmem:[#allocation3 + $0x40] sm:$0xf] %v565_v56  ;;  %v584_v62 = vpack.c.bf16 %v372_v50, %v372_v50 }
  0x6d   : > { %v421_v2 = vld [vmem:[#allocation2 + $0x38] sm:$0xff]  ;;  %v456_v3 = vpack.c.bf16 %v420_v0, %v420_v0  ;;  %616 = vst [vmem:[#allocation3 + $0xf4] sm:$0xf] %v580_v58  ;;  %v570_v22 = vpack.c.bf16 %v358_v7, %v358_v7 }
  0x6e   : > { %1503 = vmatmul.bf16.vlgmr.msra.gmra.mxu3 %v6294_v63  ;;  %v457_v5 = vpack.c.bf16 %v421_v2, %v421_v2  ;;  %v436_v6 = vld [vmem:[#allocation2 + $0xf0] sm:$0xff]  ;;  %617 = vst [vmem:[#allocation3 + $0x100] sm:$0xf] %v581_v61  ;;  %v327_v63 = vld [vmem:[%s8756_s16 + $0x48] sm:$0xff]  ;;  %v585_v2 = vpack.c.bf16 %v373_v52, %v373_v52 }
  0x6f   : > { %492 = vst [vmem:[#allocation3 + $0x30] sm:$0xf] %v456_v3  ;;  %v437_v8 = vld [vmem:[#allocation2 + $0xf8] sm:$0xff]  ;;  %v472_v9 = vpack.c.bf16 %v436_v6, %v436_v6  ;;  %v8065_v3 = vld [vmem:[#allocation7 + $0x160] sm:$0xff] }
  0x70   : > { %v6289_v12 = vld [vmem:[#allocation3 + $0xd8] sm:$0xf]  ;;  %493 = vst [vmem:[#allocation3 + $0x3c] sm:$0xf] %v457_v5  ;;  %v473_v13 = vpack.c.bf16 %v437_v8, %v437_v8  ;;  %v7985_v6 = vld [vmem:[#allocation7 + $0x60] sm:$0xff]  ;;  %1547 = vmatpush.bf16.msrb.mxu2 %v8065_v3 }
  0x71   : > { %v8022_v15 = vld [vmem:[#allocation3 + $0xe0] sm:$0xf0]  ;;  %508 = vst [vmem:[#allocation3 + $0xf0] sm:$0xf] %v472_v9  ;;  %v359_v9 = vmax.f32 %v327_v63, 0.0  ;;  %2125 = vmatpush.bf16.msrb.mxu0 %v7985_v6  ;;  %v331_v3 = vld [vmem:[%s8756_s16 + $0x68] sm:$0xff] }
  0x72   : > { %v6290_v17 = vor.u32 %v8022_v15, %v6289_v12  ;;  %509 = vst [vmem:[#allocation3 + $0xfc] sm:$0xf] %v473_v13  ;;  %v8000_v25 = vld [vmem:[#allocation3 + $0x34] sm:$0xf]  ;;  %v363_v6 = vmax.f32 %v331_v3, 0.0 }
  0x73   : > { %386 = vst [vmem:[#allocation2 + $0x49] sm:$0xff] %v354_v10  ;;  %v6207_v26 = vld [vmem:[#allocation3 + $0x3c] sm:$0xf0]  ;;  %v342_v10 = vld [vmem:[%s8756_s16 + $0xc0] sm:$0xff]  ;;  %v571_v23 = vpack.c.bf16 %v359_v9, %v359_v9 }
  0x74   : > { %1414 = vmatmul.bf16.vlgmr.msra.gmra.mxu2 %v6290_v17  ;;  %387 = vst [vmem:[#allocation2 + $0x51] sm:$0xff] %v355_v14  ;;  %v8024_v30 = vld [vmem:[#allocation3 + $0xf4] sm:$0xf]  ;;  %v6210_v36 = vor.u32 %v8000_v25, %v6207_v26 }
  0x75   : > { %402 = vst [vmem:[#allocation2 + $0x109] sm:$0xff] %v370_v16  ;;  %v6303_v34 = vld [vmem:[#allocation3 + $0xfc] sm:$0xf0]  ;;  %1548 = vmatpush.bf16.msrb.mxu2 %v8064_v43 }
  0x76   : > { %v6205_v29 = vld [vmem:[#allocation3 + $0x30] sm:$0xf]  ;;  %403 = vst [vmem:[#allocation2 + $0x111] sm:$0xff] %v371_v18  ;;  %v6306_v38 = vor.u32 %v8024_v30, %v6303_v34  ;;  %v374_v18 = vmax.f32 %v342_v10, 0.0  ;;  %v360_v34 = vmax.f32 %v328_v28, 0.0 }
  0x77   : > { %v8001_v33 = vld [vmem:[#allocation3 + $0x38] sm:$0xf0]  ;;  %602 = vst [vmem:[#allocation3 + $0x4c] sm:$0xf] %v566_v19 }
  0x78   : > { %v6206_v35 = vor.u32 %v8001_v33, %v6205_v29  ;;  %603 = vst [vmem:[#allocation3 + $0x58] sm:$0xf] %v567_v21  ;;  %v6301_v44 = vld [vmem:[#allocation3 + $0xf0] sm:$0xf]  ;;  %v375_v21 = vmax.f32 %v343_v11, 0.0  ;;  %v586_v26 = vpack.c.bf16 %v374_v18, %v374_v18  ;;  %v329_v29 = vld [vmem:[%s8756_s16 + $0x58] sm:$0xff] }
  0x79   : > { %618 = vst [vmem:[#allocation3 + $0x10c] sm:$0xf] %v582_v27  ;;  %v8025_v47 = vld [vmem:[#allocation3 + $0xf8] sm:$0xf0] }
  0x7a   : > { %1379 = vmatmul.bf16.gmra.mxu0 %v6206_v35  ;;  %v422_v39 = vld [vmem:[#allocation2 + $0x48] sm:$0xff]  ;;  %619 = vst [vmem:[#allocation3 + $0x118] sm:$0xf] %v583_v31  ;;  %v6302_v54 = vor.u32 %v8025_v47, %v6301_v44  ;;  %v587_v27 = vpack.c.bf16 %v375_v21, %v375_v21  ;;  %v7976_v44 = vld [vmem:[#allocation7 + $0x18] sm:$0xff] }
  0x7b   : > { %v423_v41 = vld [vmem:[#allocation2 + $0x50] sm:$0xff]  ;;  %v458_v42 = vpack.c.bf16 %v422_v39, %v422_v39  ;;  %388 = vst [vmem:[#allocation2 + $0x61] sm:$0xff] %v356_v32  ;;  %2037 = vmatpush.bf16.msrb.mxu3 %v7976_v44 }
  0x7c   : > { %1468 = vmatmul.bf16.gmra.mxu1 %v6210_v36  ;;  %v459_v45 = vpack.c.bf16 %v423_v41, %v423_v41  ;;  %v438_v46 = vld [vmem:[#allocation2 + $0x108] sm:$0xff]  ;;  %389 = vst [vmem:[#allocation2 + $0x69] sm:$0xff] %v357_v37  ;;  %v361_v37 = vmax.f32 %v329_v29, 0.0  ;;  %v345_v41 = vld [vmem:[%s8756_s16 + $0xd8] sm:$0xff] }
  0x7d   : > { %494 = vst [vmem:[#allocation3 + $0x48] sm:$0xf] %v458_v42  ;;  %v439_v48 = vld [vmem:[#allocation2 + $0x110] sm:$0xff]  ;;  %v474_v49 = vpack.c.bf16 %v438_v46, %v438_v46 }
  0x7e   : > { %1508 = vmatmul.bf16.gmra.mxu3 %v6306_v38  ;;  %495 = vst [vmem:[#allocation3 + $0x54] sm:$0xf] %v459_v45  ;;  %v475_v51 = vpack.c.bf16 %v439_v48, %v439_v48  ;;  %v8003_v58 = vld [vmem:[#allocation3 + $0x4c] sm:$0xf]  ;;  %v344_v38 = vld [vmem:[%s8756_s16 + $0xd0] sm:$0xff]  ;;  %v573_v57 = vpack.c.bf16 %v361_v37, %v361_v37 }
  0x7f   : > { %510 = vst [vmem:[#allocation3 + $0x108] sm:$0xf] %v474_v49  ;;  %v6219_v59 = vld [vmem:[#allocation3 + $0x54] sm:$0xf0]  ;;  %v7984_v48 = vld [vmem:[#allocation7 + $0x58] sm:$0xff]  ;;  %v376_v49 = vmax.f32 %v344_v38, 0.0 }
  0x80   : > { %511 = vst [vmem:[#allocation3 + $0x114] sm:$0xf] %v475_v51  ;;  %v8027_v12 = vld [vmem:[#allocation3 + $0x10c] sm:$0xf]  ;;  %v6222_v14 = vor.u32 %v8003_v58, %v6219_v59  ;;  %2126 = vmatpush.bf16.msrb.mxu0 %v7984_v48 }
  0x81   : > { %404 = vst [vmem:[#allocation2 + $0x121] sm:$0xff] %v372_v50  ;;  %v6315_v13 = vld [vmem:[#allocation3 + $0x114] sm:$0xf0]  ;;  %v588_v58 = vpack.c.bf16 %v376_v49, %v376_v49 }
  0x82   : > { %v424_v56 = vld [vmem:[#allocation2 + $0x60] sm:$0xff]  ;;  %405 = vst [vmem:[#allocation2 + $0x129] sm:$0xff] %v373_v52  ;;  %v6318_v19 = vor.u32 %v8027_v12, %v6315_v13  ;;  %v377_v52 = vmax.f32 %v345_v41, 0.0  ;;  %v332_v41 = vld [vmem:[%s8756_s16 + $0x70] sm:$0xff] }
  0x83   : > { %v425_v60 = vld [vmem:[#allocation2 + $0x68] sm:$0xff]  ;;  %v460_v61 = vpack.c.bf16 %v424_v56, %v424_v56  ;;  %604 = vst [vmem:[#allocation3 + $0x64] sm:$0xf] %v568_v53  ;;  %v572_v56 = vpack.c.bf16 %v360_v34, %v360_v34  ;;  %v364_v44 = vmax.f32 %v332_v41, 0.0  ;;  %v7992_v41 = vld [vmem:[#allocation7 + $0x98] sm:$0xff] }
  0x84   : > { %1419 = vmatmul.bf16.gmra.mxu2 %v6302_v54  ;;  %v6217_v0 = vld [vmem:[#allocation3 + $0x48] sm:$0xf]  ;;  %v461_v1 = vpack.c.bf16 %v425_v60, %v425_v60  ;;  %605 = vst [vmem:[#allocation3 + $0x70] sm:$0xf] %v569_v55  ;;  %v589_v60 = vpack.c.bf16 %v377_v52, %v377_v52 }
  0x85   : > { %v8004_v5 = vld [vmem:[#allocation3 + $0x50] sm:$0xf0]  ;;  %496 = vst [vmem:[#allocation3 + $0x60] sm:$0xf] %v460_v61 }
  0x86   : > { %v6218_v8 = vor.u32 %v8004_v5, %v6217_v0  ;;  %497 = vst [vmem:[#allocation3 + $0x6c] sm:$0xf] %v461_v1  ;;  %v6313_v24 = vld [vmem:[#allocation3 + $0x108] sm:$0xf] }
  0x87   : > { %620 = vst [vmem:[#allocation3 + $0x124] sm:$0xf] %v584_v62  ;;  %v8028_v25 = vld [vmem:[#allocation3 + $0x110] sm:$0xf0] }
  0x88   : > { %v440_v15 = vld [vmem:[#allocation2 + $0x120] sm:$0xff]  ;;  %621 = vst [vmem:[#allocation3 + $0x130] sm:$0xf] %v585_v2  ;;  %v6314_v30 = vor.u32 %v8028_v25, %v6313_v24 }
  0x89   : > { %v441_v16 = vld [vmem:[#allocation2 + $0x128] sm:$0xff]  ;;  %v476_v17 = vpack.c.bf16 %v440_v15, %v440_v15  ;;  %390 = vst [vmem:[#allocation2 + $0x79] sm:$0xff] %v358_v7  ;;  %v330_v2 = vld [vmem:[%s8756_s16 + $0x60] sm:$0xff] }
  0x8a   : > { %1384 = vmatmul.bf16.gmra.mxu0 %v6218_v8  ;;  %v477_v20 = vpack.c.bf16 %v441_v16, %v441_v16  ;;  %391 = vst [vmem:[#allocation2 + $0x81] sm:$0xff] %v359_v9  ;;  %v8006_v40 = vld [vmem:[#allocation3 + $0x64] sm:$0xf]  ;;  %v362_v5 = vmax.f32 %v330_v2, 0.0  ;;  %v346_v7 = vld [vmem:[%s8756_s16 + $0xe0] sm:$0xff]  ;;  %v347_v8 = vld [vmem:[%s8756_s16 + $0xe8] sm:$0xff] }
  0x8b   : > { %512 = vst [vmem:[#allocation3 + $0x120] sm:$0xf] %v476_v17  ;;  %v6231_v45 = vld [vmem:[#allocation3 + $0x6c] sm:$0xf0]  ;;  %v378_v13 = vmax.f32 %v346_v7, 0.0  ;;  %v379_v15 = vmax.f32 %v347_v8, 0.0 }
  0x8c   : > { %1473 = vmatmul.bf16.gmra.mxu1 %v6222_v14  ;;  %513 = vst [vmem:[#allocation3 + $0x12c] sm:$0xf] %v477_v20  ;;  %v6229_v35 = vld [vmem:[#allocation3 + $0x60] sm:$0xf]  ;;  %v6234_v55 = vor.u32 %v8006_v40, %v6231_v45  ;;  %v574_v28 = vpack.c.bf16 %v362_v5, %v362_v5 }
  0x8d   : > { %406 = vst [vmem:[#allocation2 + $0x139] sm:$0xff] %v374_v18  ;;  %v8007_v39 = vld [vmem:[#allocation3 + $0x68] sm:$0xf0]  ;;  %v8063_v18 = vld [vmem:[#allocation7 + $0x150] sm:$0xff]  ;;  %v591_v40 = vpack.c.bf16 %v379_v15, %v379_v15 }
  0x8e   : > { %1513 = vmatmul.bf16.gmra.mxu3 %v6318_v19  ;;  %407 = vst [vmem:[#allocation2 + $0x141] sm:$0xff] %v375_v21  ;;  %v6230_v50 = vor.u32 %v8007_v39, %v6229_v35  ;;  %v8030_v53 = vld [vmem:[#allocation3 + $0x124] sm:$0xf]  ;;  %1549 = vmatpush.bf16.msrb.mxu2 %v8063_v18 }
  0x8f   : > { %606 = vst [vmem:[#allocation3 + $0x7c] sm:$0xf] %v570_v22  ;;  %v6327_v54 = vld [vmem:[#allocation3 + $0x12c] sm:$0xf0]  ;;  %v7975_v19 = vld [vmem:[#allocation7 + $0x10] sm:$0xff] }
  0x90   : > { %v426_v31 = vld [vmem:[#allocation2 + $0x78] sm:$0xff]  ;;  %607 = vst [vmem:[#allocation3 + $0x88] sm:$0xf] %v571_v23  ;;  %v6330_v59 = vor.u32 %v8030_v53, %v6327_v54  ;;  %v7983_v22 = vld [vmem:[#allocation7 + $0x50] sm:$0xff]  ;;  %2038 = vmatpush.bf16.msrb.mxu3 %v7975_v19  ;;  %v8062_v54 = vld [vmem:[#allocation7 + $0x148] sm:$0xff] }
  0x91   : > { %v427_v32 = vld [vmem:[#allocation2 + $0x80] sm:$0xff]  ;;  %v462_v33 = vpack.c.bf16 %v426_v31, %v426_v31  ;;  %622 = vst [vmem:[#allocation3 + $0x13c] sm:$0xf] %v586_v26  ;;  %2127 = vmatpush.bf16.msrb.mxu0 %v7983_v22  ;;  %v575_v31 = vpack.c.bf16 %v363_v6, %v363_v6  ;;  %v348_v45 = vld [vmem:[%s8756_s16 + $0xf0] sm:$0xff]  ;;  %v7994_v22 = vld [vmem:[#allocation7 + $0xa8] sm:$0xff] }
  0x92   : > { %v463_v36 = vpack.c.bf16 %v427_v32, %v427_v32  ;;  %623 = vst [vmem:[#allocation3 + $0x148] sm:$0xf] %v587_v27  ;;  %v6325_v61 = vld [vmem:[#allocation3 + $0x120] sm:$0xf]  ;;  %1550 = vmatpush.bf16.msrb.mxu2 %v8062_v54  ;;  %v8061_v19 = vld [vmem:[#allocation7 + $0x140] sm:$0xff] }
  0x93   : > { %498 = vst [vmem:[#allocation3 + $0x78] sm:$0xf] %v462_v33  ;;  %v8031_v62 = vld [vmem:[#allocation3 + $0x128] sm:$0xf0] }
  0x94   : > { %1424 = vmatmul.bf16.gmra.mxu2 %v6314_v30  ;;  %499 = vst [vmem:[#allocation3 + $0x84] sm:$0xf] %v463_v36  ;;  %v442_v42 = vld [vmem:[#allocation2 + $0x138] sm:$0xff]  ;;  %v6326_v9 = vor.u32 %v8031_v62, %v6325_v61 }
  0x95   : > { %v443_v46 = vld [vmem:[#allocation2 + $0x140] sm:$0xff]  ;;  %v478_v47 = vpack.c.bf16 %v442_v42, %v442_v42  ;;  %392 = vst [vmem:[#allocation2 + $0x91] sm:$0xff] %v360_v34  ;;  %v590_v34 = vpack.c.bf16 %v378_v13, %v378_v13  ;;  %v333_v42 = vld [vmem:[%s8756_s16 + $0x78] sm:$0xff] }
  0x96   : > { %v479_v51 = vpack.c.bf16 %v443_v46, %v443_v46  ;;  %393 = vst [vmem:[#allocation2 + $0x99] sm:$0xff] %v361_v37  ;;  %v8009_v20 = vld [vmem:[#allocation3 + $0x7c] sm:$0xf]  ;;  %v349_v46 = vld [vmem:[%s8756_s16 + $0xf8] sm:$0xff]  ;;  %1551 = vmatpush.bf16.msrb.mxu2 %v8061_v19 }
  0x97   : > { %514 = vst [vmem:[#allocation3 + $0x138] sm:$0xf] %v478_v47  ;;  %v6243_v21 = vld [vmem:[#allocation3 + $0x84] sm:$0xf0]  ;;  %v365_v47 = vmax.f32 %v333_v42, 0.0 }
  0x98   : > { %515 = vst [vmem:[#allocation3 + $0x144] sm:$0xf] %v479_v51  ;;  %v8033_v24 = vld [vmem:[#allocation3 + $0x13c] sm:$0xf]  ;;  %v6246_v26 = vor.u32 %v8009_v20, %v6243_v21  ;;  %v7973_v20 = vld [vmem:[#allocation7] sm:$0xff] }
  0x99   : > { %408 = vst [vmem:[#allocation2 + $0x151] sm:$0xff] %v376_v49  ;;  %v6339_v25 = vld [vmem:[#allocation3 + $0x144] sm:$0xf0]  ;;  %v380_v49 = vmax.f32 %v348_v45, 0.0 }
  0x9a   : > { %1389 = vmatmul.bf16.gmra.mxu0 %v6230_v50  ;;  %409 = vst [vmem:[#allocation2 + $0x159] sm:$0xff] %v377_v52  ;;  %v6241_v16 = vld [vmem:[#allocation3 + $0x78] sm:$0xf]  ;;  %v6342_v32 = vor.u32 %v8033_v24, %v6339_v25  ;;  %v381_v50 = vmax.f32 %v349_v46, 0.0 }
  0x9b   : > { %608 = vst [vmem:[#allocation3 + $0x94] sm:$0xf] %v572_v56  ;;  %v8010_v17 = vld [vmem:[#allocation3 + $0x80] sm:$0xf0] }
  0x9c   : > { %1478 = vmatmul.bf16.gmra.mxu1 %v6234_v55  ;;  %v428_v63 = vld [vmem:[#allocation2 + $0x90] sm:$0xff]  ;;  %609 = vst [vmem:[#allocation3 + $0xa0] sm:$0xf] %v573_v57  ;;  %v6242_v23 = vor.u32 %v8010_v17, %v6241_v16  ;;  %v7974_v55 = vld [vmem:[#allocation7 + $0x8] sm:$0xff] }
  0x9d   : > { %v429_v0 = vld [vmem:[#allocation2 + $0x98] sm:$0xff]  ;;  %v464_v1 = vpack.c.bf16 %v428_v63, %v428_v63  ;;  %624 = vst [vmem:[#allocation3 + $0x154] sm:$0xf] %v588_v58  ;;  %v7982_v57 = vld [vmem:[#allocation7 + $0x48] sm:$0xff]  ;;  %2039 = vmatpush.bf16.msrb.mxu3 %v7974_v55  ;;  %v576_v63 = vpack.c.bf16 %v364_v44, %v364_v44  ;;  %v7995_v17 = vld [vmem:[#allocation7 + $0xb0] sm:$0xff] }
  0x9e   : > { %1518 = vmatmul.bf16.gmra.mxu3 %v6330_v59  ;;  %v465_v4 = vpack.c.bf16 %v429_v0, %v429_v0  ;;  %625 = vst [vmem:[#allocation3 + $0x160] sm:$0xf] %v589_v60  ;;  %v6337_v35 = vld [vmem:[#allocation3 + $0x138] sm:$0xf]  ;;  %v7996_v58 = vld [vmem:[#allocation7 + $0xb8] sm:$0xff]  ;;  %2128 = vmatpush.bf16.msrb.mxu0 %v7982_v57  ;;  %v577_v0 = vpack.c.bf16 %v365_v47, %v365_v47 }
  0x9f   : > { %500 = vst [vmem:[#allocation3 + $0x90] sm:$0xf] %v464_v1  ;;  %v8034_v36 = vld [vmem:[#allocation3 + $0x140] sm:$0xf0]  ;;  %2211 = vmatpush.bf16.msrb.mxu1 %v7996_v58 }
  0xa0   : > { %501 = vst [vmem:[#allocation3 + $0x9c] sm:$0xf] %v465_v4  ;;  %v444_v10 = vld [vmem:[#allocation2 + $0x150] sm:$0xff]  ;;  %v6338_v48 = vor.u32 %v8034_v36, %v6337_v35 }
  0xa1   : > { %v445_v11 = vld [vmem:[#allocation2 + $0x158] sm:$0xff]  ;;  %v480_v12 = vpack.c.bf16 %v444_v10, %v444_v10  ;;  %394 = vst [vmem:[#allocation2 + $0xa9] sm:$0xff] %v362_v5  ;;  %2040 = vmatpush.bf16.msrb.mxu3 %v7973_v20 }
  0xa2   : > { %v481_v14 = vpack.c.bf16 %v445_v11, %v445_v11  ;;  %395 = vst [vmem:[#allocation2 + $0xb1] sm:$0xff] %v363_v6  ;;  %v8012_v53 = vld [vmem:[#allocation3 + $0x94] sm:$0xf] }
  0xa3   : > { %516 = vst [vmem:[#allocation3 + $0x150] sm:$0xf] %v480_v12  ;;  %v6255_v56 = vld [vmem:[#allocation3 + $0x9c] sm:$0xf0]  ;;  %2212 = vmatpush.bf16.msrb.mxu1 %v7995_v17 }
  0xa4   : > { %1429 = vmatmul.bf16.gmra.mxu2 %v6326_v9  ;;  %517 = vst [vmem:[#allocation3 + $0x15c] sm:$0xf] %v481_v14  ;;  %v8036_v60 = vld [vmem:[#allocation3 + $0x154] sm:$0xf]  ;;  %v6258_v62 = vor.u32 %v8012_v53, %v6255_v56  ;;  %v592_v9 = vpack.c.bf16 %v380_v49, %v380_v49  ;;  %v633_v56 = vld [vmem:[#allocation2 + $0xa] sm:$0xff] }
  0xa5   : > { %410 = vst [vmem:[#allocation2 + $0x169] sm:$0xff] %v378_v13  ;;  %v6351_v61 = vld [vmem:[#allocation3 + $0x15c] sm:$0xf0]  ;;  %v593_v13 = vpack.c.bf16 %v381_v50, %v381_v50 }
  0xa6   : > { %411 = vst [vmem:[#allocation2 + $0x171] sm:$0xff] %v379_v15  ;;  %v6253_v51 = vld [vmem:[#allocation3 + $0x90] sm:$0xf]  ;;  %v6354_v2 = vor.u32 %v8036_v60, %v6351_v61  ;;  %v669_v60 = vpack.c.bf16 %v633_v56, %v633_v56  ;;  %v7990_v61 = vld [vmem:[#allocation7 + $0x88] sm:$0xff] }
  0xa7   : > { %610 = vst [vmem:[#allocation3 + $0xac] sm:$0xf] %v574_v28  ;;  %v8013_v52 = vld [vmem:[#allocation3 + $0x98] sm:$0xf0]  ;;  %v635_v28 = vld [vmem:[#allocation2 + $0x22] sm:$0xff]  ;;  %2213 = vmatpush.bf16.msrb.mxu1 %v7994_v22 }
  0xa8   : > { %v430_v27 = vld [vmem:[#allocation2 + $0xa8] sm:$0xff]  ;;  %611 = vst [vmem:[#allocation3 + $0xb8] sm:$0xf] %v575_v31  ;;  %v6254_v59 = vor.u32 %v8013_v52, %v6253_v51  ;;  %v671_v31 = vpack.c.bf16 %v635_v28, %v635_v28  ;;  %v8124_v51 = vld [vmem:[#allocation7 + $0x1b8] sm:$0xff] }
  0xa9   : > { %v431_v29 = vld [vmem:[#allocation2 + $0xb0] sm:$0xff]  ;;  %v466_v30 = vpack.c.bf16 %v430_v27, %v430_v27  ;;  %626 = vst [vmem:[#allocation3 + $0x16c] sm:$0xf] %v590_v34  ;;  %v634_v27 = vld [vmem:[#allocation2 + $0x1a] sm:$0xff]  ;;  %2814 = vmatpush.bf16.msra.mxu2 %v8124_v51  ;;  %v7928_v28 = vld [vmem:[#allocation3 + $0x1c] sm:$0xf] }
  0xaa   : > { %1394 = vmatmul.bf16.gmra.mxu0 %v6242_v23  ;;  %v467_v33 = vpack.c.bf16 %v431_v29, %v431_v29  ;;  %627 = vst [vmem:[#allocation3 + $0x178] sm:$0xf] %v591_v40  ;;  %v6349_v10 = vld [vmem:[#allocation3 + $0x150] sm:$0xf]  ;;  %v8132_v52 = vld [vmem:[#allocation7 + $0x1f8] sm:$0xff] }
  0xab   : > { %502 = vst [vmem:[#allocation3 + $0xa8] sm:$0xf] %v466_v30  ;;  %v8037_v11 = vld [vmem:[#allocation3 + $0x158] sm:$0xf0]  ;;  %v7981_v23 = vld [vmem:[#allocation7 + $0x40] sm:$0xff]  ;;  %v670_v30 = vpack.c.bf16 %v634_v27, %v634_v27  ;;  %2903 = vmatpush.bf16.msra.mxu3 %v8132_v52 }
  0xac   : > { %1483 = vmatmul.bf16.gmra.mxu1 %v6246_v26  ;;  %503 = vst [vmem:[#allocation3 + $0xb4] sm:$0xf] %v467_v33  ;;  %v446_v37 = vld [vmem:[#allocation2 + $0x168] sm:$0xff]  ;;  %v6350_v14 = vor.u32 %v8037_v11, %v6349_v10  ;;  %2129 = vmatpush.bf16.msrb.mxu0 %v7981_v23  ;;  %v7993_v34 = vld [vmem:[#allocation7 + $0xa0] sm:$0xff] }
  0xad   : > { %v447_v38 = vld [vmem:[#allocation2 + $0x170] sm:$0xff]  ;;  %v482_v39 = vpack.c.bf16 %v446_v37, %v446_v37  ;;  %396 = vst [vmem:[#allocation2 + $0xc1] sm:$0xff] %v364_v44  ;;  %2214 = vmatpush.bf16.msrb.mxu1 %v7993_v34  ;;  %v6493_v34 = vld [vmem:[#allocation3 + $0x18] sm:$0xf] }
  0xae   : > { %1523 = vmatmul.bf16.gmra.mxu3 %v6342_v32  ;;  %v483_v43 = vpack.c.bf16 %v447_v38, %v447_v38  ;;  %397 = vst [vmem:[#allocation2 + $0xc9] sm:$0xff] %v365_v47  ;;  %v8015_v18 = vld [vmem:[#allocation3 + $0xac] sm:$0xf]  ;;  %v524_v32 = vld [vmem:[#allocation2 + $0x1] sm:$0xff]  ;;  %v525_v33 = vld [vmem:[#allocation2 + $0x9] sm:$0xff] }
  0xaf   : > { %518 = vst [vmem:[#allocation3 + $0x168] sm:$0xf] %v482_v39  ;;  %v6267_v21 = vld [vmem:[#allocation3 + $0xb4] sm:$0xf0]  ;;  %v560_v36 = vpack.c.bf16 %v524_v32, %v524_v32  ;;  %v561_v37 = vpack.c.bf16 %v525_v33, %v525_v33  ;;  %v8621_v39 = vmov 0.0|0.0  }
  0xb0   : > { %519 = vst [vmem:[#allocation3 + $0x174] sm:$0xf] %v483_v43  ;;  %v8039_v25 = vld [vmem:[#allocation3 + $0x16c] sm:$0xf]  ;;  %v6270_v29 = vor.u32 %v8015_v18, %v6267_v21 }
  0xb1   : > { %412 = vst [vmem:[#allocation2 + $0x181] sm:$0xff] %v380_v49  ;;  %v6363_v26 = vld [vmem:[#allocation3 + $0x174] sm:$0xf0]  ;;  %2215 = vmatpush.bf16.msrb.mxu1 %v7992_v41 }
  0xb2   : > { %413 = vst [vmem:[#allocation2 + $0x189] sm:$0xff] %v381_v50  ;;  %v6265_v15 = vld [vmem:[#allocation3 + $0xa8] sm:$0xf]  ;;  %v6366_v35 = vor.u32 %v8039_v25, %v6363_v26  ;;  %v632_v49 = vld [vmem:[#allocation2 + $0x2] sm:$0xff] }
  0xb3   : > { %612 = vst [vmem:[#allocation3 + $0xc4] sm:$0xf] %v576_v63  ;;  %v8016_v16 = vld [vmem:[#allocation3 + $0xb0] sm:$0xf0]  ;;  %v668_v53 = vpack.c.bf16 %v632_v49, %v632_v49  ;;  %v637_v63 = vld [vmem:[#allocation2 + $0x3a] sm:$0xff] }
  0xb4   : > { %1434 = vmatmul.bf16.gmra.mxu2 %v6338_v48  ;;  %v432_v1 = vld [vmem:[#allocation2 + $0xc0] sm:$0xff]  ;;  %613 = vst [vmem:[#allocation3 + $0xd0] sm:$0xf] %v577_v0  ;;  %v6266_v24 = vor.u32 %v8016_v16, %v6265_v15  ;;  %v7991_v48 = vld [vmem:[#allocation7 + $0x90] sm:$0xff] }
  0xb5   : > { %v433_v3 = vld [vmem:[#allocation2 + $0xc8] sm:$0xff]  ;;  %v468_v4 = vpack.c.bf16 %v432_v1, %v432_v1  ;;  %628 = vst [vmem:[#allocation3 + $0x184] sm:$0xf] %v592_v9  ;;  %2216 = vmatpush.bf16.msrb.mxu1 %v7991_v48  ;;  %v8140_v1 = vld [vmem:[#allocation7 + $0x238] sm:$0xff] }
  0xb6   : > { %v469_v5 = vpack.c.bf16 %v433_v3, %v433_v3  ;;  %629 = vst [vmem:[#allocation3 + $0x190] sm:$0xf] %v593_v13  ;;  %v6361_v38 = vld [vmem:[#allocation3 + $0x168] sm:$0xf]  ;;  %v673_v3 = vpack.c.bf16 %v637_v63, %v637_v63  ;;  %2992 = vmatpush.bf16.msra.mxu0 %v8140_v1  ;;  %v638_v13 = vld [vmem:[#allocation2 + $0x4a] sm:$0xff] }
  0xb7   : > { %504 = vst [vmem:[#allocation3 + $0xc0] sm:$0xf] %v468_v4  ;;  %v8040_v40 = vld [vmem:[#allocation3 + $0x170] sm:$0xf0]  ;;  %v674_v16 = vpack.c.bf16 %v638_v13, %v638_v13  ;;  %v6505_v63 = vld [vmem:[#allocation3 + $0x30] sm:$0xf] }
  0xb8   : > { %v448_v6 = vld [vmem:[#allocation2 + $0x180] sm:$0xff]  ;;  %505 = vst [vmem:[#allocation3 + $0xcc] sm:$0xf] %v469_v5  ;;  %v6362_v42 = vor.u32 %v8040_v40, %v6361_v38  ;;  %v7929_v38 = vld [vmem:[#allocation3 + $0x20] sm:$0xf0]  ;;  %v641_v40 = vld [vmem:[#allocation2 + $0x6a] sm:$0xff] }
  0xb9   : > { %v449_v7 = vld [vmem:[#allocation2 + $0x188] sm:$0xff]  ;;  %v484_v8 = vpack.c.bf16 %v448_v6, %v448_v6  ;;  %706 = vst [vmem:[#allocation3 + $0x20] sm:$0xf] %v670_v30  ;;  %2217 = vmatpush.bf16.msrb.mxu1 %v7990_v61  ;;  %v7989_v4 = vld [vmem:[#allocation7 + $0x80] sm:$0xff]  ;;  %v8123_v30 = vld [vmem:[#allocation7 + $0x1b0] sm:$0xff]  ;;  %v6494_v49 = vor.u32 %v7929_v38, %v6493_v34 }
  0xba   : > { %1399 = vmatmul.bf16.gmra.mxu0 %v6254_v59  ;;  %v485_v12 = vpack.c.bf16 %v449_v7, %v449_v7  ;;  %707 = vst [vmem:[#allocation3 + $0x2c] sm:$0xf] %v671_v31  ;;  %v8018_v45 = vld [vmem:[#allocation3 + $0xc4] sm:$0xf]  ;;  %2815 = vmatpush.bf16.msra.mxu2 %v8123_v30 }
  0xbb   : > { %520 = vst [vmem:[#allocation3 + $0x180] sm:$0xf] %v484_v8  ;;  %v6279_v46 = vld [vmem:[#allocation3 + $0xcc] sm:$0xf0]  ;;  %v8131_v31 = vld [vmem:[#allocation7 + $0x1f0] sm:$0xff] }
  0xbc   : > { %1488 = vmatmul.bf16.gmra.mxu1 %v6258_v62  ;;  %521 = vst [vmem:[#allocation3 + $0x18c] sm:$0xf] %v485_v12  ;;  %v8042_v54 = vld [vmem:[#allocation3 + $0x184] sm:$0xf]  ;;  %v6282_v0 = vor.u32 %v8018_v45, %v6279_v46  ;;  %2904 = vmatpush.bf16.msra.mxu3 %v8131_v31  ;;  %v677_v45 = vpack.c.bf16 %v641_v40, %v641_v40  ;;  %v6517_v31 = vld [vmem:[#allocation3 + $0x48] sm:$0xf] }
  0xbd   : > { %488 = vst [vmem:[#allocation3] sm:$0xf] %v8621_v39  ;;  %v6375_v58 = vld [vmem:[#allocation3 + $0x18c] sm:$0xf0]  ;;  %v636_v62 = vld [vmem:[#allocation2 + $0x32] sm:$0xff]  ;;  %2218 = vmatpush.bf16.msrb.mxu1 %v7989_v4  ;;  %v8138_v40 = vld [vmem:[#allocation7 + $0x228] sm:$0xff] }
  0xbe   : > { %1528 = vmatmul.bf16.gmra.mxu3 %v6354_v2  ;;  %489 = vst [vmem:[#allocation3 + $0xc] sm:$0xf] %v8621_v39  ;;  %v6277_v43 = vld [vmem:[#allocation3 + $0xc0] sm:$0xf]  ;;  %v672_v2 = vpack.c.bf16 %v636_v62, %v636_v62  ;;  %v6378_v5 = vor.u32 %v8042_v54, %v6375_v58  ;;  %v642_v4 = vld [vmem:[#allocation2 + $0x7a] sm:$0xff] }
  0xbf   : > { %596 = vst [vmem:[#allocation3 + $0x4] sm:$0xf] %v560_v36  ;;  %v8019_v44 = vld [vmem:[#allocation3 + $0xc8] sm:$0xf0] }
  0xc0   : > { %597 = vst [vmem:[#allocation3 + $0x10] sm:$0xf] %v561_v37  ;;  %v6278_v57 = vor.u32 %v8019_v44, %v6277_v43  ;;  %v6201_v21 = vld [vmem:[#allocation3 + $0x20] sm:$0xf] }
  0xc1   : > { %704 = vst [vmem:[#allocation3 + $0x8] sm:$0xf] %v668_v53  ;;  %v7999_v22 = vld [vmem:[#allocation3 + $0x28] sm:$0xf0]  ;;  %v6501_v32 = vld [vmem:[#allocation3 + $0x20] sm:$0xf] }
  0xc2   : > { %705 = vst [vmem:[#allocation3 + $0x14] sm:$0xf] %v669_v60  ;;  %v6373_v6 = vld [vmem:[#allocation3 + $0x180] sm:$0xf]  ;;  %v7930_v33 = vld [vmem:[#allocation3 + $0x28] sm:$0xf0] }
  0xc3   : > { %708 = vst [vmem:[#allocation3 + $0x38] sm:$0xf] %v672_v2  ;;  %v8043_v7 = vld [vmem:[#allocation3 + $0x188] sm:$0xf0]  ;;  %v8139_v43 = vld [vmem:[#allocation7 + $0x230] sm:$0xff] }
  0xc4   : > { %1439 = vmatmul.bf16.gmra.mxu2 %v6350_v14  ;;  %v8846_v47 = vld [vmem:[#allocation3] sm:$0xf]  ;;  %709 = vst [vmem:[#allocation3 + $0x44] sm:$0xf] %v673_v3  ;;  %v6374_v9 = vor.u32 %v8043_v7, %v6373_v6  ;;  %2993 = vmatpush.bf16.msra.mxu0 %v8139_v43  ;;  %v7932_v3 = vld [vmem:[#allocation3 + $0x38] sm:$0xf0] }
  0xc5   : > { %v7926_v50 = vld [vmem:[#allocation3 + $0x8] sm:$0xf0]  ;;  %3284 = vst [vmem:[#allocation3] sm:$0xf] %v8621_v39  ;;  %v639_v14 = vld [vmem:[#allocation2 + $0x52] sm:$0xff]  ;;  %v6506_v13 = vor.u32 %v7932_v3, %v6505_v63 }
  0xc6   : > { %3285 = vst [vmem:[#allocation3 + $0xc] sm:$0xf] %v8621_v39  ;;  %v7925_v55 = vld [vmem:[#allocation3 + $0x4] sm:$0xf]  ;;  %v675_v17 = vpack.c.bf16 %v639_v14, %v639_v14  ;;  %v6482_v20 = vor.u32 %v7926_v50, %v8846_v47  ;;  %v640_v39 = vld [vmem:[#allocation2 + $0x62] sm:$0xff] }
  0xc7   : > { %v6483_v59 = vld [vmem:[#allocation3 + $0xc] sm:$0xf0]  ;;  %3392 = vst [vmem:[#allocation3 + $0x4] sm:$0xf] %v560_v36  ;;  %v676_v44 = vpack.c.bf16 %v640_v39, %v640_v39 }
  0xc8   : > { %3393 = vst [vmem:[#allocation3 + $0x10] sm:$0xf] %v561_v37  ;;  %v6489_v8 = vld [vmem:[#allocation3 + $0x8] sm:$0xf]  ;;  %v6486_v12 = vor.u32 %v7925_v55, %v6483_v59  ;;  %v7931_v59 = vld [vmem:[#allocation3 + $0x34] sm:$0xf]  ;;  %2994 = vmatpush.bf16.msra.mxu0 %v8138_v40 }
  0xc9   : > { %v7927_v10 = vld [vmem:[#allocation3 + $0x10] sm:$0xf0]  ;;  %3500 = vst [vmem:[#allocation3 + $0x8] sm:$0xf] %v668_v53 }
  0xca   : > { %1404 = vmatmul.bf16.gmra.mxu0 %v6266_v24  ;;  %3501 = vst [vmem:[#allocation3 + $0x14] sm:$0xf] %v669_v60  ;;  %v6490_v15 = vor.u32 %v7927_v10, %v6489_v8  ;;  %v6202_v24 = vor.u32 %v7999_v22, %v6201_v21  ;;  %v6213_v50 = vld [vmem:[#allocation3 + $0x38] sm:$0xf]  ;;  %v6507_v60 = vld [vmem:[#allocation3 + $0x3c] sm:$0xf0]  ;;  %v678_v8 = vpack.c.bf16 %v642_v4, %v642_v4 }
  0xcb   : > { %710 = vst [vmem:[#allocation3 + $0x50] sm:$0xf] %v674_v16  ;;  %v8002_v51 = vld [vmem:[#allocation3 + $0x40] sm:$0xf0]  ;;  %v6513_v61 = vld [vmem:[#allocation3 + $0x38] sm:$0xf] }
  0xcc   : > { %1493 = vmatmul.bf16.gmra.mxu1 %v6270_v29  ;;  %711 = vst [vmem:[#allocation3 + $0x5c] sm:$0xf] %v675_v17  ;;  %v6495_v29 = vld [vmem:[#allocation3 + $0x24] sm:$0xf0]  ;;  %v6214_v55 = vor.u32 %v8002_v51, %v6213_v50  ;;  %v7933_v62 = vld [vmem:[#allocation3 + $0x40] sm:$0xf0] }
  0xcd   : > { %712 = vst [vmem:[#allocation3 + $0x68] sm:$0xf] %v676_v44  ;;  %v6514_v7 = vor.u32 %v7933_v62, %v6513_v61  ;;  %v6531_v61 = vld [vmem:[#allocation3 + $0x6c] sm:$0xf0]  ;;  %v7938_v4 = vld [vmem:[#allocation3 + $0x68] sm:$0xf0] }
  0xce   : > { %1533 = vmatmul.bf16.gmra.mxu3 %v6366_v35  ;;  %v6498_v35 = vor.u32 %v7928_v28, %v6495_v29  ;;  %713 = vst [vmem:[#allocation3 + $0x74] sm:$0xf] %v677_v45  ;;  %v8130_v28 = vld [vmem:[#allocation7 + $0x1e8] sm:$0xff] }
  0xcf   : > { %714 = vst [vmem:[#allocation3 + $0x80] sm:$0xf] %v678_v8  ;;  %2905 = vmatpush.bf16.msra.mxu3 %v8130_v28 }
  0xd2   : > { %v6225_v14 = vld [vmem:[#allocation3 + $0x50] sm:$0xf] }
  0xd3   : > { %v6525_v29 = vld [vmem:[#allocation3 + $0x50] sm:$0xf]  ;;  %v7936_v30 = vld [vmem:[#allocation3 + $0x58] sm:$0xf0] }
  0xd4   : > { %1444 = vmatmul.bf16.gmra.mxu2 %v6362_v42  ;;  %v6502_v42 = vor.u32 %v7930_v33, %v6501_v32  ;;  %v6526_v39 = vor.u32 %v7936_v30, %v6525_v29  ;;  %v6537_v62 = vld [vmem:[#allocation3 + $0x68] sm:$0xf]  ;;  %v7940_v30 = vld [vmem:[#allocation3 + $0x7c] sm:$0xf] }
  0xd5   : > { %v1375_v11 = vpop.f32.mrf.mxu0  ;;  %v8008_v50 = vld [vmem:[#allocation3 + $0x70] sm:$0xf0] }
  0xd6   : > { %v7939_v63 = vld [vmem:[#allocation3 + $0x70] sm:$0xf0] }
  0xda   : > { %1409 = vmatmul.bf16.gmra.mxu0 %v6278_v57 }
  0xdc   : > { %1498 = vmatmul.bf16.gmra.mxu1 %v6282_v0  ;;  %v6510_v0 = vor.u32 %v7931_v59, %v6507_v60  ;;  %v7937_v60 = vld [vmem:[#allocation3 + $0x64] sm:$0xf] }
  0xdd   : > { %v1377_v23 = vpop.f32.mrf.mxu0 }
  0xde   : > { %1538 = vmatmul.bf16.gmra.mxu3 %v6378_v5  ;;  %v643_v5 = vld [vmem:[#allocation2 + $0x82] sm:$0xff] }
  0xe4   : > { %1449 = vmatmul.bf16.gmra.mxu2 %v6374_v9  ;;  %v679_v9 = vpack.c.bf16 %v643_v5, %v643_v5  ;;  %v646_v5 = vld [vmem:[#allocation2 + $0xaa] sm:$0xff] }
  0xe6   : > { %715 = vst [vmem:[#allocation3 + $0x8c] sm:$0xf] %v679_v9  ;;  %v6538_v9 = vor.u32 %v7939_v63, %v6537_v62 }
  0xe9   : > { %v1464_v18 = vpop.f32.mrf.mxu1 }
  0xea   : > { %v8848_v19 = vadd.f32 %v1464_v18, %v1375_v11  ;;  %2130 = vmatmul.bf16.vlgmr.msrb.gmra.mxu0 %v6486_v12 }
  0xec   : > { %2219 = vmatmul.bf16.vlgmr.msrb.gmra.mxu1 %v6490_v15  ;;  %v8005_v15 = vld [vmem:[#allocation3 + $0x58] sm:$0xf0] }
  0xee   : > { %2041 = vmatmul.bf16.vlgmr.msrb.gmra.mxu3 %v6482_v20  ;;  %v6226_v20 = vor.u32 %v8005_v15, %v6225_v14 }
  0xf1   : > { %v1504_v25 = vpop.f32.mrf.mxu3  ;;  %v1466_v26 = vpop.f32.mrf.mxu1 }
  0xf2   : > { %v8851_v27 = vadd.f32 %v1466_v26, %v1377_v23  ;;  %v8122_v26 = vld [vmem:[#allocation7 + $0x1a8] sm:$0xff] }
  0xf3   : > { %2816 = vmatpush.bf16.msra.mxu2 %v8122_v26 }
  0xf4   : > { %1552 = vmatmul.bf16.vlgmr.msrb.gmra.mxu2 %v6202_v24  ;;  %v7934_v24 = vld [vmem:[#allocation3 + $0x4c] sm:$0xf] }
  0xf7   : > { %v1415_v36 = vpop.f32.mrf.mxu2  ;;  %v1380_v37 = vpop.f32.mrf.mxu0 }
  0xf8   : > { %v8853_v41 = vadd.f32 %v1504_v25, %v1415_v36  ;;  %v6519_v25 = vld [vmem:[#allocation3 + $0x54] sm:$0xf0]  ;;  %v644_v36 = vld [vmem:[#allocation2 + $0x92] sm:$0xff] }
  0xf9   : > { %v1506_v46 = vpop.f32.mrf.mxu3  ;;  %v1469_v47 = vpop.f32.mrf.mxu1  ;;  %v6522_v32 = vor.u32 %v7934_v24, %v6519_v25 }
  0xfa   : > { %v8855_v48 = vadd.f32 %v1469_v47, %v1380_v37  ;;  %2135 = vmatmul.bf16.gmra.mxu0 %v6498_v35  ;;  %v7935_v35 = vld [vmem:[#allocation3 + $0x50] sm:$0xf0]  ;;  %v645_v37 = vld [vmem:[#allocation2 + $0x9a] sm:$0xff] }
  0xfb   : > { %v681_v43 = vpack.c.bf16 %v645_v37, %v645_v37  ;;  %v6518_v47 = vor.u32 %v7935_v35, %v6517_v31  ;;  %v6543_v31 = vld [vmem:[#allocation3 + $0x84] sm:$0xf0]  ;;  %v7942_v35 = vld [vmem:[#allocation3 + $0x88] sm:$0xf0] }
  0xfc   : > { %2224 = vmatmul.bf16.gmra.mxu1 %v6502_v42  ;;  %v680_v42 = vpack.c.bf16 %v644_v36, %v644_v36  ;;  %v6541_v36 = vld [vmem:[#allocation3 + $0x78] sm:$0xf]  ;;  %v6546_v37 = vor.u32 %v7940_v30, %v6543_v31 }
  0xfd   : > { %717 = vst [vmem:[#allocation3 + $0xa4] sm:$0xf] %v681_v43  ;;  %v648_v43 = vld [vmem:[#allocation2 + $0xc2] sm:$0xff] }
  0xfe   : > { %2046 = vmatmul.bf16.gmra.mxu3 %v6494_v49  ;;  %716 = vst [vmem:[#allocation3 + $0x98] sm:$0xf] %v680_v42  ;;  %v6237_v49 = vld [vmem:[#allocation3 + $0x68] sm:$0xf]  ;;  %v7941_v42 = vld [vmem:[#allocation3 + $0x80] sm:$0xf0] }
  0xff   : > { %v1417_v52 = vpop.f32.mrf.mxu2  ;;  %v1382_v53 = vpop.f32.mrf.mxu0 }
 0x100   : > { %v8857_v54 = vadd.f32 %v1506_v46, %v1417_v52 }
 0x101   : > { %v1509_v56 = vpop.f32.mrf.mxu3  ;;  %v1471_v57 = vpop.f32.mrf.mxu1 }
 0x102   : > { %v8859_v58 = vadd.f32 %v1471_v57, %v1382_v53 }
 0x104   : > { %1557 = vmatmul.bf16.gmra.mxu2 %v6214_v55  ;;  %v6238_v55 = vor.u32 %v8008_v50, %v6237_v49  ;;  %v8137_v49 = vld [vmem:[#allocation7 + $0x220] sm:$0xff]  ;;  %v684_v50 = vpack.c.bf16 %v648_v43, %v648_v43 }
 0x105   : > { %2995 = vmatpush.bf16.msra.mxu0 %v8137_v49  ;;  %v6567_v49 = vld [vmem:[#allocation3 + $0xb4] sm:$0xf0] }
 0x106   : > { %720 = vst [vmem:[#allocation3 + $0xc8] sm:$0xf] %v684_v50  ;;  %v8120_v50 = vld [vmem:[#allocation7 + $0x198] sm:$0xff] }
 0x107   : > { %v1420_v1 = vpop.f32.mrf.mxu2  ;;  %v1385_v2 = vpop.f32.mrf.mxu0 }
 0x108   : > { %v8861_v6 = vadd.f32 %v1509_v56, %v1420_v1  ;;  %v6534_v1 = vor.u32 %v7937_v60, %v6531_v61  ;;  %v6261_v60 = vld [vmem:[#allocation3 + $0x98] sm:$0xf]  ;;  %v8014_v61 = vld [vmem:[#allocation3 + $0xa0] sm:$0xf0] }
 0x109   : > { %v1511_v10 = vpop.f32.mrf.mxu3  ;;  %v1474_v11 = vpop.f32.mrf.mxu1 }
 0x10a   : > { %v8863_v12 = vadd.f32 %v1474_v11, %v1385_v2  ;;  %2140 = vmatmul.bf16.gmra.mxu0 %v6510_v0  ;;  %v6529_v0 = vld [vmem:[#allocation3 + $0x60] sm:$0xf] }
 0x10c   : > { %2229 = vmatmul.bf16.gmra.mxu1 %v6514_v7  ;;  %v647_v7 = vld [vmem:[#allocation2 + $0xb2] sm:$0xff] }
 0x10d   : > { %v683_v11 = vpack.c.bf16 %v647_v7, %v647_v7  ;;  %v6555_v7 = vld [vmem:[#allocation3 + $0x9c] sm:$0xf0] }
 0x10e   : > { %2051 = vmatmul.bf16.gmra.mxu3 %v6506_v13 }
 0x10f   : > { %v1422_v16 = vpop.f32.mrf.mxu2  ;;  %v1387_v17 = vpop.f32.mrf.mxu0  ;;  %719 = vst [vmem:[#allocation3 + $0xbc] sm:$0xf] %v683_v11  ;;  %v6553_v11 = vld [vmem:[#allocation3 + $0x90] sm:$0xf] }
 0x110   : > { %v8865_v18 = vadd.f32 %v1511_v10, %v1422_v16  ;;  %v682_v10 = vpack.c.bf16 %v646_v5, %v646_v5  ;;  %v6530_v16 = vor.u32 %v7938_v4, %v6529_v0  ;;  %v7943_v5 = vld [vmem:[#allocation3 + $0x94] sm:$0xf] }
 0x111   : > { %v1514_v21 = vpop.f32.mrf.mxu3  ;;  %v1476_v22 = vpop.f32.mrf.mxu1 }
 0x112   : > { %v8867_v23 = vadd.f32 %v1476_v22, %v1387_v17  ;;  %718 = vst [vmem:[#allocation3 + $0xb0] sm:$0xf] %v682_v10  ;;  %v6249_v17 = vld [vmem:[#allocation3 + $0x80] sm:$0xf]  ;;  %v7945_v10 = vld [vmem:[#allocation3 + $0xa0] sm:$0xf0] }
 0x114   : > { %1562 = vmatmul.bf16.gmra.mxu2 %v6226_v20  ;;  %v8011_v20 = vld [vmem:[#allocation3 + $0x88] sm:$0xf0] }
 0x115   : > { %v6250_v25 = vor.u32 %v8011_v20, %v6249_v17  ;;  %v7944_v17 = vld [vmem:[#allocation3 + $0x98] sm:$0xf0]  ;;  %v650_v20 = vld [vmem:[#allocation2 + $0xda] sm:$0xff] }
 0x117   : > { %v1425_v33 = vpop.f32.mrf.mxu2  ;;  %v1390_v34 = vpop.f32.mrf.mxu0 }
 0x118   : > { %v8869_v38 = vadd.f32 %v1514_v21, %v1425_v33  ;;  %v8129_v33 = vld [vmem:[#allocation7 + $0x1e0] sm:$0xff] }
 0x119   : > { %v1516_v44 = vpop.f32.mrf.mxu3  ;;  %v1479_v45 = vpop.f32.mrf.mxu1  ;;  %2906 = vmatpush.bf16.msra.mxu3 %v8129_v33  ;;  %v6554_v33 = vor.u32 %v7944_v17, %v6553_v11  ;;  %v6285_v17 = vld [vmem:[#allocation3 + $0xc8] sm:$0xf] }
 0x11a   : > { %v8871_v46 = vadd.f32 %v1479_v45, %v1390_v34  ;;  %2145 = vmatmul.bf16.gmra.mxu0 %v6522_v32  ;;  %v8121_v32 = vld [vmem:[#allocation7 + $0x1a0] sm:$0xff]  ;;  %v6549_v34 = vld [vmem:[#allocation3 + $0x80] sm:$0xf] }
 0x11b   : > { %2817 = vmatpush.bf16.msra.mxu2 %v8121_v32 }
 0x11c   : > { %2234 = vmatmul.bf16.gmra.mxu1 %v6526_v39 }
 0x11e   : > { %2056 = vmatmul.bf16.gmra.mxu3 %v6518_v47  ;;  %v6550_v47 = vor.u32 %v7942_v35, %v6549_v34  ;;  %v6273_v34 = vld [vmem:[#allocation3 + $0xb0] sm:$0xf]  ;;  %v8017_v35 = vld [vmem:[#allocation3 + $0xb8] sm:$0xf0] }
 0x11f   : > { %v1427_v51 = vpop.f32.mrf.mxu2  ;;  %v1392_v52 = vpop.f32.mrf.mxu0  ;;  %2818 = vmatpush.bf16.msra.mxu2 %v8120_v50  ;;  %v654_v50 = vld [vmem:[#allocation2 + $0x10a] sm:$0xff] }
 0x120   : > { %v8873_v53 = vadd.f32 %v1516_v44, %v1427_v51  ;;  %v649_v44 = vld [vmem:[#allocation2 + $0xca] sm:$0xff] }
 0x121   : > { %v1519_v56 = vpop.f32.mrf.mxu3  ;;  %v1481_v57 = vpop.f32.mrf.mxu1  ;;  %v685_v51 = vpack.c.bf16 %v649_v44, %v649_v44 }
 0x122   : > { %v8875_v59 = vadd.f32 %v1481_v57, %v1392_v52  ;;  %v6542_v57 = vor.u32 %v7941_v42, %v6541_v36 }
 0x123   : > { %721 = vst [vmem:[#allocation3 + $0xd4] sm:$0xf] %v685_v51  ;;  %v8128_v51 = vld [vmem:[#allocation7 + $0x1d8] sm:$0xff] }
 0x124   : > { %1567 = vmatmul.bf16.gmra.mxu2 %v6238_v55  ;;  %2907 = vmatpush.bf16.msra.mxu3 %v8128_v51  ;;  %v655_v51 = vld [vmem:[#allocation2 + $0x112] sm:$0xff] }
 0x127   : > { %v1430_v2 = vpop.f32.mrf.mxu2  ;;  %v1395_v3 = vpop.f32.mrf.mxu0 }
 0x128   : > { %v8877_v8 = vadd.f32 %v1519_v56, %v1430_v2 }
 0x129   : > { %v1521_v13 = vpop.f32.mrf.mxu3  ;;  %v1484_v14 = vpop.f32.mrf.mxu1 }
 0x12a   : > { %v8879_v15 = vadd.f32 %v1484_v14, %v1395_v3  ;;  %2150 = vmatmul.bf16.gmra.mxu0 %v6534_v1  ;;  %v6262_v1 = vor.u32 %v8014_v61, %v6261_v60 }
 0x12c   : > { %2239 = vmatmul.bf16.gmra.mxu1 %v6538_v9  ;;  %v6561_v9 = vld [vmem:[#allocation3 + $0x98] sm:$0xf] }
 0x12e   : > { %2061 = vmatmul.bf16.gmra.mxu3 %v6530_v16 }
 0x12f   : > { %v1432_v21 = vpop.f32.mrf.mxu2  ;;  %v1397_v22 = vpop.f32.mrf.mxu0 }
 0x130   : > { %v8881_v24 = vadd.f32 %v1521_v13, %v1432_v21  ;;  %v6558_v13 = vor.u32 %v7943_v5, %v6555_v7  ;;  %v651_v21 = vld [vmem:[#allocation2 + $0xe2] sm:$0xff] }
 0x131   : > { %v1524_v26 = vpop.f32.mrf.mxu3  ;;  %v1486_v28 = vpop.f32.mrf.mxu1 }
 0x132   : > { %v8883_v29 = vadd.f32 %v1486_v28, %v1397_v22  ;;  %v687_v28 = vpack.c.bf16 %v651_v21, %v651_v21 }
 0x134   : > { %1572 = vmatmul.bf16.gmra.mxu2 %v6250_v25  ;;  %v6562_v25 = vor.u32 %v7945_v10, %v6561_v9  ;;  %723 = vst [vmem:[#allocation3 + $0xec] sm:$0xf] %v687_v28 }
 0x137   : > { %v1435_v39 = vpop.f32.mrf.mxu2  ;;  %v1400_v40 = vpop.f32.mrf.mxu0 }
 0x138   : > { %v8885_v45 = vadd.f32 %v1524_v26, %v1435_v39  ;;  %v686_v26 = vpack.c.bf16 %v650_v20, %v650_v20  ;;  %v8020_v20 = vld [vmem:[#allocation3 + $0xd0] sm:$0xf0] }
 0x139   : > { %v1526_v52 = vpop.f32.mrf.mxu3  ;;  %v1489_v55 = vpop.f32.mrf.mxu1  ;;  %v6286_v28 = vor.u32 %v8020_v20, %v6285_v17  ;;  %v6591_v17 = vld [vmem:[#allocation3 + $0xe4] sm:$0xf0]  ;;  %v8119_v20 = vld [vmem:[#allocation7 + $0x190] sm:$0xff] }
 0x13a   : > { %v8887_v56 = vadd.f32 %v1489_v55, %v1400_v40  ;;  %2155 = vmatmul.bf16.gmra.mxu0 %v6546_v37  ;;  %722 = vst [vmem:[#allocation3 + $0xe0] sm:$0xf] %v686_v26  ;;  %v6274_v40 = vor.u32 %v8017_v35, %v6273_v34  ;;  %v7948_v55 = vld [vmem:[#allocation3 + $0xb8] sm:$0xf0]  ;;  %v7949_v34 = vld [vmem:[#allocation3 + $0xc4] sm:$0xf]  ;;  %2819 = vmatpush.bf16.msra.mxu2 %v8119_v20 }
 0x13b   : > { %v6579_v35 = vld [vmem:[#allocation3 + $0xcc] sm:$0xf0] }
 0x13c   : > { %2244 = vmatmul.bf16.gmra.mxu1 %v6550_v47  ;;  %v7946_v47 = vld [vmem:[#allocation3 + $0xac] sm:$0xf] }
 0x13d   : > { %v6570_v60 = vor.u32 %v7946_v47, %v6567_v49  ;;  %v7950_v49 = vld [vmem:[#allocation3 + $0xc8] sm:$0xf0] }
 0x13e   : > { %2066 = vmatmul.bf16.gmra.mxu3 %v6542_v57  ;;  %v6565_v57 = vld [vmem:[#allocation3 + $0xa8] sm:$0xf] }
 0x13f   : > { %v1437_v62 = vpop.f32.mrf.mxu2  ;;  %v1402_v63 = vpop.f32.mrf.mxu0 }
 0x140   : > { %v8889_v0 = vadd.f32 %v1526_v52, %v1437_v62  ;;  %v6573_v52 = vld [vmem:[#allocation3 + $0xb0] sm:$0xf] }
 0x141   : > { %v1529_v2 = vpop.f32.mrf.mxu3  ;;  %v1491_v3 = vpop.f32.mrf.mxu1  ;;  %v6574_v5 = vor.u32 %v7948_v55, %v6573_v52 }
 0x142   : > { %v8891_v4 = vadd.f32 %v1491_v3, %v1402_v63  ;;  %v7947_v63 = vld [vmem:[#allocation3 + $0xb0] sm:$0xf0] }
 0x144   : > { %1577 = vmatmul.bf16.gmra.mxu2 %v6262_v1  ;;  %v652_v1 = vld [vmem:[#allocation2 + $0xf2] sm:$0xff] }
 0x145   : > { %v688_v7 = vpack.c.bf16 %v652_v1, %v652_v1  ;;  %v6297_v1 = vld [vmem:[#allocation3 + $0xe0] sm:$0xf] }
 0x147   : > { %v1440_v14 = vpop.f32.mrf.mxu2  ;;  %v1405_v16 = vpop.f32.mrf.mxu0  ;;  %724 = vst [vmem:[#allocation3 + $0xf8] sm:$0xf] %v688_v7 }
 0x148   : > { %v8893_v22 = vadd.f32 %v1529_v2, %v1440_v14  ;;  %v653_v2 = vld [vmem:[#allocation2 + $0xfa] sm:$0xff]  ;;  %v6566_v14 = vor.u32 %v7947_v63, %v6565_v57  ;;  %v690_v57 = vpack.c.bf16 %v654_v50, %v654_v50 }
 0x149   : > { %v1531_v30 = vpop.f32.mrf.mxu3  ;;  %v1494_v31 = vpop.f32.mrf.mxu1  ;;  %v689_v9 = vpack.c.bf16 %v653_v2, %v653_v2  ;;  %v8023_v2 = vld [vmem:[#allocation3 + $0xe8] sm:$0xf0] }
 0x14a   : > { %v8895_v32 = vadd.f32 %v1494_v31, %v1405_v16  ;;  %2160 = vmatmul.bf16.gmra.mxu0 %v6558_v13  ;;  %v8136_v16 = vld [vmem:[#allocation7 + $0x218] sm:$0xff]  ;;  %726 = vst [vmem:[#allocation3 + $0x110] sm:$0xf] %v690_v57 }
 0x14b   : > { %725 = vst [vmem:[#allocation3 + $0x104] sm:$0xf] %v689_v9  ;;  %2996 = vmatpush.bf16.msra.mxu0 %v8136_v16  ;;  %v7952_v16 = vld [vmem:[#allocation3 + $0xdc] sm:$0xf] }
 0x14c   : > { %2249 = vmatmul.bf16.gmra.mxu1 %v6562_v25 }
 0x14e   : > { %2071 = vmatmul.bf16.gmra.mxu3 %v6554_v33 }
 0x14f   : > { %v1442_v36 = vpop.f32.mrf.mxu2  ;;  %v1407_v37 = vpop.f32.mrf.mxu0 }
 0x150   : > { %v8897_v39 = vadd.f32 %v1531_v30, %v1442_v36  ;;  %v6585_v36 = vld [vmem:[#allocation3 + $0xc8] sm:$0xf] }
 0x151   : > { %v1534_v42 = vpop.f32.mrf.mxu3  ;;  %v1496_v43 = vpop.f32.mrf.mxu1 }
 0x152   : > { %v8899_v44 = vadd.f32 %v1496_v43, %v1407_v37  ;;  %v7951_v37 = vld [vmem:[#allocation3 + $0xd0] sm:$0xf0] }
 0x153   : > { %v6586_v55 = vor.u32 %v7951_v37, %v6585_v36  ;;  %v7953_v36 = vld [vmem:[#allocation3 + $0xe0] sm:$0xf0]  ;;  %v656_v37 = vld [vmem:[#allocation2 + $0x122] sm:$0xff] }
 0x154   : > { %1582 = vmatmul.bf16.gmra.mxu2 %v6274_v40  ;;  %v6577_v40 = vld [vmem:[#allocation3 + $0xc0] sm:$0xf] }
 0x155   : > { %v6578_v63 = vor.u32 %v7950_v49, %v6577_v40  ;;  %v657_v40 = vld [vmem:[#allocation2 + $0x12a] sm:$0xff]  ;;  %v692_v49 = vpack.c.bf16 %v656_v37, %v656_v37 }
 0x156   : > { %v693_v50 = vpack.c.bf16 %v657_v40, %v657_v40 }
 0x157   : > { %v1445_v61 = vpop.f32.mrf.mxu2  ;;  %v1410_v62 = vpop.f32.mrf.mxu0  ;;  %728 = vst [vmem:[#allocation3 + $0x128] sm:$0xf] %v692_v49  ;;  %v658_v49 = vld [vmem:[#allocation2 + $0x13a] sm:$0xff] }
 0x158   : > { %v8901_v3 = vadd.f32 %v1534_v42, %v1445_v61  ;;  %v6582_v42 = vor.u32 %v7949_v34, %v6579_v35  ;;  %729 = vst [vmem:[#allocation3 + $0x134] sm:$0xf] %v693_v50 }
 0x159   : > { %v1536_v10 = vpop.f32.mrf.mxu3  ;;  %v1499_v11 = vpop.f32.mrf.mxu1 }
 0x15a   : > { %v8903_v13 = vadd.f32 %v1499_v11, %v1410_v62  ;;  %2165 = vmatmul.bf16.gmra.mxu0 %v6570_v60  ;;  %v691_v60 = vpack.c.bf16 %v655_v51, %v655_v51 }
 0x15c   : > { %2254 = vmatmul.bf16.gmra.mxu1 %v6574_v5  ;;  %727 = vst [vmem:[#allocation3 + $0x11c] sm:$0xf] %v691_v60 }
 0x15e   : > { %2076 = vmatmul.bf16.gmra.mxu3 %v6566_v14 }
 0x15f   : > { %v1447_v21 = vpop.f32.mrf.mxu2  ;;  %v1412_v25 = vpop.f32.mrf.mxu0 }
 0x160   : > { %v8905_v26 = vadd.f32 %v1536_v10, %v1447_v21  ;;  %v6298_v10 = vor.u32 %v8023_v2, %v6297_v1  ;;  %v8127_v21 = vld [vmem:[#allocation7 + $0x1d0] sm:$0xff]  ;;  %v6309_v1 = vld [vmem:[#allocation3 + $0xf8] sm:$0xf] }
 0x161   : > { %v1539_v30 = vpop.f32.mrf.mxu3  ;;  %v1501_v31 = vpop.f32.mrf.mxu1  ;;  %2908 = vmatpush.bf16.msra.mxu3 %v8127_v21  ;;  %v8026_v2 = vld [vmem:[#allocation3 + $0x100] sm:$0xf0] }
 0x162   : > { %v8907_v33 = vadd.f32 %v1501_v31, %v1412_v25  ;;  %v6597_v25 = vld [vmem:[#allocation3 + $0xe0] sm:$0xf]  ;;  %v6594_v31 = vor.u32 %v7952_v16, %v6591_v17  ;;  %v6310_v20 = vor.u32 %v8026_v2, %v6309_v1  ;;  %v6321_v2 = vld [vmem:[#allocation3 + $0x110] sm:$0xf] }
 0x164   : > { %1587 = vmatmul.bf16.gmra.mxu2 %v6286_v28  ;;  %v7954_v28 = vld [vmem:[#allocation3 + $0xe8] sm:$0xf0] }
 0x167   : > { %v1450_v43 = vpop.f32.mrf.mxu2  ;;  %v2131_v47 = vpop.f32.mrf.mxu0 }
 0x168   : > { %v8909_v52 = vadd.f32 %v1539_v30, %v1450_v43  ;;  %v6589_v30 = vld [vmem:[#allocation3 + $0xd8] sm:$0xf]  ;;  %v6598_v43 = vor.u32 %v7954_v28, %v6597_v25  ;;  %v7955_v28 = vld [vmem:[#allocation3 + $0xf4] sm:$0xf] }
 0x169   : > { %v1541_v61 = vpop.f32.mrf.mxu3  ;;  %v2220_v62 = vpop.f32.mrf.mxu1  ;;  %v6590_v60 = vor.u32 %v7953_v36, %v6589_v30  ;;  %v6603_v30 = vld [vmem:[#allocation3 + $0xfc] sm:$0xf0] }
 0x16a   : > { %2170 = vmatmul.bf16.gmra.mxu0 %v6582_v42  ;;  %v6606_v37 = vor.u32 %v7955_v28, %v6603_v30 }
 0x16c   : > { %2259 = vmatmul.bf16.gmra.mxu1 %v6586_v55 }
 0x16e   : > { %2081 = vmatmul.bf16.gmra.mxu3 %v6578_v63 }
 0x16f   : > { %v1452_v5 = vpop.f32.mrf.mxu2  ;;  %v2133_v7 = vpop.f32.mrf.mxu0 }
 0x170   : > { %v8911_v9 = vadd.f32 %v1541_v61, %v1452_v5  ;;  %v8135_v61 = vld [vmem:[#allocation7 + $0x210] sm:$0xff] }
 0x171   : > { %v2042_v11 = vpop.f32.mrf.mxu3  ;;  %v2222_v14 = vpop.f32.mrf.mxu1  ;;  %2997 = vmatpush.bf16.msra.mxu0 %v8135_v61 }
 0x174   : > { %1592 = vmatmul.bf16.gmra.mxu2 %v6298_v10 }
 0x177   : > { %v1553_v34 = vpop.f32.mrf.mxu2  ;;  %v2136_v35 = vpop.f32.mrf.mxu0 }
 0x178   : > { %v1554_v42 = vadd.f32 %v1553_v34, %v8848_v19  ;;  %v8268_v19 = vld [vmem:[#allocation9 + $0xf8] sm:$0xff]  ;;  %v7957_v34 = vld [vmem:[#allocation3 + $0x100] sm:$0xf0] }
 0x179   : > { %v2044_v51 = vpop.f32.mrf.mxu3  ;;  %v2225_v55 = vpop.f32.mrf.mxu1  ;;  %4161 = vmatpush.bf16.msra.mxu1 %v8268_v19  ;;  %v8029_v19 = vld [vmem:[#allocation3 + $0x118] sm:$0xf0] }
 0x17a   : > { %v2043_v57 = vadd.f32 %v2042_v11, %v1554_v42  ;;  %2175 = vmatmul.bf16.gmra.mxu0 %v6594_v31  ;;  %v6609_v31 = vld [vmem:[#allocation3 + $0xf8] sm:$0xf] }
 0x17c   : > { %v2132_v63 = vadd.f32 %v2131_v47, %v2043_v57  ;;  %2264 = vmatmul.bf16.gmra.mxu1 %v6598_v43  ;;  %v7956_v43 = vld [vmem:[#allocation3 + $0xf8] sm:$0xf0]  ;;  %v6610_v57 = vor.u32 %v7957_v34, %v6609_v31  ;;  %v6615_v31 = vld [vmem:[#allocation3 + $0x114] sm:$0xf0] }
 0x17e   : > { %v8914_v5 = vadd.f32 %v2220_v62, %v2132_v63  ;;  %2086 = vmatmul.bf16.gmra.mxu3 %v6590_v60  ;;  %v6601_v62 = vld [vmem:[#allocation3 + $0xf0] sm:$0xf]  ;;  %v694_v60 = vpack.c.bf16 %v658_v49, %v658_v49 }
 0x17f   : > { %v1555_v10 = vpop.f32.mrf.mxu2  ;;  %v2138_v16 = vpop.f32.mrf.mxu0 }
 0x180   : > { %v1556_v17 = vadd.f32 %v1555_v10, %v8851_v27  ;;  %v659_v27 = vld [vmem:[#allocation2 + $0x142] sm:$0xff]  ;;  %730 = vst [vmem:[#allocation3 + $0x140] sm:$0xf] %v694_v60  ;;  %v661_v60 = vld [vmem:[#allocation2 + $0x15a] sm:$0xff] }
 0x181   : > { %v2047_v11 = vpop.f32.mrf.mxu3  ;;  %v2227_v21 = vpop.f32.mrf.mxu1 }
 0x182   : > { %v2045_v25 = vadd.f32 %v2044_v51, %v1556_v17  ;;  %v695_v51 = vpack.c.bf16 %v659_v27, %v659_v27 }
 0x184   : > { %1597 = vmatmul.bf16.gmra.mxu2 %v6310_v20  ;;  %v2134_v47 = vadd.f32 %v2133_v7, %v2045_v25  ;;  %v6602_v7 = vor.u32 %v7956_v43, %v6601_v62  ;;  %731 = vst [vmem:[#allocation3 + $0x14c] sm:$0xf] %v695_v51  ;;  %v6322_v25 = vor.u32 %v8029_v19, %v6321_v2  ;;  %v8118_v62 = vld [vmem:[#allocation7 + $0x188] sm:$0xff] }
 0x185   : > { %2820 = vmatpush.bf16.msra.mxu2 %v8118_v62 }
 0x186   : > { %v8917_v36 = vadd.f32 %v2222_v14, %v2134_v47 }
 0x187   : > { %v1558_v40 = vpop.f32.mrf.mxu2  ;;  %v2141_v42 = vpop.f32.mrf.mxu0 }
 0x188   : > { %v1559_v50 = vadd.f32 %v1558_v40, %v8855_v48  ;;  %v7960_v40 = vld [vmem:[#allocation3 + $0x118] sm:$0xf0] }
 0x189   : > { %v2049_v61 = vpop.f32.mrf.mxu3  ;;  %v2230_v63 = vpop.f32.mrf.mxu1 }
 0x18a   : > { %v2048_v1 = vadd.f32 %v2047_v11, %v1559_v50  ;;  %2180 = vmatmul.bf16.gmra.mxu0 %v6606_v37  ;;  %v7958_v11 = vld [vmem:[#allocation3 + $0x10c] sm:$0xf]  ;;  %v6621_v37 = vld [vmem:[#allocation3 + $0x110] sm:$0xf]  ;;  %v7959_v50 = vld [vmem:[#allocation3 + $0x110] sm:$0xf0] }
 0x18b   : > { %v6618_v49 = vor.u32 %v7958_v11, %v6615_v31 }
 0x18c   : > { %v2137_v14 = vadd.f32 %v2136_v35, %v2048_v1  ;;  %2269 = vmatmul.bf16.gmra.mxu1 %v6610_v57  ;;  %v8126_v35 = vld [vmem:[#allocation7 + $0x1c8] sm:$0xff]  ;;  %v660_v57 = vld [vmem:[#allocation2 + $0x152] sm:$0xff] }
 0x18d   : > { %2909 = vmatpush.bf16.msra.mxu3 %v8126_v35  ;;  %v696_v1 = vpack.c.bf16 %v660_v57, %v660_v57 }
 0x18e   : > { %v8920_v10 = vadd.f32 %v2225_v55, %v2137_v14  ;;  %2091 = vmatmul.bf16.gmra.mxu3 %v6602_v7  ;;  %v6613_v55 = vld [vmem:[#allocation3 + $0x108] sm:$0xf] }
 0x18f   : > { %v1560_v17 = vpop.f32.mrf.mxu2  ;;  %v2143_v20 = vpop.f32.mrf.mxu0  ;;  %v6614_v19 = vor.u32 %v7959_v50, %v6613_v55  ;;  %732 = vst [vmem:[#allocation3 + $0x158] sm:$0xf] %v696_v1  ;;  %v6627_v55 = vld [vmem:[#allocation3 + $0x12c] sm:$0xf0]  ;;  %v662_v1 = vld [vmem:[#allocation2 + $0x16a] sm:$0xff] }
 0x190   : > { %v1561_v48 = vadd.f32 %v1560_v17, %v8859_v58 }
 0x191   : > { %v2052_v28 = vpop.f32.mrf.mxu3  ;;  %v2232_v30 = vpop.f32.mrf.mxu1 }
 0x192   : > { %v2050_v47 = vadd.f32 %v2049_v61, %v1561_v48  ;;  %v6622_v61 = vor.u32 %v7960_v40, %v6621_v37  ;;  %v6333_v48 = vld [vmem:[#allocation3 + $0x128] sm:$0xf]  ;;  %v7961_v40 = vld [vmem:[#allocation3 + $0x124] sm:$0xf] }
 0x193   : > { %v6630_v57 = vor.u32 %v7961_v40, %v6627_v55 }
 0x194   : > { %1602 = vmatmul.bf16.gmra.mxu2 %v6322_v25  ;;  %v2139_v34 = vadd.f32 %v2138_v16, %v2050_v47  ;;  %v697_v16 = vpack.c.bf16 %v661_v60, %v661_v60  ;;  %v8032_v25 = vld [vmem:[#allocation3 + $0x130] sm:$0xf0] }
 0x195   : > { %v6334_v62 = vor.u32 %v8032_v25, %v6333_v48  ;;  %v6345_v25 = vld [vmem:[#allocation3 + $0x140] sm:$0xf] }
 0x196   : > { %v8923_v43 = vadd.f32 %v2227_v21, %v2139_v34  ;;  %v8134_v21 = vld [vmem:[#allocation7 + $0x208] sm:$0xff]  ;;  %733 = vst [vmem:[#allocation3 + $0x164] sm:$0xf] %v697_v16 }
 0x197   : > { %v1563_v27 = vpop.f32.mrf.mxu2  ;;  %v2146_v58 = vpop.f32.mrf.mxu0  ;;  %2998 = vmatpush.bf16.msra.mxu0 %v8134_v21 }
 0x198   : > { %v1564_v51 = vadd.f32 %v1563_v27, %v8863_v12  ;;  %v8267_v12 = vld [vmem:[#allocation9 + $0xf0] sm:$0xff]  ;;  %v7963_v27 = vld [vmem:[#allocation3 + $0x130] sm:$0xf0] }
 0x199   : > { %v2054_v7 = vpop.f32.mrf.mxu3  ;;  %v2235_v14 = vpop.f32.mrf.mxu1  ;;  %4162 = vmatpush.bf16.msra.mxu1 %v8267_v12  ;;  %v8035_v12 = vld [vmem:[#allocation3 + $0x148] sm:$0xf0] }
 0x19a   : > { %v2053_v2 = vadd.f32 %v2052_v28, %v1564_v51  ;;  %2185 = vmatmul.bf16.gmra.mxu0 %v6618_v49  ;;  %v6633_v49 = vld [vmem:[#allocation3 + $0x128] sm:$0xf] }
 0x19c   : > { %v2142_v17 = vadd.f32 %v2141_v42, %v2053_v2  ;;  %2274 = vmatmul.bf16.gmra.mxu1 %v6622_v61  ;;  %v7962_v61 = vld [vmem:[#allocation3 + $0x128] sm:$0xf0]  ;;  %v6634_v2 = vor.u32 %v7963_v27, %v6633_v49  ;;  %v6639_v49 = vld [vmem:[#allocation3 + $0x144] sm:$0xf0] }
 0x19e   : > { %v8926_v47 = vadd.f32 %v2230_v63, %v2142_v17  ;;  %2096 = vmatmul.bf16.gmra.mxu3 %v6614_v19  ;;  %v6625_v63 = vld [vmem:[#allocation3 + $0x120] sm:$0xf]  ;;  %v698_v19 = vpack.c.bf16 %v662_v1, %v662_v1 }
 0x19f   : > { %v1565_v11 = vpop.f32.mrf.mxu2  ;;  %v2148_v31 = vpop.f32.mrf.mxu0 }
 0x1a0   : > { %v1566_v34 = vadd.f32 %v1565_v11, %v8867_v23  ;;  %v663_v23 = vld [vmem:[#allocation2 + $0x172] sm:$0xff]  ;;  %734 = vst [vmem:[#allocation3 + $0x170] sm:$0xf] %v698_v19  ;;  %v665_v19 = vld [vmem:[#allocation2 + $0x18a] sm:$0xff] }
 0x1a1   : > { %v2057_v28 = vpop.f32.mrf.mxu3  ;;  %v2237_v35 = vpop.f32.mrf.mxu1 }
 0x1a2   : > { %v2055_v37 = vadd.f32 %v2054_v7, %v1566_v34  ;;  %v699_v7 = vpack.c.bf16 %v663_v23, %v663_v23 }
 0x1a4   : > { %1607 = vmatmul.bf16.gmra.mxu2 %v6334_v62  ;;  %v2144_v42 = vadd.f32 %v2143_v20, %v2055_v37  ;;  %v6626_v20 = vor.u32 %v7962_v61, %v6625_v63  ;;  %735 = vst [vmem:[#allocation3 + $0x17c] sm:$0xf] %v699_v7  ;;  %v6346_v37 = vor.u32 %v8035_v12, %v6345_v25  ;;  %v8125_v63 = vld [vmem:[#allocation7 + $0x1c0] sm:$0xff]  ;;  %v6637_v61 = vld [vmem:[#allocation3 + $0x138] sm:$0xf] }
 0x1a5   : > { %2910 = vmatpush.bf16.msra.mxu3 %v8125_v63 }
 0x1a6   : > { %v8929_v50 = vadd.f32 %v2232_v30, %v2144_v42  ;;  %v7964_v42 = vld [vmem:[#allocation3 + $0x13c] sm:$0xf] }
 0x1a7   : > { %v1568_v60 = vpop.f32.mrf.mxu2  ;;  %v2151_v51 = vpop.f32.mrf.mxu0  ;;  %v6642_v1 = vor.u32 %v7964_v42, %v6639_v49 }
 0x1a8   : > { %v1569_v16 = vadd.f32 %v1568_v60, %v8871_v46  ;;  %v7966_v60 = vld [vmem:[#allocation3 + $0x148] sm:$0xf0] }
 0x1a9   : > { %v2059_v21 = vpop.f32.mrf.mxu3  ;;  %v2240_v17 = vpop.f32.mrf.mxu1 }
 0x1aa   : > { %v2058_v48 = vadd.f32 %v2057_v28, %v1569_v16  ;;  %2190 = vmatmul.bf16.gmra.mxu0 %v6630_v57  ;;  %v6645_v57 = vld [vmem:[#allocation3 + $0x140] sm:$0xf]  ;;  %v7965_v16 = vld [vmem:[#allocation3 + $0x140] sm:$0xf0] }
 0x1ab   : > { %v6638_v12 = vor.u32 %v7965_v16, %v6637_v61 }
 0x1ac   : > { %v2147_v30 = vadd.f32 %v2146_v58, %v2058_v48  ;;  %2279 = vmatmul.bf16.gmra.mxu1 %v6634_v2  ;;  %v8117_v58 = vld [vmem:[#allocation7 + $0x180] sm:$0xff] }
 0x1ad   : > { %2821 = vmatpush.bf16.msra.mxu2 %v8117_v58  ;;  %v664_v2 = vld [vmem:[#allocation2 + $0x182] sm:$0xff] }
 0x1ae   : > { %v8932_v11 = vadd.f32 %v2235_v14, %v2147_v30  ;;  %2101 = vmatmul.bf16.gmra.mxu3 %v6626_v20  ;;  %v700_v48 = vpack.c.bf16 %v664_v2, %v664_v2 }
 0x1af   : > { %v1570_v34 = vpop.f32.mrf.mxu2  ;;  %v2153_v62 = vpop.f32.mrf.mxu0 }
 0x1b0   : > { %v1571_v46 = vadd.f32 %v1570_v34, %v8875_v59  ;;  %736 = vst [vmem:[#allocation3 + $0x188] sm:$0xf] %v700_v48 }
 0x1b1   : > { %v2062_v40 = vpop.f32.mrf.mxu3  ;;  %v8935_v55 = vpop.f32.mrf.mxu1 }
 0x1b2   : > { %v2060_v28 = vadd.f32 %v2059_v21, %v1571_v46  ;;  %v6646_v21 = vor.u32 %v7966_v60, %v6645_v57  ;;  %v6357_v46 = vld [vmem:[#allocation3 + $0x158] sm:$0xf]  ;;  %v7967_v60 = vld [vmem:[#allocation3 + $0x154] sm:$0xf] }
 0x1b4   : > { %1612 = vmatmul.bf16.gmra.mxu2 %v6346_v37  ;;  %v2149_v27 = vadd.f32 %v2148_v31, %v2060_v28  ;;  %v701_v31 = vpack.c.bf16 %v665_v19, %v665_v19  ;;  %v8038_v37 = vld [vmem:[#allocation3 + $0x160] sm:$0xf0]  ;;  %v6649_v19 = vld [vmem:[#allocation3 + $0x150] sm:$0xf] }
 0x1b5   : > { %v6358_v58 = vor.u32 %v8038_v37, %v6357_v46 }
 0x1b6   : > { %v8937_v14 = vadd.f32 %v2237_v35, %v2149_v27  ;;  %v8133_v35 = vld [vmem:[#allocation7 + $0x200] sm:$0xff]  ;;  %737 = vst [vmem:[#allocation3 + $0x194] sm:$0xf] %v701_v31 }
 0x1b7   : > { %v1573_v59 = vpop.f32.mrf.mxu2  ;;  %v2156_v23 = vpop.f32.mrf.mxu0  ;;  %2999 = vmatpush.bf16.msra.mxu0 %v8133_v35  ;;  %v6369_v35 = vld [vmem:[#allocation3 + $0x170] sm:$0xf] }
 0x1b8   : > { %v1574_v7 = vadd.f32 %v1573_v59, %v8879_v15  ;;  %v8266_v15 = vld [vmem:[#allocation9 + $0xe8] sm:$0xff] }
 0x1b9   : > { %v2064_v20 = vpop.f32.mrf.mxu3  ;;  %v2245_v30 = vpop.f32.mrf.mxu1  ;;  %4163 = vmatpush.bf16.msra.mxu1 %v8266_v15 }
 0x1ba   : > { %v2063_v25 = vadd.f32 %v2062_v40, %v1574_v7  ;;  %2195 = vmatmul.bf16.gmra.mxu0 %v6642_v1  ;;  %v6657_v1 = vld [vmem:[#allocation3 + $0x158] sm:$0xf]  ;;  %v7968_v7 = vld [vmem:[#allocation3 + $0x158] sm:$0xf0] }
 0x1bc   : > { %v2152_v34 = vadd.f32 %v2151_v51, %v2063_v25  ;;  %2284 = vmatmul.bf16.gmra.mxu1 %v6646_v21  ;;  %v6651_v51 = vld [vmem:[#allocation3 + $0x15c] sm:$0xf0] }
 0x1bd   : > { %v6654_v59 = vor.u32 %v7967_v60, %v6651_v51  ;;  %v7972_v51 = vld [vmem:[#allocation3 + $0x178] sm:$0xf0] }
 0x1be   : > { %v8940_v28 = vadd.f32 %v2240_v17, %v2152_v34  ;;  %2106 = vmatmul.bf16.gmra.mxu3 %v6638_v12  ;;  %v7969_v17 = vld [vmem:[#allocation3 + $0x160] sm:$0xf0]  ;;  %v6650_v12 = vor.u32 %v7968_v7, %v6649_v19 }
 0x1bf   : > { %v1575_v42 = vpop.f32.mrf.mxu2  ;;  %v2158_v49 = vpop.f32.mrf.mxu0  ;;  %v6658_v21 = vor.u32 %v7969_v17, %v6657_v1 }
 0x1c0   : > { %v1576_v27 = vadd.f32 %v1575_v42, %v8883_v29 }
 0x1c1   : > { %v2067_v40 = vpop.f32.mrf.mxu3  ;;  %v8943_v63 = vpop.f32.mrf.mxu1 }
 0x1c2   : > { %v2065_v57 = vadd.f32 %v2064_v20, %v1576_v27 }
 0x1c4   : > { %1617 = vmatmul.bf16.gmra.mxu2 %v6358_v58  ;;  %v8945_v61 = vadd.f32 %v2153_v62, %v2065_v57  ;;  %v8041_v62 = vld [vmem:[#allocation3 + $0x178] sm:$0xf0]  ;;  %v7970_v57 = vld [vmem:[#allocation3 + $0x16c] sm:$0xf] }
 0x1c5   : > { %v6370_v42 = vor.u32 %v8041_v62, %v6369_v35  ;;  %v8265_v35 = vld [vmem:[#allocation9 + $0xe0] sm:$0xff] }
 0x1c6   : > { %4164 = vmatpush.bf16.msra.mxu1 %v8265_v35 }
 0x1c7   : > { %v1578_v16 = vpop.f32.mrf.mxu2  ;;  %v2161_v2 = vpop.f32.mrf.mxu0 }
 0x1c8   : > { %v1579_v29 = vadd.f32 %v1578_v16, %v8887_v56  ;;  %v7971_v16 = vld [vmem:[#allocation3 + $0x170] sm:$0xf0] }
 0x1c9   : > { %v2069_v48 = vpop.f32.mrf.mxu3  ;;  %v2250_v31 = vpop.f32.mrf.mxu1 }
 0x1ca   : > { %v2068_v25 = vadd.f32 %v2067_v40, %v1579_v29  ;;  %2200 = vmatmul.bf16.gmra.mxu0 %v6654_v59  ;;  %v6663_v40 = vld [vmem:[#allocation3 + $0x174] sm:$0xf0]  ;;  %v6661_v59 = vld [vmem:[#allocation3 + $0x168] sm:$0xf] }
 0x1cb   : > { %v6666_v1 = vor.u32 %v7970_v57, %v6663_v40  ;;  %v6777_v57 = vld [vmem:[#allocation3 + $0x38] sm:$0xf]  ;;  %v8071_v40 = vld [vmem:[#allocation3 + $0x40] sm:$0xf0] }
 0x1cc   : > { %v2157_v20 = vadd.f32 %v2156_v23, %v2068_v25  ;;  %2289 = vmatmul.bf16.gmra.mxu1 %v6658_v21  ;;  %v6669_v23 = vld [vmem:[#allocation3 + $0x170] sm:$0xf]  ;;  %v6662_v25 = vor.u32 %v7971_v16, %v6661_v59 }
 0x1ce   : > { %v8948_v34 = vadd.f32 %v2245_v30, %v2157_v20  ;;  %2111 = vmatmul.bf16.gmra.mxu3 %v6650_v12  ;;  %v6381_v12 = vld [vmem:[#allocation3 + $0x188] sm:$0xf] }
 0x1cf   : > { %v1580_v46 = vpop.f32.mrf.mxu2  ;;  %v2163_v37 = vpop.f32.mrf.mxu0 }
 0x1d0   : > { %v1581_v15 = vadd.f32 %v1580_v46, %v8891_v4  ;;  %v6670_v4 = vor.u32 %v7972_v51, %v6669_v23  ;;  %v6778_v23 = vor.u32 %v8071_v40, %v6777_v57 }
 0x1d1   : > { %v2072_v27 = vpop.f32.mrf.mxu3  ;;  %v8951_v56 = vpop.f32.mrf.mxu1 }
 0x1d2   : > { %v2070_v58 = vadd.f32 %v2069_v48, %v1581_v15 }
 0x1d4   : > { %1622 = vmatmul.bf16.gmra.mxu2 %v6370_v42  ;;  %v8953_v60 = vadd.f32 %v2158_v49, %v2070_v58  ;;  %v8044_v49 = vld [vmem:[#allocation3 + $0x190] sm:$0xf0] }
 0x1d5   : > { %v6382_v42 = vor.u32 %v8044_v49, %v6381_v12 }
 0x1d7   : > { %v1583_v30 = vpop.f32.mrf.mxu2  ;;  %v2166_v17 = vpop.f32.mrf.mxu0 }
 0x1d8   : > { %v1584_v19 = vadd.f32 %v1583_v30, %v8895_v32  ;;  %v6771_v30 = vld [vmem:[#allocation3 + $0x3c] sm:$0xf0] }
 0x1d9   : > { %v2074_v7 = vpop.f32.mrf.mxu3  ;;  %v2255_v29 = vpop.f32.mrf.mxu1 }
 0x1da   : > { %v2073_v21 = vadd.f32 %v2072_v27, %v1584_v19  ;;  %2205 = vmatmul.bf16.gmra.mxu0 %v6666_v1  ;;  %v8069_v1 = vld [vmem:[#allocation3 + $0x34] sm:$0xf] }
 0x1dc   : > { %v2162_v48 = vadd.f32 %v2161_v2, %v2073_v21  ;;  %2294 = vmatmul.bf16.gmra.mxu1 %v6670_v4  ;;  %v6774_v4 = vor.u32 %v8069_v1, %v6771_v30 }
 0x1de   : > { %v8956_v20 = vadd.f32 %v2250_v31, %v2162_v48  ;;  %2116 = vmatmul.bf16.gmra.mxu3 %v6662_v25  ;;  %v6769_v25 = vld [vmem:[#allocation3 + $0x30] sm:$0xf] }
 0x1df   : > { %v1585_v62 = vpop.f32.mrf.mxu2  ;;  %v2168_v46 = vpop.f32.mrf.mxu0 }
 0x1e0   : > { %v1586_v15 = vadd.f32 %v1585_v62, %v8899_v44 }
 0x1e1   : > { %v2077_v32 = vpop.f32.mrf.mxu3  ;;  %v8959_v58 = vpop.f32.mrf.mxu1 }
 0x1e2   : > { %v2075_v27 = vadd.f32 %v2074_v7, %v1586_v15  ;;  %v8070_v7 = vld [vmem:[#allocation3 + $0x38] sm:$0xf0] }
 0x1e3   : > { %v6770_v35 = vor.u32 %v8070_v7, %v6769_v25 }
 0x1e4   : > { %1627 = vmatmul.bf16.gmra.mxu2 %v6382_v42  ;;  %v8961_v2 = vadd.f32 %v2163_v37, %v2075_v27  ;;  %v6789_v42 = vld [vmem:[#allocation3 + $0x50] sm:$0xf]  ;;  %v8074_v27 = vld [vmem:[#allocation3 + $0x58] sm:$0xf0] }
 0x1e7   : > { %v1588_v31 = vpop.f32.mrf.mxu2  ;;  %v2171_v51 = vpop.f32.mrf.mxu0 }
 0x1e8   : > { %v1589_v59 = vadd.f32 %v1588_v31, %v8903_v13 }
 0x1e9   : > { %v2079_v16 = vpop.f32.mrf.mxu3  ;;  %v2260_v44 = vpop.f32.mrf.mxu1 }
 0x1ea   : > { %v2078_v19 = vadd.f32 %v2077_v32, %v1589_v59  ;;  %3000 = vmatmul.bf16.vlgmr.msra.gmra.mxu0 %v6778_v23  ;;  %v6783_v23 = vld [vmem:[#allocation3 + $0x54] sm:$0xf0] }
 0x1ec   : > { %v2167_v21 = vadd.f32 %v2166_v17, %v2078_v19  ;;  %v6790_v17 = vor.u32 %v8074_v27, %v6789_v42  ;;  %v8077_v42 = vld [vmem:[#allocation3 + $0x70] sm:$0xf0] }
 0x1ee   : > { %v8964_v48 = vadd.f32 %v2255_v29, %v2167_v21  ;;  %2911 = vmatmul.bf16.vlgmr.msra.gmra.mxu3 %v6774_v4  ;;  %v8072_v29 = vld [vmem:[#allocation3 + $0x4c] sm:$0xf]  ;;  %v6781_v4 = vld [vmem:[#allocation3 + $0x48] sm:$0xf] }
 0x1ef   : > { %v1590_v37 = vpop.f32.mrf.mxu2  ;;  %v2173_v12 = vpop.f32.mrf.mxu0  ;;  %v6786_v59 = vor.u32 %v8072_v29, %v6783_v23  ;;  %v6795_v29 = vld [vmem:[#allocation3 + $0x6c] sm:$0xf0] }
 0x1f0   : > { %v1591_v49 = vadd.f32 %v1590_v37, %v8907_v33 }
 0x1f1   : > { %v2082_v62 = vpop.f32.mrf.mxu3  ;;  %v8967_v15 = vpop.f32.mrf.mxu1 }
 0x1f2   : > { %v2080_v13 = vadd.f32 %v2079_v16, %v1591_v49  ;;  %v8073_v16 = vld [vmem:[#allocation3 + $0x50] sm:$0xf0] }
 0x1f3   : > { %v6782_v49 = vor.u32 %v8073_v16, %v6781_v4  ;;  %v6793_v4 = vld [vmem:[#allocation3 + $0x60] sm:$0xf] }
 0x1f4   : > { %2822 = vmatmul.bf16.vlgmr.msra.gmra.mxu2 %v6770_v35  ;;  %v8969_v32 = vadd.f32 %v2168_v46, %v2080_v13  ;;  %v8264_v46 = vld [vmem:[#allocation9 + $0xd8] sm:$0xff] }
 0x1f5   : > { %4165 = vmatpush.bf16.msra.mxu1 %v8264_v46 }
 0x1f7   : > { %v1593_v57 = vpop.f32.mrf.mxu2  ;;  %v2176_v40 = vpop.f32.mrf.mxu0 }
 0x1f8   : > { %v1594_v31 = vadd.f32 %v1593_v57, %v8853_v41  ;;  %v8075_v57 = vld [vmem:[#allocation3 + $0x64] sm:$0xf] }
 0x1f9   : > { %v2084_v1 = vpop.f32.mrf.mxu3  ;;  %v2265_v30 = vpop.f32.mrf.mxu1 }
 0x1fa   : > { %v2083_v33 = vadd.f32 %v2082_v62, %v1594_v31  ;;  %3005 = vmatmul.bf16.gmra.mxu0 %v6790_v17  ;;  %v6801_v62 = vld [vmem:[#allocation3 + $0x68] sm:$0xf] }
 0x1fb   : > { %v6802_v27 = vor.u32 %v8077_v42, %v6801_v62  ;;  %v6813_v62 = vld [vmem:[#allocation3 + $0x80] sm:$0xf]  ;;  %v8080_v42 = vld [vmem:[#allocation3 + $0x88] sm:$0xf0] }
 0x1fc   : > { %v2172_v19 = vadd.f32 %v2171_v51, %v2083_v33 }
 0x1fe   : > { %v8972_v21 = vadd.f32 %v2260_v44, %v2172_v19  ;;  %2916 = vmatmul.bf16.gmra.mxu3 %v6786_v59  ;;  %v6798_v59 = vor.u32 %v8075_v57, %v6795_v29  ;;  %v6807_v57 = vld [vmem:[#allocation3 + $0x84] sm:$0xf0] }
 0x1ff   : > { %v1595_v25 = vpop.f32.mrf.mxu2  ;;  %v2178_v7 = vpop.f32.mrf.mxu0 }
 0x200   : > { %v1596_v37 = vadd.f32 %v1595_v25, %v8857_v54 }
 0x201   : > { %v2087_v35 = vpop.f32.mrf.mxu3  ;;  %v8975_v41 = vpop.f32.mrf.mxu1 }
 0x202   : > { %v2085_v13 = vadd.f32 %v2084_v1, %v1596_v37  ;;  %v8076_v1 = vld [vmem:[#allocation3 + $0x68] sm:$0xf0] }
 0x203   : > { %v6794_v37 = vor.u32 %v8076_v1, %v6793_v4  ;;  %v6805_v4 = vld [vmem:[#allocation3 + $0x78] sm:$0xf] }
 0x204   : > { %2827 = vmatmul.bf16.gmra.mxu2 %v6782_v49  ;;  %v8977_v51 = vadd.f32 %v2173_v12, %v2085_v13 }
 0x207   : > { %v1598_v44 = vpop.f32.mrf.mxu2  ;;  %v2181_v17 = vpop.f32.mrf.mxu0 }
 0x208   : > { %v1599_v23 = vadd.f32 %v1598_v44, %v8861_v6 }
 0x209   : > { %v2089_v31 = vpop.f32.mrf.mxu3  ;;  %v2270_v54 = vpop.f32.mrf.mxu1 }
 0x20a   : > { %v2088_v33 = vadd.f32 %v2087_v35, %v1599_v23  ;;  %3010 = vmatmul.bf16.gmra.mxu0 %v6802_v27 }
 0x20c   : > { %v2177_v19 = vadd.f32 %v2176_v40, %v2088_v33  ;;  %v6814_v40 = vor.u32 %v8080_v42, %v6813_v62  ;;  %v6825_v42 = vld [vmem:[#allocation3 + $0x98] sm:$0xf] }
 0x20e   : > { %v8980_v16 = vadd.f32 %v2265_v30, %v2177_v19  ;;  %2921 = vmatmul.bf16.gmra.mxu3 %v6798_v59  ;;  %v8078_v30 = vld [vmem:[#allocation3 + $0x7c] sm:$0xf] }
 0x20f   : > { %v1600_v12 = vpop.f32.mrf.mxu2  ;;  %v2183_v46 = vpop.f32.mrf.mxu0 }
 0x210   : > { %v1601_v25 = vadd.f32 %v1600_v12, %v8865_v18  ;;  %v6810_v18 = vor.u32 %v8078_v30, %v6807_v57  ;;  %v8081_v57 = vld [vmem:[#allocation3 + $0x94] sm:$0xf] }
 0x211   : > { %v2092_v49 = vpop.f32.mrf.mxu3  ;;  %v8983_v13 = vpop.f32.mrf.mxu1 }
 0x212   : > { %v2090_v6 = vadd.f32 %v2089_v31, %v1601_v25  ;;  %v8079_v31 = vld [vmem:[#allocation3 + $0x80] sm:$0xf0] }
 0x214   : > { %2832 = vmatmul.bf16.gmra.mxu2 %v6794_v37  ;;  %v8985_v35 = vadd.f32 %v2178_v7, %v2090_v6  ;;  %v8263_v7 = vld [vmem:[#allocation9 + $0xd0] sm:$0xff]  ;;  %v6806_v6 = vor.u32 %v8079_v31, %v6805_v4  ;;  %v8082_v31 = vld [vmem:[#allocation3 + $0x98] sm:$0xf0] }
 0x215   : > { %4166 = vmatpush.bf16.msra.mxu1 %v8263_v7 }
 0x217   : > { %v1603_v27 = vpop.f32.mrf.mxu2  ;;  %v2186_v44 = vpop.f32.mrf.mxu0 }
 0x218   : > { %v1604_v29 = vadd.f32 %v1603_v27, %v8869_v38 }
 0x219   : > { %v2094_v23 = vpop.f32.mrf.mxu3  ;;  %v2275_v59 = vpop.f32.mrf.mxu1 }
 0x21a   : > { %v2093_v33 = vadd.f32 %v2092_v49, %v1604_v29  ;;  %3015 = vmatmul.bf16.gmra.mxu0 %v6814_v40  ;;  %v8083_v49 = vld [vmem:[#allocation3 + $0xa0] sm:$0xf0]  ;;  %v6819_v29 = vld [vmem:[#allocation3 + $0x9c] sm:$0xf0] }
 0x21b   : > { %v6826_v27 = vor.u32 %v8083_v49, %v6825_v42 }
 0x21c   : > { %v2182_v19 = vadd.f32 %v2181_v17, %v2093_v33 }
 0x21e   : > { %v8988_v1 = vadd.f32 %v2270_v54, %v2182_v19  ;;  %2926 = vmatmul.bf16.gmra.mxu3 %v6810_v18  ;;  %v6822_v19 = vor.u32 %v8081_v57, %v6819_v29  ;;  %v8084_v57 = vld [vmem:[#allocation3 + $0xac] sm:$0xf] }
 0x21f   : > { %v1605_v12 = vpop.f32.mrf.mxu2  ;;  %v2188_v25 = vpop.f32.mrf.mxu0 }
 0x220   : > { %v1606_v37 = vadd.f32 %v1605_v12, %v8873_v53 }
 0x221   : > { %v2097_v62 = vpop.f32.mrf.mxu3  ;;  %v8993_v17 = vpop.f32.mrf.mxu1 }
 0x222   : > { %v2095_v38 = vadd.f32 %v2094_v23, %v1606_v37  ;;  %9811 = vst [vmem:[#allocation14_spill] sm:$0xff] %v8993_v17  ;;  %v6817_v23 = vld [vmem:[#allocation3 + $0x90] sm:$0xf] }
 0x223   : > { %v6837_v17 = vld [vmem:[#allocation3 + $0xb0] sm:$0xf] }
 0x224   : > { %2837 = vmatmul.bf16.gmra.mxu2 %v6806_v6  ;;  %v8991_v40 = vadd.f32 %v2183_v46, %v2095_v38  ;;  %v6818_v38 = vor.u32 %v8082_v31, %v6817_v23  ;;  %v8085_v23 = vld [vmem:[#allocation3 + $0xb0] sm:$0xf0] }
 0x227   : > { %v1608_v54 = vpop.f32.mrf.mxu2  ;;  %v2191_v30 = vpop.f32.mrf.mxu0 }
 0x228   : > { %v1609_v33 = vadd.f32 %v1608_v54, %v8877_v8  ;;  %v8086_v8 = vld [vmem:[#allocation3 + $0xb8] sm:$0xf0] }
 0x229   : > { %v2099_v18 = vpop.f32.mrf.mxu3  ;;  %v2280_v46 = vpop.f32.mrf.mxu1 }
 0x22a   : > { %v2098_v53 = vadd.f32 %v2097_v62, %v1609_v33  ;;  %3020 = vmatmul.bf16.gmra.mxu0 %v6826_v27  ;;  %v6838_v27 = vor.u32 %v8086_v8, %v6837_v17 }
 0x22c   : > { %v2187_v4 = vadd.f32 %v2186_v44, %v2098_v53 }
 0x22e   : > { %v8996_v7 = vadd.f32 %v2275_v59, %v2187_v4  ;;  %2931 = vmatmul.bf16.gmra.mxu3 %v6822_v19  ;;  %v6831_v59 = vld [vmem:[#allocation3 + $0xb4] sm:$0xf0] }
 0x22f   : > { %v1610_v12 = vpop.f32.mrf.mxu2  ;;  %v2193_v37 = vpop.f32.mrf.mxu0 }
 0x230   : > { %v1611_v6 = vadd.f32 %v1610_v12, %v8881_v24  ;;  %v6834_v24 = vor.u32 %v8084_v57, %v6831_v59  ;;  %v8087_v59 = vld [vmem:[#allocation3 + $0xc4] sm:$0xf] }
 0x231   : > { %v2102_v42 = vpop.f32.mrf.mxu3  ;;  %v9002_v33 = vpop.f32.mrf.mxu1 }
 0x232   : > { %v2100_v49 = vadd.f32 %v2099_v18, %v1611_v6  ;;  %v6829_v18 = vld [vmem:[#allocation3 + $0xa8] sm:$0xf] }
 0x234   : > { %2842 = vmatmul.bf16.gmra.mxu2 %v6818_v38  ;;  %v8999_v62 = vadd.f32 %v2188_v25, %v2100_v49  ;;  %v8262_v25 = vld [vmem:[#allocation9 + $0xc8] sm:$0xff]  ;;  %v6830_v38 = vor.u32 %v8085_v23, %v6829_v18 }
 0x235   : > { %4167 = vmatpush.bf16.msra.mxu1 %v8262_v25  ;;  %v8088_v25 = vld [vmem:[#allocation3 + $0xc8] sm:$0xf0] }
 0x237   : > { %v1613_v44 = vpop.f32.mrf.mxu2  ;;  %v2196_v54 = vpop.f32.mrf.mxu0 }
 0x238   : > { %v1614_v29 = vadd.f32 %v1613_v44, %v8885_v45  ;;  %v6849_v44 = vld [vmem:[#allocation3 + $0xc8] sm:$0xf] }
 0x239   : > { %v2104_v53 = vpop.f32.mrf.mxu3  ;;  %v2285_v8 = vpop.f32.mrf.mxu1 }
 0x23a   : > { %v2103_v19 = vadd.f32 %v2102_v42, %v1614_v29  ;;  %3025 = vmatmul.bf16.gmra.mxu0 %v6838_v27  ;;  %v8089_v42 = vld [vmem:[#allocation3 + $0xd0] sm:$0xf0]  ;;  %v6843_v29 = vld [vmem:[#allocation3 + $0xcc] sm:$0xf0] }
 0x23c   : > { %v2192_v4 = vadd.f32 %v2191_v30, %v2103_v19  ;;  %v6850_v30 = vor.u32 %v8089_v42, %v6849_v44 }
 0x23e   : > { %v9004_v31 = vadd.f32 %v2280_v46, %v2192_v4  ;;  %2936 = vmatmul.bf16.gmra.mxu3 %v6834_v24 }
 0x23f   : > { %v1615_v17 = vpop.f32.mrf.mxu2  ;;  %v2198_v12 = vpop.f32.mrf.mxu0 }
 0x240   : > { %v1616_v6 = vadd.f32 %v1615_v17, %v8889_v0  ;;  %v6846_v0 = vor.u32 %v8087_v59, %v6843_v29 }
 0x241   : > { %v2107_v45 = vpop.f32.mrf.mxu3  ;;  %v9010_v23 = vpop.f32.mrf.mxu1 }
 0x242   : > { %v2105_v49 = vadd.f32 %v2104_v53, %v1616_v6  ;;  %9812 = vst [vmem:[#allocation15_spill] sm:$0xff] %v9010_v23  ;;  %v6841_v53 = vld [vmem:[#allocation3 + $0xc0] sm:$0xf] }
 0x244   : > { %2847 = vmatmul.bf16.gmra.mxu2 %v6830_v38  ;;  %v9007_v27 = vadd.f32 %v2193_v37, %v2105_v49  ;;  %v6842_v49 = vor.u32 %v8088_v25, %v6841_v53  ;;  %v6853_v53 = vld [vmem:[#allocation3 + $0xd8] sm:$0xf] }
 0x247   : > { %v1618_v57 = vpop.f32.mrf.mxu2  ;;  %v2201_v46 = vpop.f32.mrf.mxu0 }
 0x248   : > { %v1619_v19 = vadd.f32 %v1618_v57, %v8893_v22  ;;  %v6861_v22 = vld [vmem:[#allocation3 + $0xe0] sm:$0xf]  ;;  %v8092_v57 = vld [vmem:[#allocation3 + $0xe8] sm:$0xf0] }
 0x249   : > { %v2109_v24 = vpop.f32.mrf.mxu3 }
 0x24a   : > { %v2108_v4 = vadd.f32 %v2107_v45, %v1619_v19  ;;  %3030 = vmatmul.bf16.gmra.mxu0 %v6850_v30  ;;  %v6862_v30 = vor.u32 %v8092_v57, %v6861_v22  ;;  %v8090_v19 = vld [vmem:[#allocation3 + $0xdc] sm:$0xf] }
 0x24c   : > { %v2197_v18 = vadd.f32 %v2196_v54, %v2108_v4  ;;  %v2290_v54 = vpop.f32.mrf.mxu1 }
 0x24e   : > { %v9012_v17 = vadd.f32 %v2285_v8, %v2197_v18  ;;  %2941 = vmatmul.bf16.gmra.mxu3 %v6846_v0  ;;  %v6855_v8 = vld [vmem:[#allocation3 + $0xe4] sm:$0xf0] }
 0x24f   : > { %v1620_v37 = vpop.f32.mrf.mxu2  ;;  %v2203_v6 = vpop.f32.mrf.mxu0  ;;  %v6858_v23 = vor.u32 %v8090_v19, %v6855_v8  ;;  %v6867_v8 = vld [vmem:[#allocation3 + $0xfc] sm:$0xf0] }
 0x250   : > { %v1621_v38 = vadd.f32 %v1620_v37, %v8897_v39 }
 0x251   : > { %v2112_v44 = vpop.f32.mrf.mxu3 }
 0x252   : > { %v2110_v42 = vadd.f32 %v2109_v24, %v1621_v38  ;;  %v8091_v24 = vld [vmem:[#allocation3 + $0xe0] sm:$0xf0] }
 0x254   : > { %2852 = vmatmul.bf16.gmra.mxu2 %v6842_v49  ;;  %v9015_v45 = vadd.f32 %v2198_v12, %v2110_v42  ;;  %v6854_v49 = vor.u32 %v8091_v24, %v6853_v53  ;;  %v9021_v42 = vpop.f32.mrf.mxu1  ;;  %v6865_v24 = vld [vmem:[#allocation3 + $0xf0] sm:$0xf] }
 0x255   : > { %9813 = vst [vmem:[#allocation16_spill] sm:$0xff] %v9021_v42  ;;  %v6885_v42 = vld [vmem:[#allocation3 + $0x110] sm:$0xf] }
 0x257   : > { %v1623_v59 = vpop.f32.mrf.mxu2  ;;  %v2206_v29 = vpop.f32.mrf.mxu0 }
 0x258   : > { %v1624_v4 = vadd.f32 %v1623_v59, %v8901_v3  ;;  %v8261_v3 = vld [vmem:[#allocation9 + $0xc0] sm:$0xff]  ;;  %v6873_v59 = vld [vmem:[#allocation3 + $0xf8] sm:$0xf] }
 0x259   : > { %v2114_v0 = vpop.f32.mrf.mxu3  ;;  %4168 = vmatpush.bf16.msra.mxu1 %v8261_v3 }
 0x25a   : > { %v2113_v18 = vadd.f32 %v2112_v44, %v1624_v4  ;;  %3035 = vmatmul.bf16.gmra.mxu0 %v6862_v30  ;;  %v8095_v44 = vld [vmem:[#allocation3 + $0x100] sm:$0xf0] }
 0x25c   : > { %v2202_v39 = vadd.f32 %v2201_v46, %v2113_v18  ;;  %v6874_v46 = vor.u32 %v8095_v44, %v6873_v59  ;;  %v2295_v53 = vpop.f32.mrf.mxu1 }
 0x25e   : > { %v9018_v25 = vadd.f32 %v2290_v54, %v2202_v39  ;;  %2946 = vmatmul.bf16.gmra.mxu3 %v6858_v23  ;;  %v8093_v23 = vld [vmem:[#allocation3 + $0xf4] sm:$0xf] }
 0x25f   : > { %v1625_v12 = vpop.f32.mrf.mxu2  ;;  %v2208_v37 = vpop.f32.mrf.mxu0  ;;  %v6870_v39 = vor.u32 %v8093_v23, %v6867_v8  ;;  %v8096_v23 = vld [vmem:[#allocation3 + $0x10c] sm:$0xf]  ;;  %v6879_v8 = vld [vmem:[#allocation3 + $0x114] sm:$0xf0] }
 0x260   : > { %v1626_v38 = vadd.f32 %v1625_v12, %v8905_v26  ;;  %v8094_v12 = vld [vmem:[#allocation3 + $0xf8] sm:$0xf0] }
 0x261   : > { %v2117_v22 = vpop.f32.mrf.mxu3  ;;  %v6866_v3 = vor.u32 %v8094_v12, %v6865_v24 }
 0x262   : > { %v2115_v57 = vadd.f32 %v2114_v0, %v1626_v38 }
 0x264   : > { %2857 = vmatmul.bf16.gmra.mxu2 %v6854_v49  ;;  %v9023_v30 = vadd.f32 %v2203_v6, %v2115_v57 }
 0x267   : > { %v1628_v54 = vpop.f32.mrf.mxu2  ;;  %v3001_v19 = vpop.f32.mrf.mxu0 }
 0x268   : > { %v1629_v4 = vadd.f32 %v1628_v54, %v8909_v52  ;;  %v8098_v52 = vld [vmem:[#allocation3 + $0x118] sm:$0xf0] }
 0x269   : > { %v2119_v26 = vpop.f32.mrf.mxu3 }
 0x26a   : > { %v2118_v18 = vadd.f32 %v2117_v22, %v1629_v4  ;;  %3040 = vmatmul.bf16.gmra.mxu0 %v6874_v46  ;;  %v6886_v46 = vor.u32 %v8098_v52, %v6885_v42  ;;  %v8097_v42 = vld [vmem:[#allocation3 + $0x110] sm:$0xf0]  ;;  %v8276_v52 = vld [vmem:[#allocation9 + $0x138] sm:$0xff] }
 0x26b   : > { %4250 = vmatpush.bf16.msrb.mxu2 %v8276_v52  ;;  %v6889_v52 = vld [vmem:[#allocation3 + $0x120] sm:$0xf] }
 0x26c   : > { %v2207_v0 = vadd.f32 %v2206_v29, %v2118_v18 }
 0x26e   : > { %v9026_v38 = vadd.f32 %v2295_v53, %v2207_v0  ;;  %2951 = vmatmul.bf16.gmra.mxu3 %v6870_v39  ;;  %v6882_v53 = vor.u32 %v8096_v23, %v6879_v8  ;;  %v6897_v8 = vld [vmem:[#allocation3 + $0x128] sm:$0xf] }
 0x26f   : > { %v1630_v6 = vpop.f32.mrf.mxu2  ;;  %v3003_v49 = vpop.f32.mrf.mxu0 }
 0x270   : > { %v1631_v57 = vadd.f32 %v1630_v6, %v8911_v9  ;;  %v9034_v9 = vld [vmem:[%s9803_s3] ss:$0 sm:$0xff] }
 0x271   : > { %v2912_v59 = vpop.f32.mrf.mxu3 }
 0x272   : > { %v2120_v44 = vadd.f32 %v2119_v26, %v1631_v57  ;;  %v8284_v26 = vld [vmem:[#allocation9 + $0x178] sm:$0xff] }
 0x273   : > { %4339 = vmatpush.bf16.msrb.mxu3 %v8284_v26 }
 0x274   : > { %2862 = vmatmul.bf16.gmra.mxu2 %v6866_v3  ;;  %v9029_v22 = vadd.f32 %v2208_v37, %v2120_v44  ;;  %v6877_v37 = vld [vmem:[#allocation3 + $0x108] sm:$0xf] }
 0x275   : > { %v6878_v3 = vor.u32 %v8097_v42, %v6877_v37 }
 0x277   : > { %v2823_v54 = vpop.f32.mrf.mxu2  ;;  %v3006_v29 = vpop.f32.mrf.mxu0 }
 0x278   : > { %v2913_v4 = vadd.f32 %v2912_v59, %v2823_v54  ;;  %v8196_v54 = vld [vmem:[#allocation9 + $0x38] sm:$0xff] }
 0x279   : > { %v2914_v18 = vpop.f32.mrf.mxu3  ;;  %4828 = vmatpush.bf16.msrb.mxu0 %v8196_v54  ;;  %v8100_v54 = vld [vmem:[#allocation3 + $0x128] sm:$0xf0] }
 0x27a   : > { %v3002_v39 = vadd.f32 %v3001_v19, %v2913_v4  ;;  %3045 = vmatmul.bf16.gmra.mxu0 %v6886_v46  ;;  %v8204_v46 = vld [vmem:[#allocation9 + $0x78] sm:$0xff] }
 0x27b   : > { %4917 = vmatpush.bf16.msrb.mxu1 %v8204_v46 }
 0x27c   : > { %v3081_v0 = vadd.f32 %v3002_v39, %v8914_v5  ;;  %v8101_v5 = vld [vmem:[#allocation3 + $0x130] sm:$0xf0] }
 0x27d   : > { %v6898_v26 = vor.u32 %v8101_v5, %v6897_v8 }
 0x27e   : > { %v3116_v24 = vadd.f32 %v9034_v9, %v3081_v0  ;;  %2956 = vmatmul.bf16.gmra.mxu3 %v6882_v53  ;;  %v6891_v53 = vld [vmem:[#allocation3 + $0x12c] sm:$0xf0] }
 0x27f   : > { %v2825_v12 = vpop.f32.mrf.mxu2  ;;  %v3008_v6 = vpop.f32.mrf.mxu0 }
 0x280   : > { %v3148_v57 = vmax.f32 %v3116_v24, 0.0  ;;  %v2915_v19 = vadd.f32 %v2914_v18, %v2825_v12  ;;  %v8099_v18 = vld [vmem:[#allocation3 + $0x124] sm:$0xf] }
 0x281   : > { %v2917_v59 = vpop.f32.mrf.mxu3  ;;  %v6894_v12 = vor.u32 %v8099_v18, %v6891_v53 }
 0x282   : > { %3180 = vst [vmem:[#allocation2 + $0x19] sm:$0xff] %v3148_v57  ;;  %v3004_v44 = vadd.f32 %v3003_v49, %v2915_v19  ;;  %v3358_v23 = vpack.c.bf16 %v3148_v57, %v3148_v57 }
 0x284   : > { %v3082_v4 = vadd.f32 %v3004_v44, %v8917_v36  ;;  %2867 = vmatmul.bf16.gmra.mxu2 %v6878_v3  ;;  %3394 = vst [vmem:[#allocation3 + $0x1c] sm:$0xf] %v3358_v23 }
 0x286   : > { %v3117_v39 = vadd.f32 %v9034_v9, %v3082_v4  ;;  %v6890_v4 = vor.u32 %v8100_v54, %v6889_v52 }
 0x287   : > { %v2828_v0 = vpop.f32.mrf.mxu2  ;;  %v3011_v49 = vpop.f32.mrf.mxu0 }
 0x288   : > { %v3149_v37 = vmax.f32 %v3117_v39, 0.0  ;;  %v2918_v42 = vadd.f32 %v2917_v59, %v2828_v0 }
 0x289   : > { %v2919_v24 = vpop.f32.mrf.mxu3  ;;  %v3214_v57 = vld [vmem:[#allocation2 + $0x18] sm:$0xff] }
 0x28a   : > { %3181 = vst [vmem:[#allocation2 + $0x21] sm:$0xff] %v3149_v37  ;;  %v3007_v19 = vadd.f32 %v3006_v29, %v2918_v42  ;;  %3050 = vmatmul.bf16.gmra.mxu0 %v6898_v26  ;;  %v3250_v36 = vpack.c.bf16 %v3214_v57, %v3214_v57  ;;  %v3359_v3 = vpack.c.bf16 %v3149_v37, %v3149_v37  ;;  %v8104_v37 = vld [vmem:[#allocation3 + $0x148] sm:$0xf0] }
 0x28c   : > { %v3083_v44 = vadd.f32 %v3007_v19, %v8920_v10  ;;  %3286 = vst [vmem:[#allocation3 + $0x18] sm:$0xf] %v3250_v36  ;;  %v6909_v10 = vld [vmem:[#allocation3 + $0x140] sm:$0xf]  ;;  %v8102_v36 = vld [vmem:[#allocation3 + $0x13c] sm:$0xf] }
 0x28d   : > { %3395 = vst [vmem:[#allocation3 + $0x28] sm:$0xf] %v3359_v3  ;;  %v6903_v3 = vld [vmem:[#allocation3 + $0x144] sm:$0xf0] }
 0x28e   : > { %v3118_v46 = vadd.f32 %v9034_v9, %v3083_v44  ;;  %2961 = vmatmul.bf16.gmra.mxu3 %v6894_v12  ;;  %v6910_v44 = vor.u32 %v8104_v37, %v6909_v10  ;;  %v6901_v37 = vld [vmem:[#allocation3 + $0x138] sm:$0xf] }
 0x28f   : > { %v2830_v23 = vpop.f32.mrf.mxu2  ;;  %v3013_v8 = vpop.f32.mrf.mxu0 }
 0x290   : > { %v3150_v59 = vmax.f32 %v3118_v46, 0.0  ;;  %v2920_v5 = vadd.f32 %v2919_v24, %v2830_v23 }
 0x291   : > { %v2922_v39 = vpop.f32.mrf.mxu3  ;;  %v3215_v18 = vld [vmem:[#allocation2 + $0x20] sm:$0xff] }
 0x292   : > { %3182 = vst [vmem:[#allocation2 + $0x31] sm:$0xff] %v3150_v59  ;;  %v3009_v29 = vadd.f32 %v3008_v6, %v2920_v5  ;;  %v3251_v53 = vpack.c.bf16 %v3215_v18, %v3215_v18  ;;  %v3430_v26 = vld [vmem:[#allocation2 + $0x1a] sm:$0xff]  ;;  %v3360_v0 = vpack.c.bf16 %v3150_v59, %v3150_v59  ;;  %v3431_v12 = vld [vmem:[#allocation2 + $0x22] sm:$0xff]  ;;  %v6906_v59 = vor.u32 %v8102_v36, %v6903_v3  ;;  %v8283_v18 = vld [vmem:[#allocation9 + $0x170] sm:$0xff] }
 0x293   : > { %v3466_v42 = vpack.c.bf16 %v3430_v26, %v3430_v26  ;;  %v3467_v19 = vpack.c.bf16 %v3431_v12, %v3431_v12  ;;  %4340 = vmatpush.bf16.msrb.mxu3 %v8283_v18 }
 0x294   : > { %v3084_v57 = vadd.f32 %v3009_v29, %v8923_v43  ;;  %2872 = vmatmul.bf16.gmra.mxu2 %v6890_v4  ;;  %3287 = vst [vmem:[#allocation3 + $0x24] sm:$0xf] %v3251_v53  ;;  %v7057_v53 = vld [vmem:[#allocation3 + $0x18] sm:$0xf] }
 0x295   : > { %3502 = vst [vmem:[#allocation3 + $0x20] sm:$0xf] %v3466_v42  ;;  %v8103_v42 = vld [vmem:[#allocation3 + $0x140] sm:$0xf0] }
 0x296   : > { %v3119_v24 = vadd.f32 %v9034_v9, %v3084_v57  ;;  %3396 = vst [vmem:[#allocation3 + $0x34] sm:$0xf] %v3360_v0 }
 0x297   : > { %v2833_v6 = vpop.f32.mrf.mxu2  ;;  %v9044_v52 = vpop.f32.mrf.mxu0  ;;  %3503 = vst [vmem:[#allocation3 + $0x2c] sm:$0xf] %v3467_v19 }
 0x298   : > { %v3151_v54 = vmax.f32 %v3119_v24, 0.0  ;;  %v2923_v46 = vadd.f32 %v2922_v39, %v2833_v6  ;;  %v6902_v24 = vor.u32 %v8103_v42, %v6901_v37  ;;  %v8275_v6 = vld [vmem:[#allocation9 + $0x130] sm:$0xff] }
 0x299   : > { %v2924_v23 = vpop.f32.mrf.mxu3  ;;  %v3216_v43 = vld [vmem:[#allocation2 + $0x30] sm:$0xff]  ;;  %4251 = vmatpush.bf16.msrb.mxu2 %v8275_v6 }
 0x29a   : > { %3183 = vst [vmem:[#allocation2 + $0x39] sm:$0xff] %v3151_v54  ;;  %v3012_v5 = vadd.f32 %v3011_v49, %v2923_v46  ;;  %3055 = vmatmul.bf16.gmra.mxu0 %v6910_v44  ;;  %v3252_v4 = vpack.c.bf16 %v3216_v43, %v3216_v43  ;;  %v3361_v29 = vpack.c.bf16 %v3151_v54, %v3151_v54  ;;  %v8195_v54 = vld [vmem:[#allocation9 + $0x30] sm:$0xff] }
 0x29b   : > { %v8214_v26 = vld [vmem:[#allocation3 + $0x20] sm:$0xf0]  ;;  %4829 = vmatpush.bf16.msrb.mxu0 %v8195_v54 }
 0x29c   : > { %v3085_v10 = vadd.f32 %v3012_v5, %v8926_v47  ;;  %v7058_v0 = vor.u32 %v8214_v26, %v7057_v53  ;;  %3288 = vst [vmem:[#allocation3 + $0x30] sm:$0xf] %v3252_v4  ;;  %v8203_v46 = vld [vmem:[#allocation9 + $0x70] sm:$0xff]  ;;  %v6921_v5 = vld [vmem:[#allocation3 + $0x158] sm:$0xf] }
 0x29d   : > { %3397 = vst [vmem:[#allocation3 + $0x40] sm:$0xf] %v3361_v29  ;;  %v8107_v4 = vld [vmem:[#allocation3 + $0x160] sm:$0xf0]  ;;  %4918 = vmatpush.bf16.msrb.mxu1 %v8203_v46  ;;  %v6915_v53 = vld [vmem:[#allocation3 + $0x15c] sm:$0xf0] }
 0x29e   : > { %v3120_v39 = vadd.f32 %v9034_v9, %v3085_v10  ;;  %4169 = vmatmul.bf16.vlgmr.msra.gmra.mxu1 %v7058_v0  ;;  %2966 = vmatmul.bf16.gmra.mxu3 %v6906_v59  ;;  %v6922_v26 = vor.u32 %v8107_v4, %v6921_v5  ;;  %v8106_v5 = vld [vmem:[#allocation3 + $0x158] sm:$0xf0] }
 0x29f   : > { %v2835_v57 = vpop.f32.mrf.mxu2  ;;  %v9048_v49 = vpop.f32.mrf.mxu0 }
 0x2a0   : > { %v3152_v12 = vmax.f32 %v3120_v39, 0.0  ;;  %v2925_v19 = vadd.f32 %v2924_v23, %v2835_v57 }
 0x2a1   : > { %v2927_v36 = vpop.f32.mrf.mxu3  ;;  %v3217_v3 = vld [vmem:[#allocation2 + $0x38] sm:$0xff] }
 0x2a2   : > { %3184 = vst [vmem:[#allocation2 + $0x49] sm:$0xff] %v3152_v12  ;;  %v3014_v47 = vadd.f32 %v3013_v8, %v2925_v19  ;;  %v3253_v44 = vpack.c.bf16 %v3217_v3, %v3217_v3  ;;  %v3362_v43 = vpack.c.bf16 %v3152_v12, %v3152_v12  ;;  %v3432_v23 = vld [vmem:[#allocation2 + $0x32] sm:$0xff]  ;;  %v3433_v59 = vld [vmem:[#allocation2 + $0x3a] sm:$0xff]  ;;  %v8105_v8 = vld [vmem:[#allocation3 + $0x154] sm:$0xf] }
 0x2a3   : > { %v3468_v10 = vpack.c.bf16 %v3432_v23, %v3432_v23  ;;  %v3469_v0 = vpack.c.bf16 %v3433_v59, %v3433_v59  ;;  %v6918_v12 = vor.u32 %v8105_v8, %v6915_v53 }
 0x2a4   : > { %v3086_v18 = vadd.f32 %v3014_v47, %v8929_v50  ;;  %2877 = vmatmul.bf16.gmra.mxu2 %v6902_v24  ;;  %3289 = vst [vmem:[#allocation3 + $0x3c] sm:$0xf] %v3253_v44  ;;  %v7069_v44 = vld [vmem:[#allocation3 + $0x30] sm:$0xf] }
 0x2a5   : > { %3398 = vst [vmem:[#allocation3 + $0x4c] sm:$0xf] %v3362_v43  ;;  %v6913_v43 = vld [vmem:[#allocation3 + $0x150] sm:$0xf] }
 0x2a6   : > { %v3121_v29 = vadd.f32 %v9034_v9, %v3086_v18  ;;  %3504 = vst [vmem:[#allocation3 + $0x38] sm:$0xf] %v3468_v10  ;;  %v6914_v59 = vor.u32 %v8106_v5, %v6913_v43  ;;  %v559_v5 = vld [vmem:[#allocation2 + $0x1a1] sm:$0xff] }
 0x2a7   : > { %v2838_v37 = vpop.f32.mrf.mxu2  ;;  %v9052_v42 = vpop.f32.mrf.mxu0  ;;  %3505 = vst [vmem:[#allocation3 + $0x44] sm:$0xf] %v3469_v0  ;;  %v6933_v0 = vld [vmem:[#allocation3 + $0x170] sm:$0xf] }
 0x2a8   : > { %v3153_v39 = vmax.f32 %v3121_v29, 0.0  ;;  %v2928_v50 = vadd.f32 %v2927_v36, %v2838_v37  ;;  %v8110_v37 = vld [vmem:[#allocation3 + $0x178] sm:$0xf0] }
 0x2a9   : > { %v2929_v57 = vpop.f32.mrf.mxu3  ;;  %v3218_v19 = vld [vmem:[#allocation2 + $0x48] sm:$0xff] }
 0x2aa   : > { %3185 = vst [vmem:[#allocation2 + $0x51] sm:$0xff] %v3153_v39  ;;  %v3017_v24 = vadd.f32 %v9044_v52, %v2928_v50  ;;  %3060 = vmatmul.bf16.gmra.mxu0 %v6922_v26  ;;  %v3254_v3 = vpack.c.bf16 %v3218_v19, %v3218_v19  ;;  %v3363_v47 = vpack.c.bf16 %v3153_v39, %v3153_v39 }
 0x2ab   : > { %v8217_v6 = vld [vmem:[#allocation3 + $0x38] sm:$0xf0] }
 0x2ac   : > { %v3087_v54 = vadd.f32 %v3017_v24, %v8932_v11  ;;  %v7070_v46 = vor.u32 %v8217_v6, %v7069_v44  ;;  %3290 = vst [vmem:[#allocation3 + $0x48] sm:$0xf] %v3254_v3  ;;  %v8108_v24 = vld [vmem:[#allocation3 + $0x16c] sm:$0xf]  ;;  %v6927_v3 = vld [vmem:[#allocation3 + $0x174] sm:$0xf0] }
 0x2ad   : > { %3399 = vst [vmem:[#allocation3 + $0x58] sm:$0xf] %v3363_v47  ;;  %v6934_v47 = vor.u32 %v8110_v37, %v6933_v0  ;;  %v558_v6 = vld [vmem:[#allocation2 + $0x199] sm:$0xff]  ;;  %v8274_v0 = vld [vmem:[#allocation9 + $0x128] sm:$0xff] }
 0x2ae   : > { %v3122_v36 = vadd.f32 %v9034_v9, %v3087_v54  ;;  %4174 = vmatmul.bf16.gmra.mxu1 %v7070_v46  ;;  %2971 = vmatmul.bf16.gmra.mxu3 %v6918_v12  ;;  %v8194_v37 = vld [vmem:[#allocation9 + $0x28] sm:$0xff] }
 0x2af   : > { %v2840_v4 = vpop.f32.mrf.mxu2  ;;  %v9057_v18 = vpop.f32.mrf.mxu0  ;;  %4252 = vmatpush.bf16.msrb.mxu2 %v8274_v0  ;;  %4830 = vmatpush.bf16.msrb.mxu0 %v8194_v37  ;;  %v8272_v0 = vld [vmem:[#allocation9 + $0x118] sm:$0xff] }
 0x2b0   : > { %v3154_v52 = vmax.f32 %v3122_v36, 0.0  ;;  %v2930_v23 = vadd.f32 %v2929_v57, %v2840_v4  ;;  %v6930_v4 = vor.u32 %v8108_v24, %v6927_v3  ;;  %v8280_v37 = vld [vmem:[#allocation9 + $0x158] sm:$0xff] }
 0x2b1   : > { %v2932_v29 = vpop.f32.mrf.mxu3  ;;  %v3219_v8 = vld [vmem:[#allocation2 + $0x50] sm:$0xff] }
 0x2b2   : > { %3186 = vst [vmem:[#allocation2 + $0x61] sm:$0xff] %v3154_v52  ;;  %v3019_v11 = vadd.f32 %v9048_v49, %v2930_v23  ;;  %v3255_v53 = vpack.c.bf16 %v3219_v8, %v3219_v8  ;;  %v3434_v26 = vld [vmem:[#allocation2 + $0x4a] sm:$0xff]  ;;  %v3364_v10 = vpack.c.bf16 %v3154_v52, %v3154_v52  ;;  %v3435_v12 = vld [vmem:[#allocation2 + $0x52] sm:$0xff]  ;;  %v666_v23 = vld [vmem:[#allocation2 + $0x19a] sm:$0xff] }
 0x2b3   : > { %v3470_v39 = vpack.c.bf16 %v3434_v26, %v3434_v26  ;;  %v3471_v19 = vpack.c.bf16 %v3435_v12, %v3435_v12  ;;  %v7081_v8 = vld [vmem:[#allocation3 + $0x48] sm:$0xf]  ;;  %v9070_v26 = vpack.c.bf16 %v558_v6, %v558_v6  ;;  %v8281_v6 = vld [vmem:[#allocation9 + $0x160] sm:$0xff] }
 0x2b4   : > { %v3088_v50 = vadd.f32 %v3019_v11, %v8937_v14  ;;  %2882 = vmatmul.bf16.gmra.mxu2 %v6914_v59  ;;  %3291 = vst [vmem:[#allocation3 + $0x54] sm:$0xf] %v3255_v53  ;;  %v8450_v14 = vld [vmem:[#allocation2] sm:$0xff]  ;;  %v8282_v53 = vld [vmem:[#allocation9 + $0x168] sm:$0xff] }
 0x2b5   : > { %3506 = vst [vmem:[#allocation3 + $0x50] sm:$0xf] %v3470_v39  ;;  %v9066_v43 = vpack.c.bf16 %v8450_v14, %v8450_v14  ;;  %v9073_v39 = vpack.c.bf16 %v559_v5, %v559_v5  ;;  %4341 = vmatpush.bf16.msrb.mxu3 %v8282_v53  ;;  %v6945_v53 = vld [vmem:[#allocation3 + $0x188] sm:$0xf] }
 0x2b6   : > { %v3123_v57 = vadd.f32 %v9034_v9, %v3088_v50  ;;  %3400 = vst [vmem:[#allocation3 + $0x64] sm:$0xf] %v3364_v10  ;;  %v667_v10 = vld [vmem:[#allocation2 + $0x1a2] sm:$0xff] }
 0x2b7   : > { %v2843_v49 = vpop.f32.mrf.mxu2  ;;  %v9062_v44 = vpop.f32.mrf.mxu0  ;;  %3507 = vst [vmem:[#allocation3 + $0x5c] sm:$0xf] %v3471_v19  ;;  %v6925_v19 = vld [vmem:[#allocation3 + $0x168] sm:$0xf]  ;;  %v9079_v24 = vpack.c.bf16 %v667_v10, %v667_v10  ;;  %v8202_v10 = vld [vmem:[#allocation9 + $0x68] sm:$0xff] }
 0x2b8   : > { %v9064_v54 = vmax.f32 %v3123_v57, 0.0  ;;  %v2933_v46 = vadd.f32 %v2932_v29, %v2843_v49  ;;  %522 = vst [vmem:[#allocation3 + $0x198] sm:$0xf] %v9066_v43  ;;  %v8109_v57 = vld [vmem:[#allocation3 + $0x170] sm:$0xf0]  ;;  %4919 = vmatpush.bf16.msrb.mxu1 %v8202_v10 }
 0x2b9   : > { %v2934_v36 = vpop.f32.mrf.mxu3  ;;  %v3220_v52 = vld [vmem:[#allocation2 + $0x60] sm:$0xff]  ;;  %523 = vst [vmem:[#allocation3 + $0x1a4] sm:$0xf] %v9066_v43  ;;  %4342 = vmatpush.bf16.msrb.mxu3 %v8281_v6 }
 0x2ba   : > { %3187 = vst [vmem:[#allocation2 + $0x69] sm:$0xff] %v9064_v54  ;;  %v3022_v59 = vadd.f32 %v9052_v42, %v2933_v46  ;;  %3065 = vmatmul.bf16.gmra.mxu0 %v6934_v47  ;;  %v3256_v11 = vpack.c.bf16 %v3220_v52, %v3220_v52  ;;  %v9076_v42 = vpack.c.bf16 %v666_v23, %v666_v23  ;;  %v8273_v49 = vld [vmem:[#allocation9 + $0x120] sm:$0xff] }
 0x2bb   : > { %v8220_v29 = vld [vmem:[#allocation3 + $0x50] sm:$0xf0]  ;;  %630 = vst [vmem:[#allocation3 + $0x19c] sm:$0xf] %v9070_v26  ;;  %v6926_v52 = vor.u32 %v8109_v57, %v6925_v19  ;;  %4253 = vmatpush.bf16.msrb.mxu2 %v8273_v49 }
 0x2bc   : > { %v3089_v50 = vadd.f32 %v3022_v59, %v8940_v28  ;;  %v7082_v12 = vor.u32 %v8220_v29, %v7081_v8  ;;  %3292 = vst [vmem:[#allocation3 + $0x60] sm:$0xf] %v3256_v11  ;;  %v8193_v46 = vld [vmem:[#allocation9 + $0x20] sm:$0xff] }
 0x2bd   : > { %631 = vst [vmem:[#allocation3 + $0x1a8] sm:$0xf] %v9073_v39  ;;  %4831 = vmatpush.bf16.msrb.mxu0 %v8193_v46  ;;  %v8113_v29 = vld [vmem:[#allocation3 + $0x190] sm:$0xf0]  ;;  %4343 = vmatpush.bf16.msrb.mxu3 %v8280_v37 }
 0x2be   : > { %v3124_v3 = vadd.f32 %v9034_v9, %v3089_v50  ;;  %4179 = vmatmul.bf16.gmra.mxu1 %v7082_v12  ;;  %2976 = vmatmul.bf16.gmra.mxu3 %v6930_v4  ;;  %738 = vst [vmem:[#allocation3 + $0x1a0] sm:$0xf] %v9076_v42  ;;  %v2243_v4 = vadd.f32 %v8935_v55, %v8945_v61  ;;  %v8111_v12 = vld [vmem:[#allocation3 + $0x184] sm:$0xf]  ;;  %v8192_v61 = vld [vmem:[#allocation9 + $0x18] sm:$0xff] }
 0x2bf   : > { %v2845_v28 = vpop.f32.mrf.mxu2  ;;  %v9083_v47 = vpop.f32.mrf.mxu0  ;;  %739 = vst [vmem:[#allocation3 + $0x1ac] sm:$0xf] %v9079_v24  ;;  %4254 = vmatpush.bf16.msrb.mxu2 %v8272_v0 }
 0x2c0   : > { %v9086_v14 = vmax.f32 %v3124_v3, 0.0  ;;  %v2935_v5 = vadd.f32 %v2934_v36, %v2845_v28  ;;  %v9094_v36 = vld [vmem:[#allocation3 + $0x198] sm:$0xf]  ;;  %v9097_v55 = vld [vmem:[#allocation3 + $0x1a0] sm:$0xf0]  ;;  %v6946_v3 = vor.u32 %v8113_v29, %v6945_v53 }
 0x2c1   : > { %v2937_v23 = vpop.f32.mrf.mxu3  ;;  %v3221_v59 = vld [vmem:[#allocation2 + $0x68] sm:$0xff]  ;;  %3318 = vst [vmem:[#allocation3 + $0x198] sm:$0xf] %v9066_v43  ;;  %4832 = vmatpush.bf16.msrb.mxu0 %v8192_v61 }
 0x2c2   : > { %3188 = vst [vmem:[#allocation2 + $0x79] sm:$0xff] %v9086_v14  ;;  %v3024_v8 = vadd.f32 %v9057_v18, %v2935_v5  ;;  %v3257_v11 = vpack.c.bf16 %v3221_v59, %v3221_v59  ;;  %v6939_v18 = vld [vmem:[#allocation3 + $0x18c] sm:$0xf0]  ;;  %v9100_v19 = vld [vmem:[#allocation3 + $0x19c] sm:$0xf]  ;;  %v8279_v59 = vld [vmem:[#allocation9 + $0x150] sm:$0xff] }
 0x2c3   : > { %3319 = vst [vmem:[#allocation3 + $0x1a4] sm:$0xf] %v9066_v43  ;;  %v3436_v49 = vld [vmem:[#allocation2 + $0x62] sm:$0xff]  ;;  %v3437_v6 = vld [vmem:[#allocation2 + $0x6a] sm:$0xff]  ;;  %v6942_v29 = vor.u32 %v8111_v12, %v6939_v18  ;;  %4344 = vmatpush.bf16.msrb.mxu3 %v8279_v59  ;;  %v3366_v12 = vpack.c.bf16 %v9086_v14, %v9086_v14 }
 0x2c4   : > { %v3090_v50 = vadd.f32 %v3024_v8, %v2243_v4  ;;  %2887 = vmatmul.bf16.gmra.mxu2 %v6926_v52  ;;  %3293 = vst [vmem:[#allocation3 + $0x6c] sm:$0xf] %v3257_v11  ;;  %v9103_v28 = vld [vmem:[#allocation3 + $0x1a4] sm:$0xf0]  ;;  %v8271_v52 = vld [vmem:[#allocation9 + $0x110] sm:$0xff]  ;;  %v3365_v4 = vpack.c.bf16 %v9064_v54, %v9064_v54  ;;  %v8269_v14 = vld [vmem:[#allocation9 + $0x100] sm:$0xff] }
 0x2c5   : > { %3426 = vst [vmem:[#allocation3 + $0x19c] sm:$0xf] %v9070_v26  ;;  %v9109_v43 = vld [vmem:[#allocation3 + $0x1a0] sm:$0xf]  ;;  %4255 = vmatpush.bf16.msrb.mxu2 %v8271_v52 }
 0x2c6   : > { %v3125_v57 = vadd.f32 %v9034_v9, %v3090_v50  ;;  %3427 = vst [vmem:[#allocation3 + $0x1a8] sm:$0xf] %v9073_v39  ;;  %v9113_v53 = vld [vmem:[#allocation3 + $0x1a8] sm:$0xf0]  ;;  %v8191_v26 = vld [vmem:[#allocation9 + $0x10] sm:$0xff]  ;;  %v3472_v39 = vpack.c.bf16 %v3436_v49, %v3436_v49  ;;  %v8190_v49 = vld [vmem:[#allocation9 + $0x8] sm:$0xff] }
 0x2c7   : > { %v2848_v46 = vpop.f32.mrf.mxu2  ;;  %v9106_v5 = vpop.f32.mrf.mxu0  ;;  %3534 = vst [vmem:[#allocation3 + $0x1a0] sm:$0xf] %v9076_v42  ;;  %v7093_v50 = vld [vmem:[#allocation3 + $0x60] sm:$0xf]  ;;  %4833 = vmatpush.bf16.msrb.mxu0 %v8191_v26  ;;  %v8278_v42 = vld [vmem:[#allocation9 + $0x148] sm:$0xff] }
 0x2c8   : > { %v3157_v8 = vmax.f32 %v3125_v57, 0.0  ;;  %v2938_v11 = vadd.f32 %v2937_v23, %v2848_v46  ;;  %3535 = vst [vmem:[#allocation3 + $0x1ac] sm:$0xf] %v9079_v24  ;;  %v3473_v23 = vpack.c.bf16 %v3437_v6, %v3437_v6  ;;  %v8270_v57 = vld [vmem:[#allocation9 + $0x108] sm:$0xff]  ;;  %v6937_v52 = vld [vmem:[#allocation3 + $0x180] sm:$0xf]  ;;  %4345 = vmatpush.bf16.msrb.mxu3 %v8278_v42 }
 0x2c9   : > { %v2939_v10 = vpop.f32.mrf.mxu3  ;;  %v3222_v0 = vld [vmem:[#allocation2 + $0x78] sm:$0xff]  ;;  %3401 = vst [vmem:[#allocation3 + $0x70] sm:$0xf] %v3365_v4  ;;  %4256 = vmatpush.bf16.msrb.mxu2 %v8270_v57  ;;  %v8189_v4 = vld [vmem:[#allocation9] sm:$0xff] }
 0x2ca   : > { %3189 = vst [vmem:[#allocation2 + $0x81] sm:$0xff] %v3157_v8  ;;  %v3027_v37 = vadd.f32 %v9062_v44, %v2938_v11  ;;  %3070 = vmatmul.bf16.gmra.mxu0 %v6946_v3  ;;  %v3258_v54 = vpack.c.bf16 %v3222_v0, %v3222_v0  ;;  %v3367_v46 = vpack.c.bf16 %v3157_v8, %v3157_v8  ;;  %v8112_v44 = vld [vmem:[#allocation3 + $0x188] sm:$0xf0] }
 0x2cb   : > { %v8223_v61 = vld [vmem:[#allocation3 + $0x68] sm:$0xf0]  ;;  %3508 = vst [vmem:[#allocation3 + $0x68] sm:$0xf] %v3472_v39  ;;  %4834 = vmatpush.bf16.msrb.mxu0 %v8190_v49  ;;  %v6938_v26 = vor.u32 %v8112_v44, %v6937_v52  ;;  %v2248_v0 = vadd.f32 %v8943_v63, %v8953_v60  ;;  %v6958_v60 = vor.u32 %v9113_v53, %v9109_v43 }
 0x2cc   : > { %v3091_v24 = vadd.f32 %v3027_v37, %v8948_v34  ;;  %v7094_v18 = vor.u32 %v8223_v61, %v7093_v50  ;;  %3294 = vst [vmem:[#allocation3 + $0x78] sm:$0xf] %v3258_v54  ;;  %v8277_v34 = vld [vmem:[#allocation9 + $0x140] sm:$0xff] }
 0x2cd   : > { %3509 = vst [vmem:[#allocation3 + $0x74] sm:$0xf] %v3473_v23  ;;  %4257 = vmatpush.bf16.msrb.mxu2 %v8269_v14  ;;  %4346 = vmatpush.bf16.msrb.mxu3 %v8277_v34 }
 0x2ce   : > { %v3126_v3 = vadd.f32 %v9034_v9, %v3091_v24  ;;  %4184 = vmatmul.bf16.gmra.mxu1 %v7094_v18  ;;  %2981 = vmatmul.bf16.gmra.mxu3 %v6942_v29  ;;  %3402 = vst [vmem:[#allocation3 + $0x7c] sm:$0xf] %v3366_v12 }
 0x2cf   : > { %v2850_v6 = vpop.f32.mrf.mxu2  ;;  %v9122_v59 = vpop.f32.mrf.mxu0  ;;  %3403 = vst [vmem:[#allocation3 + $0x88] sm:$0xf] %v3367_v46  ;;  %4835 = vmatpush.bf16.msrb.mxu0 %v8189_v4  ;;  %v6954_v46 = vor.u32 %v9100_v19, %v9103_v28 }
 0x2d0   : > { %v3158_v11 = vmax.f32 %v3126_v3, 0.0  ;;  %v2940_v8 = vadd.f32 %v2939_v10, %v2850_v6 }
 0x2d1   : > { %v2942_v39 = vpop.f32.mrf.mxu3  ;;  %v3223_v37 = vld [vmem:[#allocation2 + $0x80] sm:$0xff] }
 0x2d2   : > { %v3438_v29 = vld [vmem:[#allocation2 + $0x7a] sm:$0xff]  ;;  %v3439_v50 = vld [vmem:[#allocation2 + $0x82] sm:$0xff]  ;;  %3190 = vst [vmem:[#allocation2 + $0x91] sm:$0xff] %v3158_v11  ;;  %v3029_v54 = vadd.f32 %v9083_v47, %v2940_v8  ;;  %v3259_v23 = vpack.c.bf16 %v3223_v37, %v3223_v37  ;;  %v3368_v42 = vpack.c.bf16 %v3158_v11, %v3158_v11 }
 0x2d3   : > { %v3474_v61 = vpack.c.bf16 %v3438_v29, %v3438_v29  ;;  %v3475_v57 = vpack.c.bf16 %v3439_v50, %v3439_v50  ;;  %v7105_v14 = vld [vmem:[#allocation3 + $0x78] sm:$0xf] }
 0x2d4   : > { %v3092_v10 = vadd.f32 %v3029_v54, %v2248_v0  ;;  %2892 = vmatmul.bf16.gmra.mxu2 %v6938_v26  ;;  %3295 = vst [vmem:[#allocation3 + $0x84] sm:$0xf] %v3259_v23  ;;  %v2253_v26 = vadd.f32 %v8951_v56, %v8961_v2  ;;  %v8201_v54 = vld [vmem:[#allocation9 + $0x60] sm:$0xff] }
 0x2d5   : > { %3510 = vst [vmem:[#allocation3 + $0x80] sm:$0xf] %v3474_v61  ;;  %4920 = vmatpush.bf16.msrb.mxu1 %v8201_v54 }
 0x2d6   : > { %v3127_v63 = vadd.f32 %v9034_v9, %v3092_v10  ;;  %3511 = vst [vmem:[#allocation3 + $0x8c] sm:$0xf] %v3475_v57  ;;  %v7345_v57 = vld [vmem:[#allocation3] sm:$0xf] }
 0x2d7   : > { %v2853_v12 = vpop.f32.mrf.mxu2  ;;  %v3036_v24 = vpop.f32.mrf.mxu0  ;;  %3404 = vst [vmem:[#allocation3 + $0x94] sm:$0xf] %v3368_v42  ;;  %v8142_v42 = vld [vmem:[#allocation3 + $0x8] sm:$0xf0] }
 0x2d8   : > { %v3159_v18 = vmax.f32 %v3127_v63, 0.0  ;;  %v2943_v47 = vadd.f32 %v2942_v39, %v2853_v12  ;;  %v7346_v2 = vor.u32 %v8142_v42, %v7345_v57  ;;  %v8145_v42 = vld [vmem:[#allocation3 + $0x20] sm:$0xf0] }
 0x2d9   : > { %v2944_v49 = vpop.f32.mrf.mxu3  ;;  %v3224_v52 = vld [vmem:[#allocation2 + $0x90] sm:$0xff] }
 0x2da   : > { %3191 = vst [vmem:[#allocation2 + $0x99] sm:$0xff] %v3159_v18  ;;  %v3032_v44 = vadd.f32 %v9106_v5, %v2943_v47  ;;  %3075 = vmatmul.bf16.gmra.mxu0 %v6958_v60  ;;  %v3260_v3 = vpack.c.bf16 %v3224_v52, %v3224_v52  ;;  %v3369_v6 = vpack.c.bf16 %v3159_v18, %v3159_v18  ;;  %v7065_v18 = vld [vmem:[#allocation3 + $0x20] sm:$0xf]  ;;  %v8215_v47 = vld [vmem:[#allocation3 + $0x28] sm:$0xf0] }
 0x2db   : > { %v8226_v34 = vld [vmem:[#allocation3 + $0x80] sm:$0xf0]  ;;  %v6950_v5 = vor.u32 %v9097_v55, %v9094_v36 }
 0x2dc   : > { %v3093_v43 = vadd.f32 %v3032_v44, %v8956_v20  ;;  %v7106_v53 = vor.u32 %v8226_v34, %v7105_v14  ;;  %3296 = vst [vmem:[#allocation3 + $0x90] sm:$0xf] %v3260_v3 }
 0x2dd   : > { %3405 = vst [vmem:[#allocation3 + $0xa0] sm:$0xf] %v3369_v6 }
 0x2de   : > { %v3128_v4 = vadd.f32 %v9034_v9, %v3093_v43  ;;  %4189 = vmatmul.bf16.gmra.mxu1 %v7106_v53  ;;  %2986 = vmatmul.bf16.gmra.mxu3 %v6954_v46  ;;  %v7066_v43 = vor.u32 %v8215_v47, %v7065_v18 }
 0x2df   : > { %v2855_v11 = vpop.f32.mrf.mxu2  ;;  %v9135_v19 = vpop.f32.mrf.mxu0 }
 0x2e0   : > { %v3160_v28 = vmax.f32 %v3128_v4, 0.0  ;;  %v2945_v8 = vadd.f32 %v2944_v49, %v2855_v11  ;;  %v7059_v4 = vld [vmem:[#allocation3 + $0x24] sm:$0xf0] }
 0x2e1   : > { %v2947_v0 = vpop.f32.mrf.mxu3  ;;  %v3225_v20 = vld [vmem:[#allocation2 + $0x98] sm:$0xff] }
 0x2e2   : > { %v3440_v39 = vld [vmem:[#allocation2 + $0x92] sm:$0xff]  ;;  %v3441_v37 = vld [vmem:[#allocation2 + $0x9a] sm:$0xff]  ;;  %3192 = vst [vmem:[#allocation2 + $0xa9] sm:$0xff] %v3160_v28  ;;  %v3034_v29 = vadd.f32 %v9122_v59, %v2945_v8  ;;  %v3261_v50 = vpack.c.bf16 %v3225_v20, %v3225_v20  ;;  %v3370_v10 = vpack.c.bf16 %v3160_v28, %v3160_v28 }
 0x2e3   : > { %v3476_v23 = vpack.c.bf16 %v3440_v39, %v3440_v39  ;;  %v3477_v61 = vpack.c.bf16 %v3441_v37, %v3441_v37  ;;  %v7117_v3 = vld [vmem:[#allocation3 + $0x90] sm:$0xf] }
 0x2e4   : > { %v3094_v63 = vadd.f32 %v3034_v29, %v2253_v26  ;;  %2897 = vmatmul.bf16.gmra.mxu2 %v6950_v5  ;;  %3297 = vst [vmem:[#allocation3 + $0x9c] sm:$0xf] %v3261_v50  ;;  %v8213_v5 = vld [vmem:[#allocation3 + $0x1c] sm:$0xf]  ;;  %v2258_v26 = vadd.f32 %v8959_v58, %v8969_v32 }
 0x2e5   : > { %3512 = vst [vmem:[#allocation3 + $0x98] sm:$0xf] %v3476_v23 }
 0x2e6   : > { %v3129_v56 = vadd.f32 %v9034_v9, %v3094_v63  ;;  %3513 = vst [vmem:[#allocation3 + $0xa4] sm:$0xf] %v3477_v61  ;;  %v7357_v63 = vld [vmem:[#allocation3 + $0x18] sm:$0xf] }
 0x2e7   : > { %v2858_v36 = vpop.f32.mrf.mxu2  ;;  %v3041_v55 = vpop.f32.mrf.mxu0  ;;  %3406 = vst [vmem:[#allocation3 + $0xac] sm:$0xf] %v3370_v10 }
 0x2e8   : > { %v3161_v59 = vmax.f32 %v3129_v56, 0.0  ;;  %v2948_v60 = vadd.f32 %v2947_v0, %v2858_v36  ;;  %v7062_v0 = vor.u32 %v8213_v5, %v7059_v4 }
 0x2e9   : > { %v2949_v12 = vpop.f32.mrf.mxu3  ;;  %v3226_v49 = vld [vmem:[#allocation2 + $0xa8] sm:$0xff] }
 0x2ea   : > { %3193 = vst [vmem:[#allocation2 + $0xb1] sm:$0xff] %v3161_v59  ;;  %v3037_v46 = vadd.f32 %v3036_v24, %v2948_v60  ;;  %4836 = vmatmul.bf16.vlgmr.msrb.gmra.mxu0 %v7346_v2  ;;  %v3262_v52 = vpack.c.bf16 %v3226_v49, %v3226_v49  ;;  %v3371_v44 = vpack.c.bf16 %v3161_v59, %v3161_v59  ;;  %v7077_v59 = vld [vmem:[#allocation3 + $0x38] sm:$0xf]  ;;  %v8218_v60 = vld [vmem:[#allocation3 + $0x40] sm:$0xf0] }
 0x2eb   : > { %v8229_v6 = vld [vmem:[#allocation3 + $0x98] sm:$0xf0] }
 0x2ec   : > { %v3095_v14 = vadd.f32 %v3037_v46, %v8964_v48  ;;  %v7118_v34 = vor.u32 %v8229_v6, %v7117_v3  ;;  %3298 = vst [vmem:[#allocation3 + $0xa8] sm:$0xf] %v3262_v52  ;;  %v7078_v6 = vor.u32 %v8218_v60, %v7077_v59 }
 0x2ed   : > { %3407 = vst [vmem:[#allocation3 + $0xb8] sm:$0xf] %v3371_v44 }
 0x2ee   : > { %v3130_v53 = vadd.f32 %v9034_v9, %v3095_v14  ;;  %4194 = vmatmul.bf16.gmra.mxu1 %v7118_v34  ;;  %4347 = vmatmul.bf16.vlgmr.msrb.gmra.mxu3 %v7066_v43  ;;  %v7071_v34 = vld [vmem:[#allocation3 + $0x3c] sm:$0xf0] }
 0x2ef   : > { %v2860_v11 = vpop.f32.mrf.mxu2  ;;  %v3043_v28 = vpop.f32.mrf.mxu0 }
 0x2f0   : > { %v3162_v8 = vmax.f32 %v3130_v53, 0.0  ;;  %v2950_v24 = vadd.f32 %v2949_v12, %v2860_v11  ;;  %v8216_v11 = vld [vmem:[#allocation3 + $0x34] sm:$0xf] }
 0x2f1   : > { %v2952_v20 = vpop.f32.mrf.mxu3  ;;  %v3227_v48 = vld [vmem:[#allocation2 + $0xb0] sm:$0xff] }
 0x2f2   : > { %v3442_v39 = vld [vmem:[#allocation2 + $0xaa] sm:$0xff]  ;;  %v3443_v37 = vld [vmem:[#allocation2 + $0xb2] sm:$0xff]  ;;  %3194 = vst [vmem:[#allocation2 + $0xc1] sm:$0xff] %v3162_v8  ;;  %v3039_v29 = vadd.f32 %v9135_v19, %v2950_v24  ;;  %v3263_v50 = vpack.c.bf16 %v3227_v48, %v3227_v48  ;;  %v3372_v61 = vpack.c.bf16 %v3162_v8, %v3162_v8  ;;  %v7358_v19 = vor.u32 %v8145_v42, %v7357_v63  ;;  %v7089_v63 = vld [vmem:[#allocation3 + $0x50] sm:$0xf] }
 0x2f3   : > { %v3478_v54 = vpack.c.bf16 %v3442_v39, %v3442_v39  ;;  %v3479_v23 = vpack.c.bf16 %v3443_v37, %v3443_v37  ;;  %v7129_v46 = vld [vmem:[#allocation3 + $0xa8] sm:$0xf]  ;;  %v2263_v8 = vadd.f32 %v8967_v15, %v8977_v51  ;;  %v7074_v24 = vor.u32 %v8216_v11, %v7071_v34 }
 0x2f4   : > { %v3096_v57 = vadd.f32 %v3039_v29, %v2258_v26  ;;  %4258 = vmatmul.bf16.vlgmr.msrb.gmra.mxu2 %v7062_v0  ;;  %3299 = vst [vmem:[#allocation3 + $0xb4] sm:$0xf] %v3263_v50  ;;  %v8200_v39 = vld [vmem:[#allocation9 + $0x58] sm:$0xff] }
 0x2f5   : > { %3514 = vst [vmem:[#allocation3 + $0xb0] sm:$0xf] %v3478_v54  ;;  %4921 = vmatpush.bf16.msrb.mxu1 %v8200_v39 }
 0x2f6   : > { %v3131_v10 = vadd.f32 %v9034_v9, %v3096_v57  ;;  %3515 = vst [vmem:[#allocation3 + $0xbc] sm:$0xf] %v3479_v23  ;;  %v8148_v23 = vld [vmem:[#allocation3 + $0x38] sm:$0xf0]  ;;  %v7369_v57 = vld [vmem:[#allocation3 + $0x30] sm:$0xf] }
 0x2f7   : > { %v2863_v58 = vpop.f32.mrf.mxu2  ;;  %v9149_v32 = vpop.f32.mrf.mxu0  ;;  %3408 = vst [vmem:[#allocation3 + $0xc4] sm:$0xf] %v3372_v61 }
 0x2f8   : > { %v3163_v56 = vmax.f32 %v3131_v10, 0.0  ;;  %v2953_v2 = vadd.f32 %v2952_v20, %v2863_v58  ;;  %v7370_v10 = vor.u32 %v8148_v23, %v7369_v57  ;;  %v7101_v23 = vld [vmem:[#allocation3 + $0x68] sm:$0xf] }
 0x2f9   : > { %v2954_v36 = vpop.f32.mrf.mxu3  ;;  %v3228_v12 = vld [vmem:[#allocation2 + $0xc0] sm:$0xff] }
 0x2fa   : > { %3195 = vst [vmem:[#allocation2 + $0xc9] sm:$0xff] %v3163_v56  ;;  %v3042_v18 = vadd.f32 %v3041_v55, %v2953_v2  ;;  %4841 = vmatmul.bf16.gmra.mxu0 %v7358_v19  ;;  %v3264_v47 = vpack.c.bf16 %v3228_v12, %v3228_v12  ;;  %v3373_v49 = vpack.c.bf16 %v3163_v56, %v3163_v56  ;;  %v8221_v56 = vld [vmem:[#allocation3 + $0x58] sm:$0xf0] }
 0x2fb   : > { %v8232_v52 = vld [vmem:[#allocation3 + $0xb0] sm:$0xf0] }
 0x2fc   : > { %v3097_v44 = vadd.f32 %v3042_v18, %v8972_v21  ;;  %v7130_v3 = vor.u32 %v8232_v52, %v7129_v46  ;;  %3300 = vst [vmem:[#allocation3 + $0xc0] sm:$0xf] %v3264_v47  ;;  %v7090_v47 = vor.u32 %v8221_v56, %v7089_v63 }
 0x2fd   : > { %3409 = vst [vmem:[#allocation3 + $0xd0] sm:$0xf] %v3373_v49  ;;  %v9165_v49 = vld [vmem:[%s9803_s3] ss:$0 sm:$0xff] }
 0x2fe   : > { %v3132_v14 = vadd.f32 %v9034_v9, %v3097_v44  ;;  %4199 = vmatmul.bf16.gmra.mxu1 %v7130_v3  ;;  %4352 = vmatmul.bf16.gmra.mxu3 %v7078_v6 }
 0x2ff   : > { %v2865_v43 = vpop.f32.mrf.mxu2  ;;  %v9153_v53 = vpop.f32.mrf.mxu0 }
 0x300   : > { %v3164_v55 = vmax.f32 %v3132_v14, 0.0  ;;  %v2955_v4 = vadd.f32 %v2954_v36, %v2865_v43  ;;  %v2268_v14 = vadd.f32 %v8975_v41, %v8985_v35 }
 0x301   : > { %v2957_v21 = vpop.f32.mrf.mxu3  ;;  %v3229_v5 = vld [vmem:[#allocation2 + $0xc8] sm:$0xff] }
 0x302   : > { %v3444_v26 = vld [vmem:[#allocation2 + $0xc2] sm:$0xff]  ;;  %v3445_v0 = vld [vmem:[#allocation2 + $0xca] sm:$0xff]  ;;  %3196 = vst [vmem:[#allocation2 + $0xd9] sm:$0xff] %v3164_v55  ;;  %v3044_v20 = vadd.f32 %v3043_v28, %v2955_v4  ;;  %v3265_v48 = vpack.c.bf16 %v3229_v5, %v3229_v5  ;;  %v3374_v50 = vpack.c.bf16 %v3164_v55, %v3164_v55 }
 0x303   : > { %v3480_v37 = vpack.c.bf16 %v3444_v26, %v3444_v26  ;;  %v3481_v29 = vpack.c.bf16 %v3445_v0, %v3445_v0  ;;  %v9173_v26 = vpop.f32.mrf.mxu1 }
 0x304   : > { %v3098_v54 = vadd.f32 %v3044_v20, %v2263_v8  ;;  %4263 = vmatmul.bf16.gmra.mxu2 %v7074_v24  ;;  %3301 = vst [vmem:[#allocation3 + $0xcc] sm:$0xf] %v3265_v48  ;;  %v8151_v48 = vld [vmem:[#allocation3 + $0x50] sm:$0xf0] }
 0x305   : > { %3516 = vst [vmem:[#allocation3 + $0xc8] sm:$0xf] %v3480_v37  ;;  %v7381_v37 = vld [vmem:[#allocation3 + $0x48] sm:$0xf] }
 0x306   : > { %v3133_v15 = vadd.f32 %v9034_v9, %v3098_v54  ;;  %3517 = vst [vmem:[#allocation3 + $0xd4] sm:$0xf] %v3481_v29  ;;  %v7141_v9 = vld [vmem:[#allocation3 + $0xc0] sm:$0xf] }
 0x307   : > { %v2868_v51 = vpop.f32.mrf.mxu2  ;;  %v9158_v61 = vpop.f32.mrf.mxu0  ;;  %3410 = vst [vmem:[#allocation3 + $0xdc] sm:$0xf] %v3374_v50  ;;  %v7382_v50 = vor.u32 %v8151_v48, %v7381_v37  ;;  %v7113_v48 = vld [vmem:[#allocation3 + $0x80] sm:$0xf] }
 0x308   : > { %v3165_v28 = vmax.f32 %v3133_v15, 0.0  ;;  %v2958_v42 = vadd.f32 %v2957_v21, %v2868_v51  ;;  %v8224_v15 = vld [vmem:[#allocation3 + $0x70] sm:$0xf0] }
 0x309   : > { %v2959_v58 = vpop.f32.mrf.mxu3  ;;  %v3230_v2 = vld [vmem:[#allocation2 + $0xd8] sm:$0xff] }
 0x30a   : > { %3197 = vst [vmem:[#allocation2 + $0xe1] sm:$0xff] %v3165_v28  ;;  %v3047_v19 = vadd.f32 %v9149_v32, %v2958_v42  ;;  %4846 = vmatmul.bf16.gmra.mxu0 %v7370_v10  ;;  %v3266_v36 = vpack.c.bf16 %v3230_v2, %v3230_v2  ;;  %v3375_v59 = vpack.c.bf16 %v3165_v28, %v3165_v28  ;;  %v7083_v32 = vld [vmem:[#allocation3 + $0x54] sm:$0xf0] }
 0x30b   : > { %v8235_v60 = vld [vmem:[#allocation3 + $0xc8] sm:$0xf0] }
 0x30c   : > { %v3099_v12 = vadd.f32 %v3047_v19, %v8980_v16  ;;  %v7142_v18 = vor.u32 %v8235_v60, %v7141_v9  ;;  %3302 = vst [vmem:[#allocation3 + $0xd8] sm:$0xf] %v3266_v36  ;;  %v8219_v16 = vld [vmem:[#allocation3 + $0x4c] sm:$0xf]  ;;  %v7102_v19 = vor.u32 %v8224_v15, %v7101_v23 }
 0x30d   : > { %3411 = vst [vmem:[#allocation3 + $0xe8] sm:$0xf] %v3375_v59  ;;  %v7086_v34 = vor.u32 %v8219_v16, %v7083_v32  ;;  %v7095_v59 = vld [vmem:[#allocation3 + $0x6c] sm:$0xf0] }
 0x30e   : > { %v3134_v46 = vadd.f32 %v9165_v49, %v3099_v12  ;;  %4204 = vmatmul.bf16.gmra.mxu1 %v7142_v18  ;;  %4357 = vmatmul.bf16.gmra.mxu3 %v7090_v47  ;;  %v8222_v18 = vld [vmem:[#allocation3 + $0x64] sm:$0xf]  ;;  %v2273_v47 = vadd.f32 %v8983_v13, %v8991_v40  ;;  %v8154_v13 = vld [vmem:[#allocation3 + $0x68] sm:$0xf0] }
 0x30f   : > { %v2870_v52 = vpop.f32.mrf.mxu2  ;;  %v9168_v44 = vpop.f32.mrf.mxu0 }
 0x310   : > { %v3166_v3 = vmax.f32 %v3134_v46, 0.0  ;;  %v2960_v6 = vadd.f32 %v2959_v58, %v2870_v52  ;;  %v7098_v46 = vor.u32 %v8222_v18, %v7095_v59 }
 0x311   : > { %v2962_v43 = vpop.f32.mrf.mxu3  ;;  %v3231_v55 = vld [vmem:[#allocation2 + $0xe0] sm:$0xff] }
 0x312   : > { %v3446_v4 = vld [vmem:[#allocation2 + $0xda] sm:$0xff]  ;;  %v3447_v11 = vld [vmem:[#allocation2 + $0xe2] sm:$0xff]  ;;  %3198 = vst [vmem:[#allocation2 + $0xf1] sm:$0xff] %v3166_v3  ;;  %v3049_v8 = vadd.f32 %v9153_v53, %v2960_v6  ;;  %v3267_v24 = vpack.c.bf16 %v3231_v55, %v3231_v55  ;;  %v3376_v0 = vpack.c.bf16 %v3166_v3, %v3166_v3 }
 0x313   : > { %v3482_v21 = vpack.c.bf16 %v3446_v4, %v3446_v4  ;;  %v3483_v5 = vpack.c.bf16 %v3447_v11, %v3447_v11  ;;  %v7153_v58 = vld [vmem:[#allocation3 + $0xd8] sm:$0xf] }
 0x314   : > { %v3100_v20 = vadd.f32 %v3049_v8, %v2268_v14  ;;  %4268 = vmatmul.bf16.gmra.mxu2 %v7086_v34  ;;  %3303 = vst [vmem:[#allocation3 + $0xe4] sm:$0xf] %v3267_v24  ;;  %v8199_v14 = vld [vmem:[#allocation9 + $0x50] sm:$0xff] }
 0x315   : > { %3518 = vst [vmem:[#allocation3 + $0xe0] sm:$0xf] %v3482_v21  ;;  %4922 = vmatpush.bf16.msrb.mxu1 %v8199_v14 }
 0x316   : > { %v3135_v41 = vadd.f32 %v9165_v49, %v3100_v20  ;;  %3519 = vst [vmem:[#allocation3 + $0xec] sm:$0xf] %v3483_v5 }
 0x317   : > { %v2873_v35 = vpop.f32.mrf.mxu2  ;;  %v9176_v39 = vpop.f32.mrf.mxu0  ;;  %3412 = vst [vmem:[#allocation3 + $0xf4] sm:$0xf] %v3376_v0 }
 0x318   : > { %v3167_v53 = vmax.f32 %v3135_v41, 0.0  ;;  %v2963_v29 = vadd.f32 %v2962_v43, %v2873_v35  ;;  %v8227_v41 = vld [vmem:[#allocation3 + $0x88] sm:$0xf0] }
 0x319   : > { %v2964_v54 = vpop.f32.mrf.mxu3  ;;  %v3232_v51 = vld [vmem:[#allocation2 + $0xf0] sm:$0xff] }
 0x31a   : > { %3199 = vst [vmem:[#allocation2 + $0xf9] sm:$0xff] %v3167_v53  ;;  %v3052_v57 = vadd.f32 %v9158_v61, %v2963_v29  ;;  %4851 = vmatmul.bf16.gmra.mxu0 %v7382_v50  ;;  %v3268_v28 = vpack.c.bf16 %v3232_v51, %v3232_v51  ;;  %v3377_v42 = vpack.c.bf16 %v3167_v53, %v3167_v53 }
 0x31b   : > { %v9179_v10 = vpop.f32.mrf.mxu1  ;;  %v8238_v63 = vld [vmem:[#allocation3 + $0xe0] sm:$0xf0] }
 0x31c   : > { %v3101_v56 = vadd.f32 %v3052_v57, %v8988_v1  ;;  %v7154_v2 = vor.u32 %v8238_v63, %v7153_v58  ;;  %3304 = vst [vmem:[#allocation3 + $0xf0] sm:$0xf] %v3268_v28  ;;  %v7114_v57 = vor.u32 %v8227_v41, %v7113_v48 }
 0x31d   : > { %3413 = vst [vmem:[#allocation3 + $0x100] sm:$0xf] %v3377_v42  ;;  %v7107_v42 = vld [vmem:[#allocation3 + $0x84] sm:$0xf0] }
 0x31e   : > { %v3136_v36 = vadd.f32 %v9165_v49, %v3101_v56  ;;  %4209 = vmatmul.bf16.gmra.mxu1 %v7154_v2  ;;  %4362 = vmatmul.bf16.gmra.mxu3 %v7102_v19  ;;  %v8225_v2 = vld [vmem:[#allocation3 + $0x7c] sm:$0xf]  ;;  %v9814_v19 = vld [vmem:[#allocation14_spill] sm:$0xff] }
 0x31f   : > { %v2875_v9 = vpop.f32.mrf.mxu2  ;;  %v9183_v61 = vpop.f32.mrf.mxu0  ;;  %v7110_v59 = vor.u32 %v8225_v2, %v7107_v42 }
 0x320   : > { %v3168_v60 = vmax.f32 %v3136_v36, 0.0  ;;  %v2965_v12 = vadd.f32 %v2964_v54, %v2875_v9  ;;  %v2278_v36 = vadd.f32 %v9814_v19, %v8999_v62  ;;  %v8198_v19 = vld [vmem:[#allocation9 + $0x48] sm:$0xff] }
 0x321   : > { %v2967_v1 = vpop.f32.mrf.mxu3  ;;  %v3233_v32 = vld [vmem:[#allocation2 + $0xf8] sm:$0xff]  ;;  %4923 = vmatpush.bf16.msrb.mxu1 %v8198_v19 }
 0x322   : > { %v3448_v52 = vld [vmem:[#allocation2 + $0xf2] sm:$0xff]  ;;  %v3449_v3 = vld [vmem:[#allocation2 + $0xfa] sm:$0xff]  ;;  %3200 = vst [vmem:[#allocation2 + $0x109] sm:$0xff] %v3168_v60  ;;  %v3054_v6 = vadd.f32 %v9168_v44, %v2965_v12  ;;  %v3269_v16 = vpack.c.bf16 %v3233_v32, %v3233_v32  ;;  %v3378_v4 = vpack.c.bf16 %v3168_v60, %v3168_v60 }
 0x323   : > { %v3484_v34 = vpack.c.bf16 %v3448_v52, %v3448_v52  ;;  %v3485_v43 = vpack.c.bf16 %v3449_v3, %v3449_v3  ;;  %v9188_v55 = vpop.f32.mrf.mxu1  ;;  %v7393_v44 = vld [vmem:[#allocation3 + $0x60] sm:$0xf]  ;;  %v7165_v54 = vld [vmem:[#allocation3 + $0xf0] sm:$0xf]  ;;  %v7429_v19 = vld [vmem:[#allocation3 + $0xa8] sm:$0xf] }
 0x324   : > { %v3102_v11 = vadd.f32 %v3054_v6, %v2273_v47  ;;  %4273 = vmatmul.bf16.gmra.mxu2 %v7098_v46  ;;  %3305 = vst [vmem:[#allocation3 + $0xfc] sm:$0xf] %v3269_v16  ;;  %v7394_v0 = vor.u32 %v8154_v13, %v7393_v44  ;;  %v8157_v6 = vld [vmem:[#allocation3 + $0x80] sm:$0xf0]  ;;  %v7125_v13 = vld [vmem:[#allocation3 + $0x98] sm:$0xf] }
 0x325   : > { %3520 = vst [vmem:[#allocation3 + $0xf8] sm:$0xf] %v3484_v34  ;;  %v7405_v34 = vld [vmem:[#allocation3 + $0x78] sm:$0xf] }
 0x326   : > { %v3137_v40 = vadd.f32 %v9165_v49, %v3102_v11  ;;  %3521 = vst [vmem:[#allocation3 + $0x104] sm:$0xf] %v3485_v43 }
 0x327   : > { %v2878_v8 = vpop.f32.mrf.mxu2  ;;  %v9191_v24 = vpop.f32.mrf.mxu0  ;;  %3414 = vst [vmem:[#allocation3 + $0x10c] sm:$0xf] %v3378_v4  ;;  %v7406_v4 = vor.u32 %v8157_v6, %v7405_v34  ;;  %v8233_v6 = vld [vmem:[#allocation3 + $0xb8] sm:$0xf0] }
 0x328   : > { %v3169_v21 = vmax.f32 %v3137_v40, 0.0  ;;  %v2968_v5 = vadd.f32 %v2967_v1, %v2878_v8  ;;  %v8230_v40 = vld [vmem:[#allocation3 + $0xa0] sm:$0xf0] }
 0x329   : > { %v2969_v20 = vpop.f32.mrf.mxu3  ;;  %v3234_v35 = vld [vmem:[#allocation2 + $0x108] sm:$0xff] }
 0x32a   : > { %3201 = vst [vmem:[#allocation2 + $0x111] sm:$0xff] %v3169_v21  ;;  %v3057_v37 = vadd.f32 %v9176_v39, %v2968_v5  ;;  %4856 = vmatmul.bf16.gmra.mxu0 %v7394_v0  ;;  %v3270_v53 = vpack.c.bf16 %v3234_v35, %v3234_v35  ;;  %v3379_v29 = vpack.c.bf16 %v3169_v21, %v3169_v21 }
 0x32b   : > { %v9194_v50 = vpop.f32.mrf.mxu1  ;;  %v8241_v23 = vld [vmem:[#allocation3 + $0xf8] sm:$0xf0] }
 0x32c   : > { %v3103_v15 = vadd.f32 %v3057_v37, %v8996_v7  ;;  %v7166_v51 = vor.u32 %v8241_v23, %v7165_v54  ;;  %3306 = vst [vmem:[#allocation3 + $0x108] sm:$0xf] %v3270_v53  ;;  %v7126_v37 = vor.u32 %v8230_v40, %v7125_v13 }
 0x32d   : > { %3415 = vst [vmem:[#allocation3 + $0x118] sm:$0xf] %v3379_v29  ;;  %v7119_v29 = vld [vmem:[#allocation3 + $0x9c] sm:$0xf0] }
 0x32e   : > { %v3138_v28 = vadd.f32 %v9165_v49, %v3103_v15  ;;  %4214 = vmatmul.bf16.gmra.mxu1 %v7166_v51  ;;  %4367 = vmatmul.bf16.gmra.mxu3 %v7114_v57  ;;  %v8228_v51 = vld [vmem:[#allocation3 + $0x94] sm:$0xf]  ;;  %v2283_v57 = vadd.f32 %v9002_v33, %v9007_v27  ;;  %v8160_v33 = vld [vmem:[#allocation3 + $0x98] sm:$0xf0] }
 0x32f   : > { %v2880_v58 = vpop.f32.mrf.mxu2  ;;  %v9198_v39 = vpop.f32.mrf.mxu0 }
 0x330   : > { %v3170_v63 = vmax.f32 %v3138_v28, 0.0  ;;  %v2970_v56 = vadd.f32 %v2969_v20, %v2880_v58  ;;  %v7122_v28 = vor.u32 %v8228_v51, %v7119_v29 }
 0x331   : > { %v2972_v7 = vpop.f32.mrf.mxu3  ;;  %v3235_v9 = vld [vmem:[#allocation2 + $0x110] sm:$0xff] }
 0x332   : > { %v3450_v60 = vld [vmem:[#allocation2 + $0x10a] sm:$0xff]  ;;  %v3451_v12 = vld [vmem:[#allocation2 + $0x112] sm:$0xff]  ;;  %3202 = vst [vmem:[#allocation2 + $0x121] sm:$0xff] %v3170_v63  ;;  %v3059_v18 = vadd.f32 %v9183_v61, %v2970_v56  ;;  %v3271_v47 = vpack.c.bf16 %v3235_v9, %v3235_v9  ;;  %v3380_v52 = vpack.c.bf16 %v3170_v63, %v3170_v63 }
 0x333   : > { %v3486_v46 = vpack.c.bf16 %v3450_v60, %v3450_v60  ;;  %v3487_v1 = vpack.c.bf16 %v3451_v12, %v3451_v12  ;;  %v9203_v32 = vpop.f32.mrf.mxu1  ;;  %v7177_v20 = vld [vmem:[#allocation3 + $0x108] sm:$0xf] }
 0x334   : > { %v3104_v3 = vadd.f32 %v3059_v18, %v2278_v36  ;;  %4278 = vmatmul.bf16.gmra.mxu2 %v7110_v59  ;;  %3307 = vst [vmem:[#allocation3 + $0x114] sm:$0xf] %v3271_v47 }
 0x335   : > { %3522 = vst [vmem:[#allocation3 + $0x110] sm:$0xf] %v3486_v46 }
 0x336   : > { %v3139_v62 = vadd.f32 %v9165_v49, %v3104_v3  ;;  %3523 = vst [vmem:[#allocation3 + $0x11c] sm:$0xf] %v3487_v1  ;;  %v7137_v3 = vld [vmem:[#allocation3 + $0xb0] sm:$0xf] }
 0x337   : > { %v2883_v16 = vpop.f32.mrf.mxu2  ;;  %v9206_v14 = vpop.f32.mrf.mxu0  ;;  %3416 = vst [vmem:[#allocation3 + $0x124] sm:$0xf] %v3380_v52 }
 0x338   : > { %v3171_v61 = vmax.f32 %v3139_v62, 0.0  ;;  %v2973_v43 = vadd.f32 %v2972_v7, %v2883_v16 }
 0x339   : > { %v2974_v11 = vpop.f32.mrf.mxu3  ;;  %v3236_v8 = vld [vmem:[#allocation2 + $0x120] sm:$0xff] }
 0x33a   : > { %3203 = vst [vmem:[#allocation2 + $0x129] sm:$0xff] %v3171_v61  ;;  %v3062_v44 = vadd.f32 %v9191_v24, %v2973_v43  ;;  %4861 = vmatmul.bf16.gmra.mxu0 %v7406_v4  ;;  %v3272_v21 = vpack.c.bf16 %v3236_v8, %v3236_v8  ;;  %v3381_v5 = vpack.c.bf16 %v3171_v61, %v3171_v61 }
 0x33b   : > { %v9209_v0 = vpop.f32.mrf.mxu1  ;;  %v8244_v48 = vld [vmem:[#allocation3 + $0x110] sm:$0xf0]  ;;  %v7138_v8 = vor.u32 %v8233_v6, %v7137_v3 }
 0x33c   : > { %v3105_v41 = vadd.f32 %v3062_v44, %v9004_v31  ;;  %v7178_v35 = vor.u32 %v8244_v48, %v7177_v20  ;;  %3308 = vst [vmem:[#allocation3 + $0x120] sm:$0xf] %v3272_v21  ;;  %v7131_v21 = vld [vmem:[#allocation3 + $0xb4] sm:$0xf0] }
 0x33d   : > { %3417 = vst [vmem:[#allocation3 + $0x130] sm:$0xf] %v3381_v5 }
 0x33e   : > { %v3140_v53 = vadd.f32 %v9165_v49, %v3105_v41  ;;  %4219 = vmatmul.bf16.gmra.mxu1 %v7178_v35  ;;  %4372 = vmatmul.bf16.gmra.mxu3 %v7126_v37  ;;  %v8231_v41 = vld [vmem:[#allocation3 + $0xac] sm:$0xf]  ;;  %v9815_v35 = vld [vmem:[#allocation15_spill] sm:$0xff] }
 0x33f   : > { %v2885_v54 = vpop.f32.mrf.mxu2  ;;  %v9213_v24 = vpop.f32.mrf.mxu0  ;;  %v2288_v37 = vadd.f32 %v9815_v35, %v9015_v45 }
 0x340   : > { %v3172_v23 = vmax.f32 %v3140_v53, 0.0  ;;  %v2975_v15 = vadd.f32 %v2974_v11, %v2885_v54  ;;  %v7134_v53 = vor.u32 %v8231_v41, %v7131_v21 }
 0x341   : > { %v2977_v31 = vpop.f32.mrf.mxu3  ;;  %v3237_v42 = vld [vmem:[#allocation2 + $0x128] sm:$0xff] }
 0x342   : > { %v3452_v58 = vld [vmem:[#allocation2 + $0x122] sm:$0xff]  ;;  %v3453_v63 = vld [vmem:[#allocation2 + $0x12a] sm:$0xff]  ;;  %3204 = vst [vmem:[#allocation2 + $0x139] sm:$0xff] %v3172_v23  ;;  %v3064_v56 = vadd.f32 %v9198_v39, %v2975_v15  ;;  %v3273_v2 = vpack.c.bf16 %v3237_v42, %v3237_v42  ;;  %v3382_v9 = vpack.c.bf16 %v3172_v23, %v3172_v23 }
 0x343   : > { %v3488_v36 = vpack.c.bf16 %v3452_v58, %v3452_v58  ;;  %v3489_v59 = vpack.c.bf16 %v3453_v63, %v3453_v63  ;;  %v9218_v7 = vpop.f32.mrf.mxu1  ;;  %v7417_v39 = vld [vmem:[#allocation3 + $0x90] sm:$0xf]  ;;  %v7189_v4 = vld [vmem:[#allocation3 + $0x120] sm:$0xf]  ;;  %v8163_v63 = vld [vmem:[#allocation3 + $0xb0] sm:$0xf0] }
 0x344   : > { %v3106_v60 = vadd.f32 %v3064_v56, %v2283_v57  ;;  %4283 = vmatmul.bf16.gmra.mxu2 %v7122_v28  ;;  %3309 = vst [vmem:[#allocation3 + $0x12c] sm:$0xf] %v3273_v2  ;;  %v7418_v1 = vor.u32 %v8160_v33, %v7417_v39  ;;  %v8236_v33 = vld [vmem:[#allocation3 + $0xd0] sm:$0xf0] }
 0x345   : > { %3524 = vst [vmem:[#allocation3 + $0x128] sm:$0xf] %v3488_v36 }
 0x346   : > { %v3141_v27 = vadd.f32 %v9165_v49, %v3106_v60  ;;  %3525 = vst [vmem:[#allocation3 + $0x134] sm:$0xf] %v3489_v59  ;;  %v7430_v59 = vor.u32 %v8163_v63, %v7429_v19  ;;  %v7149_v60 = vld [vmem:[#allocation3 + $0xc8] sm:$0xf]  ;;  %v7161_v63 = vld [vmem:[#allocation3 + $0xe0] sm:$0xf] }
 0x347   : > { %v2888_v12 = vpop.f32.mrf.mxu2  ;;  %v9221_v18 = vpop.f32.mrf.mxu0  ;;  %3418 = vst [vmem:[#allocation3 + $0x13c] sm:$0xf] %v3382_v9 }
 0x348   : > { %v3173_v47 = vmax.f32 %v3141_v27, 0.0  ;;  %v2978_v46 = vadd.f32 %v2977_v31, %v2888_v12 }
 0x349   : > { %v2979_v52 = vpop.f32.mrf.mxu3  ;;  %v3238_v62 = vld [vmem:[#allocation2 + $0x138] sm:$0xff] }
 0x34a   : > { %3205 = vst [vmem:[#allocation2 + $0x141] sm:$0xff] %v3173_v47  ;;  %v3067_v16 = vadd.f32 %v9206_v14, %v2978_v46  ;;  %4866 = vmatmul.bf16.gmra.mxu0 %v7418_v1  ;;  %v3274_v34 = vpack.c.bf16 %v3238_v62, %v3238_v62  ;;  %v3383_v61 = vpack.c.bf16 %v3173_v47, %v3173_v47 }
 0x34b   : > { %v9224_v43 = vpop.f32.mrf.mxu1  ;;  %v8247_v11 = vld [vmem:[#allocation3 + $0x128] sm:$0xf0]  ;;  %v7150_v62 = vor.u32 %v8236_v33, %v7149_v60 }
 0x34c   : > { %v3107_v13 = vadd.f32 %v3067_v16, %v9012_v17  ;;  %v7190_v40 = vor.u32 %v8247_v11, %v7189_v4  ;;  %3310 = vst [vmem:[#allocation3 + $0x138] sm:$0xf] %v3274_v34  ;;  %v7143_v34 = vld [vmem:[#allocation3 + $0xcc] sm:$0xf0] }
 0x34d   : > { %3419 = vst [vmem:[#allocation3 + $0x148] sm:$0xf] %v3383_v61  ;;  %v8197_v61 = vld [vmem:[#allocation9 + $0x40] sm:$0xff] }
 0x34e   : > { %v3142_v44 = vadd.f32 %v9165_v49, %v3107_v13  ;;  %4224 = vmatmul.bf16.gmra.mxu1 %v7190_v40  ;;  %4377 = vmatmul.bf16.gmra.mxu3 %v7138_v8  ;;  %v8234_v40 = vld [vmem:[#allocation3 + $0xc4] sm:$0xf] }
 0x34f   : > { %v2890_v5 = vpop.f32.mrf.mxu2  ;;  %v9228_v14 = vpop.f32.mrf.mxu0  ;;  %4924 = vmatpush.bf16.msrb.mxu1 %v8197_v61  ;;  %v9816_v8 = vld [vmem:[#allocation16_spill] sm:$0xff] }
 0x350   : > { %v3174_v20 = vmax.f32 %v3142_v44, 0.0  ;;  %v2980_v48 = vadd.f32 %v2979_v52, %v2890_v5  ;;  %v7146_v44 = vor.u32 %v8234_v40, %v7143_v34 }
 0x351   : > { %v2982_v17 = vpop.f32.mrf.mxu3  ;;  %v3239_v29 = vld [vmem:[#allocation2 + $0x140] sm:$0xff] }
 0x352   : > { %v3454_v54 = vld [vmem:[#allocation2 + $0x13a] sm:$0xff]  ;;  %v3455_v23 = vld [vmem:[#allocation2 + $0x142] sm:$0xff]  ;;  %3206 = vst [vmem:[#allocation2 + $0x151] sm:$0xff] %v3174_v20  ;;  %v3069_v15 = vadd.f32 %v9213_v24, %v2980_v48  ;;  %v3275_v51 = vpack.c.bf16 %v3239_v29, %v3239_v29  ;;  %v3384_v42 = vpack.c.bf16 %v3174_v20, %v3174_v20 }
 0x353   : > { %v3490_v57 = vpack.c.bf16 %v3454_v54, %v3454_v54  ;;  %v3491_v28 = vpack.c.bf16 %v3455_v23, %v3455_v23  ;;  %v9233_v31 = vpop.f32.mrf.mxu1  ;;  %v7201_v1 = vld [vmem:[#allocation3 + $0x138] sm:$0xf]  ;;  %v8166_v23 = vld [vmem:[#allocation3 + $0xc8] sm:$0xf0] }
 0x354   : > { %v3108_v58 = vadd.f32 %v3069_v15, %v2288_v37  ;;  %4288 = vmatmul.bf16.gmra.mxu2 %v7134_v53  ;;  %3311 = vst [vmem:[#allocation3 + $0x144] sm:$0xf] %v3275_v51 }
 0x355   : > { %3526 = vst [vmem:[#allocation3 + $0x140] sm:$0xf] %v3490_v57  ;;  %v7441_v57 = vld [vmem:[#allocation3 + $0xc0] sm:$0xf] }
 0x356   : > { %v3143_v45 = vadd.f32 %v9165_v49, %v3108_v58  ;;  %3527 = vst [vmem:[#allocation3 + $0x14c] sm:$0xf] %v3491_v28 }
 0x357   : > { %v2893_v56 = vpop.f32.mrf.mxu2  ;;  %v9236_v2 = vpop.f32.mrf.mxu0  ;;  %3420 = vst [vmem:[#allocation3 + $0x154] sm:$0xf] %v3384_v42  ;;  %v7442_v42 = vor.u32 %v8166_v23, %v7441_v57 }
 0x358   : > { %v3175_v24 = vmax.f32 %v3143_v45, 0.0  ;;  %v2983_v36 = vadd.f32 %v2982_v17, %v2893_v56  ;;  %v8239_v45 = vld [vmem:[#allocation3 + $0xe8] sm:$0xf0] }
 0x359   : > { %v2984_v9 = vpop.f32.mrf.mxu3  ;;  %v3240_v27 = vld [vmem:[#allocation2 + $0x150] sm:$0xff] }
 0x35a   : > { %3207 = vst [vmem:[#allocation2 + $0x159] sm:$0xff] %v3175_v24  ;;  %v3072_v12 = vadd.f32 %v9221_v18, %v2983_v36  ;;  %4871 = vmatmul.bf16.gmra.mxu0 %v7430_v59  ;;  %v3276_v39 = vpack.c.bf16 %v3240_v27, %v3240_v27  ;;  %v3385_v47 = vpack.c.bf16 %v3175_v24, %v3175_v24 }
 0x35b   : > { %v9239_v46 = vpop.f32.mrf.mxu1  ;;  %v8250_v52 = vld [vmem:[#allocation3 + $0x140] sm:$0xf0] }
 0x35c   : > { %v3109_v3 = vadd.f32 %v3072_v12, %v9018_v25  ;;  %v7202_v6 = vor.u32 %v8250_v52, %v7201_v1  ;;  %3312 = vst [vmem:[#allocation3 + $0x150] sm:$0xf] %v3276_v39  ;;  %v2293_v25 = vadd.f32 %v9816_v8, %v9023_v30  ;;  %v7162_v12 = vor.u32 %v8239_v45, %v7161_v63 }
 0x35d   : > { %3421 = vst [vmem:[#allocation3 + $0x160] sm:$0xf] %v3385_v47  ;;  %v7155_v47 = vld [vmem:[#allocation3 + $0xe4] sm:$0xf0] }
 0x35e   : > { %v3144_v16 = vadd.f32 %v9165_v49, %v3109_v3  ;;  %4229 = vmatmul.bf16.gmra.mxu1 %v7202_v6  ;;  %4382 = vmatmul.bf16.gmra.mxu3 %v7150_v62  ;;  %v8237_v6 = vld [vmem:[#allocation3 + $0xdc] sm:$0xf]  ;;  %v2298_v62 = vadd.f32 %v9173_v26, %v9029_v22 }
 0x35f   : > { %v2895_v18 = vpop.f32.mrf.mxu2  ;;  %v9243_v4 = vpop.f32.mrf.mxu0 }
 0x360   : > { %v3176_v11 = vmax.f32 %v3144_v16, 0.0  ;;  %v2985_v13 = vadd.f32 %v2984_v9, %v2895_v18  ;;  %v7158_v16 = vor.u32 %v8237_v6, %v7155_v47 }
 0x361   : > { %v2987_v21 = vpop.f32.mrf.mxu3  ;;  %v3241_v5 = vld [vmem:[#allocation2 + $0x158] sm:$0xff] }
 0x362   : > { %v3456_v20 = vld [vmem:[#allocation2 + $0x152] sm:$0xff]  ;;  %v3457_v48 = vld [vmem:[#allocation2 + $0x15a] sm:$0xff]  ;;  %3208 = vst [vmem:[#allocation2 + $0x169] sm:$0xff] %v3176_v11  ;;  %v3074_v41 = vadd.f32 %v9228_v14, %v2985_v13  ;;  %v3277_v35 = vpack.c.bf16 %v3241_v5, %v3241_v5  ;;  %v3386_v29 = vpack.c.bf16 %v3176_v11, %v3176_v11 }
 0x363   : > { %v3492_v37 = vpack.c.bf16 %v3456_v20, %v3456_v20  ;;  %v3493_v53 = vpack.c.bf16 %v3457_v48, %v3457_v48  ;;  %v9248_v17 = vpop.f32.mrf.mxu1  ;;  %v7213_v9 = vld [vmem:[#allocation3 + $0x150] sm:$0xf]  ;;  %v8340_v5 = vld [vmem:[#allocation9 + $0x1b8] sm:$0xff]  ;;  %v8169_v20 = vld [vmem:[#allocation3 + $0xe0] sm:$0xf0] }
 0x364   : > { %v3110_v54 = vadd.f32 %v3074_v41, %v2293_v25  ;;  %4293 = vmatmul.bf16.gmra.mxu2 %v7146_v44  ;;  %3313 = vst [vmem:[#allocation3 + $0x15c] sm:$0xf] %v3277_v35  ;;  %5608 = vmatpush.bf16.msra.mxu3 %v8340_v5 }
 0x365   : > { %3528 = vst [vmem:[#allocation3 + $0x158] sm:$0xf] %v3492_v37 }
 0x366   : > { %v3145_v30 = vadd.f32 %v9165_v49, %v3110_v54  ;;  %3529 = vst [vmem:[#allocation3 + $0x164] sm:$0xf] %v3493_v53  ;;  %v8242_v54 = vld [vmem:[#allocation3 + $0x100] sm:$0xf0] }
 0x367   : > { %v2898_v15 = vpop.f32.mrf.mxu2  ;;  %v9251_v51 = vpop.f32.mrf.mxu0  ;;  %3422 = vst [vmem:[#allocation3 + $0x16c] sm:$0xf] %v3386_v29  ;;  %v7173_v29 = vld [vmem:[#allocation3 + $0xf8] sm:$0xf] }
 0x368   : > { %v3177_v14 = vmax.f32 %v3145_v30, 0.0  ;;  %v2988_v28 = vadd.f32 %v2987_v21, %v2898_v15  ;;  %v7174_v45 = vor.u32 %v8242_v54, %v7173_v29 }
 0x369   : > { %v2989_v58 = vpop.f32.mrf.mxu3  ;;  %v3242_v56 = vld [vmem:[#allocation2 + $0x168] sm:$0xff] }
 0x36a   : > { %3209 = vst [vmem:[#allocation2 + $0x171] sm:$0xff] %v3177_v14  ;;  %v3077_v19 = vadd.f32 %v9236_v2, %v2988_v28  ;;  %4876 = vmatmul.bf16.gmra.mxu0 %v7442_v42  ;;  %v3278_v24 = vpack.c.bf16 %v3242_v56, %v3242_v56  ;;  %v3387_v36 = vpack.c.bf16 %v3177_v14, %v3177_v14  ;;  %v7167_v56 = vld [vmem:[#allocation3 + $0xfc] sm:$0xf0] }
 0x36b   : > { %v9254_v59 = vpop.f32.mrf.mxu1  ;;  %v8253_v60 = vld [vmem:[#allocation3 + $0x158] sm:$0xf0] }
 0x36c   : > { %v3111_v33 = vadd.f32 %v3077_v19, %v9026_v38  ;;  %v7214_v27 = vor.u32 %v8253_v60, %v7213_v9  ;;  %3314 = vst [vmem:[#allocation3 + $0x168] sm:$0xf] %v3278_v24  ;;  %v8356_v19 = vld [vmem:[#allocation9 + $0x238] sm:$0xff]  ;;  %v8240_v60 = vld [vmem:[#allocation3 + $0xf4] sm:$0xf] }
 0x36d   : > { %3423 = vst [vmem:[#allocation3 + $0x178] sm:$0xf] %v3387_v36  ;;  %5786 = vmatpush.bf16.msra.mxu1 %v8356_v19 }
 0x36e   : > { %v3146_v39 = vadd.f32 %v9165_v49, %v3111_v33  ;;  %4234 = vmatmul.bf16.gmra.mxu1 %v7214_v27  ;;  %4387 = vmatmul.bf16.gmra.mxu3 %v7162_v12  ;;  %v7170_v33 = vor.u32 %v8240_v60, %v7167_v56  ;;  %v8248_v56 = vld [vmem:[#allocation3 + $0x130] sm:$0xf0] }
 0x36f   : > { %v2900_v1 = vpop.f32.mrf.mxu2  ;;  %v9258_v2 = vpop.f32.mrf.mxu0 }
 0x370   : > { %v3178_v52 = vmax.f32 %v3146_v39, 0.0  ;;  %v2990_v3 = vadd.f32 %v2989_v58, %v2900_v1  ;;  %v8348_v58 = vld [vmem:[#allocation9 + $0x1f8] sm:$0xff] }
 0x371   : > { %v4348_v38 = vpop.f32.mrf.mxu3  ;;  %v3243_v34 = vld [vmem:[#allocation2 + $0x170] sm:$0xff]  ;;  %5697 = vmatpush.bf16.msra.mxu0 %v8348_v58 }
 0x372   : > { %v3458_v61 = vld [vmem:[#allocation2 + $0x16a] sm:$0xff]  ;;  %v3459_v18 = vld [vmem:[#allocation2 + $0x172] sm:$0xff]  ;;  %3210 = vst [vmem:[#allocation2 + $0x181] sm:$0xff] %v3178_v52  ;;  %v3079_v11 = vadd.f32 %v9243_v4, %v2990_v3  ;;  %v3279_v13 = vpack.c.bf16 %v3243_v34, %v3243_v34  ;;  %v3388_v44 = vpack.c.bf16 %v3178_v52, %v3178_v52  ;;  %v7465_v34 = vld [vmem:[#allocation3 + $0xf0] sm:$0xf] }
 0x373   : > { %v3494_v40 = vpack.c.bf16 %v3458_v61, %v3458_v61  ;;  %v3495_v8 = vpack.c.bf16 %v3459_v18, %v3459_v18  ;;  %v9263_v25 = vpop.f32.mrf.mxu1  ;;  %v7453_v4 = vld [vmem:[#allocation3 + $0xd8] sm:$0xf]  ;;  %v7225_v28 = vld [vmem:[#allocation3 + $0x168] sm:$0xf] }
 0x374   : > { %v3112_v21 = vadd.f32 %v3079_v11, %v2298_v62  ;;  %4298 = vmatmul.bf16.gmra.mxu2 %v7158_v16  ;;  %3315 = vst [vmem:[#allocation3 + $0x174] sm:$0xf] %v3279_v13  ;;  %v7454_v37 = vor.u32 %v8169_v20, %v7453_v4  ;;  %v8172_v16 = vld [vmem:[#allocation3 + $0xf8] sm:$0xf0]  ;;  %v7185_v13 = vld [vmem:[#allocation3 + $0x110] sm:$0xf] }
 0x375   : > { %3530 = vst [vmem:[#allocation3 + $0x170] sm:$0xf] %v3494_v40  ;;  %v7466_v18 = vor.u32 %v8172_v16, %v7465_v34  ;;  %v8245_v40 = vld [vmem:[#allocation3 + $0x118] sm:$0xf0]  ;;  %v7179_v4 = vld [vmem:[#allocation3 + $0x114] sm:$0xf0] }
 0x376   : > { %v3147_v22 = vadd.f32 %v9165_v49, %v3112_v21  ;;  %3531 = vst [vmem:[#allocation3 + $0x17c] sm:$0xf] %v3495_v8  ;;  %v8212_v49 = vld [vmem:[#allocation9 + $0xb8] sm:$0xff]  ;;  %v7186_v20 = vor.u32 %v8245_v40, %v7185_v13 }
 0x377   : > { %v4259_v26 = vpop.f32.mrf.mxu2  ;;  %v9266_v48 = vpop.f32.mrf.mxu0  ;;  %3424 = vst [vmem:[#allocation3 + $0x184] sm:$0xf] %v3388_v44  ;;  %5006 = vmatpush.bf16.msra.mxu2 %v8212_v49  ;;  %v8141_v49 = vld [vmem:[#allocation3 + $0x4] sm:$0xf] }
 0x378   : > { %v3179_v41 = vmax.f32 %v3147_v22, 0.0  ;;  %v4260_v35 = vadd.f32 %v4259_v26, %v9179_v10 }
 0x379   : > { %v4350_v53 = vpop.f32.mrf.mxu3  ;;  %v3244_v23 = vld [vmem:[#allocation2 + $0x180] sm:$0xff] }
 0x37a   : > { %3211 = vst [vmem:[#allocation2 + $0x189] sm:$0xff] %v3179_v41  ;;  %v4349_v30 = vadd.f32 %v4348_v38, %v4260_v35  ;;  %4881 = vmatmul.bf16.gmra.mxu0 %v7454_v37  ;;  %v3280_v15 = vpack.c.bf16 %v3244_v23, %v3244_v23  ;;  %v3389_v57 = vpack.c.bf16 %v3179_v41, %v3179_v41  ;;  %v8243_v35 = vld [vmem:[#allocation3 + $0x10c] sm:$0xf]  ;;  %v8339_v23 = vld [vmem:[#allocation9 + $0x1b0] sm:$0xff] }
 0x37b   : > { %v9269_v14 = vpop.f32.mrf.mxu1  ;;  %v8256_v42 = vld [vmem:[#allocation3 + $0x170] sm:$0xf0]  ;;  %v7182_v29 = vor.u32 %v8243_v35, %v7179_v4  ;;  %5609 = vmatpush.bf16.msra.mxu3 %v8339_v23 }
 0x37c   : > { %v7226_v63 = vor.u32 %v8256_v42, %v7225_v28  ;;  %3316 = vst [vmem:[#allocation3 + $0x180] sm:$0xf] %v3280_v15  ;;  %v9272_v10 = vadd.f32 %v9251_v51, %v4349_v30  ;;  %v8175_v15 = vld [vmem:[#allocation3 + $0x110] sm:$0xf0]  ;;  %v7477_v42 = vld [vmem:[#allocation3 + $0x108] sm:$0xf] }
 0x37d   : > { %3425 = vst [vmem:[#allocation3 + $0x190] sm:$0xf] %v3389_v57  ;;  %v7347_v57 = vld [vmem:[#allocation3 + $0xc] sm:$0xf0] }
 0x37e   : > { %4239 = vmatmul.bf16.gmra.mxu1 %v7226_v63  ;;  %4392 = vmatmul.bf16.gmra.mxu3 %v7174_v45  ;;  %v7197_v45 = vld [vmem:[#allocation3 + $0x128] sm:$0xf] }
 0x37f   : > { %v4261_v24 = vpop.f32.mrf.mxu2  ;;  %v4844_v36 = vpop.f32.mrf.mxu0 }
 0x380   : > { %v4262_v9 = vadd.f32 %v4261_v24, %v9188_v55  ;;  %v7350_v24 = vor.u32 %v8141_v49, %v7347_v57  ;;  %v8338_v57 = vld [vmem:[#allocation9 + $0x1a8] sm:$0xff] }
 0x381   : > { %v4353_v27 = vpop.f32.mrf.mxu3  ;;  %v3245_v12 = vld [vmem:[#allocation2 + $0x188] sm:$0xff]  ;;  %5610 = vmatpush.bf16.msra.mxu3 %v8338_v57 }
 0x382   : > { %v3460_v39 = vld [vmem:[#allocation2 + $0x182] sm:$0xff]  ;;  %v3461_v47 = vld [vmem:[#allocation2 + $0x18a] sm:$0xff]  ;;  %v4351_v1 = vadd.f32 %v4350_v53, %v4262_v9  ;;  %v3281_v51 = vpack.c.bf16 %v3245_v12, %v3245_v12 }
 0x383   : > { %v3496_v52 = vpack.c.bf16 %v3460_v39, %v3460_v39  ;;  %v3497_v3 = vpack.c.bf16 %v3461_v47, %v3461_v47  ;;  %v9275_v6 = vpop.f32.mrf.mxu1  ;;  %v7237_v21 = vld [vmem:[#allocation3 + $0x180] sm:$0xf]  ;;  %v7191_v39 = vld [vmem:[#allocation3 + $0x12c] sm:$0xf0]  ;;  %v8257_v57 = vld [vmem:[#allocation3 + $0x178] sm:$0xf0] }
 0x384   : > { %4303 = vmatmul.bf16.gmra.mxu2 %v7170_v33  ;;  %3317 = vst [vmem:[#allocation3 + $0x18c] sm:$0xf] %v3281_v51  ;;  %v9278_v62 = vadd.f32 %v9258_v2, %v4351_v1  ;;  %v8211_v9 = vld [vmem:[#allocation9 + $0xb0] sm:$0xff]  ;;  %v7198_v33 = vor.u32 %v8248_v56, %v7197_v45 }
 0x385   : > { %3532 = vst [vmem:[#allocation3 + $0x188] sm:$0xf] %v3496_v52  ;;  %5007 = vmatpush.bf16.msra.mxu2 %v8211_v9  ;;  %v8355_v12 = vld [vmem:[#allocation9 + $0x230] sm:$0xff] }
 0x386   : > { %3533 = vst [vmem:[#allocation3 + $0x194] sm:$0xf] %v3497_v3  ;;  %5787 = vmatpush.bf16.msra.mxu1 %v8355_v12  ;;  %v8246_v51 = vld [vmem:[#allocation3 + $0x124] sm:$0xf] }
 0x387   : > { %v4264_v55 = vpop.f32.mrf.mxu2  ;;  %v4847_v38 = vpop.f32.mrf.mxu0  ;;  %v7194_v16 = vor.u32 %v8246_v51, %v7191_v39  ;;  %v8254_v9 = vld [vmem:[#allocation3 + $0x160] sm:$0xf0]  ;;  %v8346_v39 = vld [vmem:[#allocation9 + $0x1e8] sm:$0xff] }
 0x388   : > { %v4265_v61 = vadd.f32 %v4264_v55, %v9194_v50 }
 0x389   : > { %v4355_v11 = vpop.f32.mrf.mxu3 }
 0x38a   : > { %v4354_v8 = vadd.f32 %v4353_v27, %v4265_v61  ;;  %4886 = vmatmul.bf16.gmra.mxu0 %v7466_v18 }
 0x38b   : > { %v9281_v44 = vpop.f32.mrf.mxu1  ;;  %v8259_v5 = vld [vmem:[#allocation3 + $0x188] sm:$0xf0] }
 0x38c   : > { %v7238_v2 = vor.u32 %v8259_v5, %v7237_v21  ;;  %v9284_v22 = vadd.f32 %v9266_v48, %v4354_v8  ;;  %v7359_v8 = vld [vmem:[#allocation3 + $0x24] sm:$0xf0]  ;;  %v8251_v5 = vld [vmem:[#allocation3 + $0x148] sm:$0xf0] }
 0x38e   : > { %4244 = vmatmul.bf16.gmra.mxu1 %v7238_v2  ;;  %4397 = vmatmul.bf16.gmra.mxu3 %v7186_v20 }
 0x38f   : > { %v4266_v26 = vpop.f32.mrf.mxu2  ;;  %v4849_v50 = vpop.f32.mrf.mxu0 }
 0x390   : > { %v4267_v41 = vadd.f32 %v4266_v26, %v9203_v32  ;;  %v7478_v32 = vor.u32 %v8175_v15, %v7477_v42  ;;  %v8144_v26 = vld [vmem:[#allocation3 + $0x1c] sm:$0xf] }
 0x391   : > { %v4358_v37 = vpop.f32.mrf.mxu3  ;;  %v7362_v4 = vor.u32 %v8144_v26, %v7359_v8  ;;  %v8209_v8 = vld [vmem:[#allocation9 + $0xa0] sm:$0xff]  ;;  %v8184_v26 = vld [vmem:[#allocation3 + $0x158] sm:$0xf0] }
 0x392   : > { %v4356_v53 = vadd.f32 %v4355_v11, %v4267_v41  ;;  %v7489_v11 = vld [vmem:[#allocation3 + $0x120] sm:$0xf] }
 0x393   : > { %v9287_v54 = vpop.f32.mrf.mxu1 }
 0x394   : > { %4308 = vmatmul.bf16.gmra.mxu2 %v7182_v29  ;;  %v9289_v30 = vadd.f32 %v4844_v36, %v4356_v53  ;;  %v8347_v36 = vld [vmem:[#allocation9 + $0x1f0] sm:$0xff]  ;;  %v8249_v29 = vld [vmem:[#allocation3 + $0x13c] sm:$0xf] }
 0x395   : > { %5698 = vmatpush.bf16.msra.mxu0 %v8347_v36 }
 0x397   : > { %v4269_v48 = vpop.f32.mrf.mxu2  ;;  %v4852_v28 = vpop.f32.mrf.mxu0 }
 0x398   : > { %v4270_v58 = vadd.f32 %v4269_v48, %v9209_v0 }
 0x399   : > { %v4360_v63 = vpop.f32.mrf.mxu3  ;;  %5699 = vmatpush.bf16.msra.mxu0 %v8346_v39 }
 0x39a   : > { %v4359_v19 = vadd.f32 %v4358_v37, %v4270_v58  ;;  %4891 = vmatmul.bf16.gmra.mxu0 %v7478_v32  ;;  %v7203_v37 = vld [vmem:[#allocation3 + $0x144] sm:$0xf0]  ;;  %v8181_v58 = vld [vmem:[#allocation3 + $0x140] sm:$0xf0] }
 0x39b   : > { %v9292_v60 = vpop.f32.mrf.mxu1  ;;  %v7206_v48 = vor.u32 %v8249_v29, %v7203_v37  ;;  %v7513_v37 = vld [vmem:[#allocation3 + $0x150] sm:$0xf] }
 0x39c   : > { %v9294_v27 = vadd.f32 %v4847_v38, %v4359_v19  ;;  %v8178_v38 = vld [vmem:[#allocation3 + $0x128] sm:$0xf0]  ;;  %v7514_v29 = vor.u32 %v8184_v26, %v7513_v37  ;;  %v7395_v26 = vld [vmem:[#allocation3 + $0x6c] sm:$0xf0] }
 0x39d   : > { %v7490_v40 = vor.u32 %v8178_v38, %v7489_v11 }
 0x39e   : > { %4925 = vmatmul.bf16.vlgmr.msrb.gmra.mxu1 %v7350_v24  ;;  %4402 = vmatmul.bf16.gmra.mxu3 %v7198_v33  ;;  %v7221_v24 = vld [vmem:[#allocation3 + $0x158] sm:$0xf] }
 0x39f   : > { %v4271_v0 = vpop.f32.mrf.mxu2  ;;  %v4854_v47 = vpop.f32.mrf.mxu0  ;;  %v8210_v33 = vld [vmem:[#allocation9 + $0xa8] sm:$0xff] }
 0x3a0   : > { %v4272_v1 = vadd.f32 %v4271_v0, %v9218_v7  ;;  %v7209_v7 = vld [vmem:[#allocation3 + $0x140] sm:$0xf]  ;;  %v8147_v0 = vld [vmem:[#allocation3 + $0x34] sm:$0xf]  ;;  %5008 = vmatpush.bf16.msra.mxu2 %v8210_v33 }
 0x3a1   : > { %v4363_v52 = vpop.f32.mrf.mxu3  ;;  %v7210_v41 = vor.u32 %v8251_v5, %v7209_v7  ;;  %v8345_v7 = vld [vmem:[#allocation9 + $0x1e0] sm:$0xff]  ;;  %v8336_v5 = vld [vmem:[#allocation9 + $0x198] sm:$0xff] }
 0x3a2   : > { %v4361_v3 = vadd.f32 %v4360_v63, %v4272_v1  ;;  %v7501_v63 = vld [vmem:[#allocation3 + $0x138] sm:$0xf]  ;;  %v7222_v1 = vor.u32 %v8254_v9, %v7221_v24  ;;  %5700 = vmatpush.bf16.msra.mxu0 %v8345_v7 }
 0x3a3   : > { %v9297_v55 = vpop.f32.mrf.mxu1  ;;  %v7502_v56 = vor.u32 %v8181_v58, %v7501_v63  ;;  %v8207_v58 = vld [vmem:[#allocation9 + $0x90] sm:$0xff]  ;;  %v8206_v9 = vld [vmem:[#allocation9 + $0x88] sm:$0xff] }
 0x3a4   : > { %4313 = vmatmul.bf16.gmra.mxu2 %v7194_v16  ;;  %v9299_v34 = vadd.f32 %v4849_v50, %v4361_v3  ;;  %v7215_v3 = vld [vmem:[#allocation3 + $0x15c] sm:$0xf0] }
 0x3a5   : > { %5009 = vmatpush.bf16.msra.mxu2 %v8209_v8  ;;  %v8343_v63 = vld [vmem:[#allocation9 + $0x1d0] sm:$0xff] }
 0x3a7   : > { %v4274_v61 = vpop.f32.mrf.mxu2  ;;  %v4857_v18 = vpop.f32.mrf.mxu0 }
 0x3a8   : > { %v4275_v13 = vadd.f32 %v4274_v61, %v9224_v43  ;;  %v8252_v61 = vld [vmem:[#allocation3 + $0x154] sm:$0xf] }
 0x3a9   : > { %v4365_v21 = vpop.f32.mrf.mxu3 }
 0x3aa   : > { %v4364_v2 = vadd.f32 %v4363_v52, %v4275_v13  ;;  %4896 = vmatmul.bf16.gmra.mxu0 %v7490_v40  ;;  %v7218_v40 = vor.u32 %v8252_v61, %v7215_v3  ;;  %v8341_v61 = vld [vmem:[#allocation9 + $0x1c0] sm:$0xff] }
 0x3ab   : > { %v9302_v20 = vpop.f32.mrf.mxu1 }
 0x3ac   : > { %v9304_v50 = vadd.f32 %v4852_v28, %v4364_v2 }
 0x3ae   : > { %4930 = vmatmul.bf16.gmra.mxu1 %v7362_v4  ;;  %4407 = vmatmul.bf16.gmra.mxu3 %v7210_v41  ;;  %v8208_v4 = vld [vmem:[#allocation9 + $0x98] sm:$0xff] }
 0x3af   : > { %v4276_v35 = vpop.f32.mrf.mxu2  ;;  %v4859_v53 = vpop.f32.mrf.mxu0  ;;  %5010 = vmatpush.bf16.msra.mxu2 %v8208_v4 }
 0x3b0   : > { %v4277_v43 = vadd.f32 %v4276_v35, %v9233_v31  ;;  %v7371_v31 = vld [vmem:[#allocation3 + $0x3c] sm:$0xf0] }
 0x3b1   : > { %v4368_v23 = vpop.f32.mrf.mxu3 }
 0x3b2   : > { %v4366_v15 = vadd.f32 %v4365_v21, %v4277_v43  ;;  %v8337_v21 = vld [vmem:[#allocation9 + $0x1a0] sm:$0xff] }
 0x3b3   : > { %v9307_v49 = vpop.f32.mrf.mxu1  ;;  %5611 = vmatpush.bf16.msra.mxu3 %v8337_v21  ;;  %5011 = vmatpush.bf16.msra.mxu2 %v8207_v58  ;;  %v7525_v21 = vld [vmem:[#allocation3 + $0x168] sm:$0xf] }
 0x3b4   : > { %4318 = vmatmul.bf16.gmra.mxu2 %v7206_v48  ;;  %v9309_v42 = vadd.f32 %v4854_v47, %v4366_v15  ;;  %v7374_v47 = vor.u32 %v8147_v0, %v7371_v31  ;;  %v7233_v48 = vld [vmem:[#allocation3 + $0x170] sm:$0xf]  ;;  %v7227_v0 = vld [vmem:[#allocation3 + $0x174] sm:$0xf0] }
 0x3b7   : > { %v4279_v28 = vpop.f32.mrf.mxu2  ;;  %v9311_v32 = vpop.f32.mrf.mxu0  ;;  %5612 = vmatpush.bf16.msra.mxu3 %v8336_v5  ;;  %5012 = vmatpush.bf16.msra.mxu2 %v8206_v9 }
 0x3b8   : > { %v4280_v45 = vadd.f32 %v4279_v28, %v9239_v46  ;;  %v8354_v46 = vld [vmem:[#allocation9 + $0x228] sm:$0xff]  ;;  %v8335_v28 = vld [vmem:[#allocation9 + $0x190] sm:$0xff] }
 0x3b9   : > { %v4370_v19 = vpop.f32.mrf.mxu3  ;;  %5788 = vmatpush.bf16.msra.mxu1 %v8354_v46 }
 0x3ba   : > { %v4369_v36 = vadd.f32 %v4368_v23, %v4280_v45  ;;  %4901 = vmatmul.bf16.gmra.mxu0 %v7502_v56  ;;  %v7383_v23 = vld [vmem:[#allocation3 + $0x54] sm:$0xf0]  ;;  %v8150_v56 = vld [vmem:[#allocation3 + $0x4c] sm:$0xf] }
 0x3bb   : > { %v9314_v12 = vpop.f32.mrf.mxu1  ;;  %v7386_v31 = vor.u32 %v8150_v56, %v7383_v23  ;;  %5613 = vmatpush.bf16.msra.mxu3 %v8335_v28  ;;  %v8258_v28 = vld [vmem:[#allocation3 + $0x184] sm:$0xf] }
 0x3bc   : > { %v9316_v51 = vadd.f32 %v4857_v18, %v4369_v36  ;;  %v8342_v36 = vld [vmem:[#allocation9 + $0x1c8] sm:$0xff] }
 0x3be   : > { %4935 = vmatmul.bf16.gmra.mxu1 %v7374_v47  ;;  %4412 = vmatmul.bf16.gmra.mxu3 %v7222_v1  ;;  %v8255_v1 = vld [vmem:[#allocation3 + $0x16c] sm:$0xf] }
 0x3bf   : > { %v4281_v52 = vpop.f32.mrf.mxu2  ;;  %v9318_v16 = vpop.f32.mrf.mxu0  ;;  %v7230_v3 = vor.u32 %v8255_v1, %v7227_v0  ;;  %v7407_v1 = vld [vmem:[#allocation3 + $0x84] sm:$0xf0] }
 0x3c0   : > { %v4282_v38 = vadd.f32 %v4281_v52, %v9248_v17  ;;  %v8344_v17 = vld [vmem:[#allocation9 + $0x1d8] sm:$0xff] }
 0x3c1   : > { %v4373_v11 = vpop.f32.mrf.mxu3  ;;  %5701 = vmatpush.bf16.msra.mxu0 %v8344_v17  ;;  %v7245_v17 = vld [vmem:[#allocation3 + $0x188] sm:$0xf] }
 0x3c2   : > { %v4371_v13 = vadd.f32 %v4370_v19, %v4282_v38  ;;  %v7234_v19 = vor.u32 %v8257_v57, %v7233_v48  ;;  %v8333_v38 = vld [vmem:[#allocation9 + $0x180] sm:$0xff] }
 0x3c3   : > { %v9321_v18 = vpop.f32.mrf.mxu1  ;;  %v8353_v48 = vld [vmem:[#allocation9 + $0x220] sm:$0xff] }
 0x3c4   : > { %4323 = vmatmul.bf16.gmra.mxu2 %v7218_v40  ;;  %v9323_v2 = vadd.f32 %v4859_v53, %v4371_v13  ;;  %v8187_v40 = vld [vmem:[#allocation3 + $0x170] sm:$0xf0]  ;;  %5789 = vmatpush.bf16.msra.mxu1 %v8353_v48 }
 0x3c5   : > { %5702 = vmatpush.bf16.msra.mxu0 %v8343_v63  ;;  %v7526_v5 = vor.u32 %v8187_v40, %v7525_v21  ;;  %v8143_v21 = vld [vmem:[#allocation3 + $0x10] sm:$0xf0] }
 0x3c7   : > { %v4284_v41 = vpop.f32.mrf.mxu2  ;;  %v9325_v35 = vpop.f32.mrf.mxu0 }
 0x3c8   : > { %v4285_v43 = vadd.f32 %v4284_v41, %v9254_v59  ;;  %v8334_v59 = vld [vmem:[#allocation9 + $0x188] sm:$0xff]  ;;  %v8260_v41 = vld [vmem:[#allocation3 + $0x190] sm:$0xf0] }
 0x3c9   : > { %v4375_v15 = vpop.f32.mrf.mxu3  ;;  %5614 = vmatpush.bf16.msra.mxu3 %v8334_v59  ;;  %5703 = vmatpush.bf16.msra.mxu0 %v8342_v36  ;;  %v7246_v23 = vor.u32 %v8260_v41, %v7245_v17 }
 0x3ca   : > { %v4374_v53 = vadd.f32 %v4373_v11, %v4285_v43  ;;  %4906 = vmatmul.bf16.gmra.mxu0 %v7514_v29  ;;  %v8153_v29 = vld [vmem:[#allocation3 + $0x64] sm:$0xf] }
 0x3cb   : > { %v9328_v45 = vpop.f32.mrf.mxu1 }
 0x3cc   : > { %v9331_v24 = vadd.f32 %v9311_v32, %v4374_v53  ;;  %v8205_v32 = vld [vmem:[#allocation9 + $0x80] sm:$0xff] }
 0x3cd   : > { %5615 = vmatpush.bf16.msra.mxu3 %v8333_v38  ;;  %5013 = vmatpush.bf16.msra.mxu2 %v8205_v32  ;;  %v8156_v32 = vld [vmem:[#allocation3 + $0x7c] sm:$0xf]  ;;  %v7633_v38 = vld [vmem:[#allocation3 + $0x30] sm:$0xf] }
 0x3ce   : > { %4940 = vmatmul.bf16.gmra.mxu1 %v7386_v31  ;;  %4417 = vmatmul.bf16.gmra.mxu3 %v7234_v19 }
 0x3cf   : > { %v4286_v33 = vpop.f32.mrf.mxu2  ;;  %v4869_v39 = vpop.f32.mrf.mxu0  ;;  %5704 = vmatpush.bf16.msra.mxu0 %v8341_v61  ;;  %v7410_v61 = vor.u32 %v8156_v32, %v7407_v1 }
 0x3d0   : > { %v4287_v47 = vadd.f32 %v4286_v33, %v9263_v25  ;;  %v8285_v33 = vld [vmem:[#allocation3 + $0x34] sm:$0xf] }
 0x3d1   : > { %v4378_v46 = vpop.f32.mrf.mxu3 }
 0x3d2   : > { %v4376_v52 = vadd.f32 %v4375_v15, %v4287_v47 }
 0x3d3   : > { %v9334_v11 = vpop.f32.mrf.mxu1 }
 0x3d4   : > { %4328 = vmatmul.bf16.gmra.mxu2 %v7230_v3  ;;  %v9337_v13 = vadd.f32 %v9318_v16, %v4376_v52  ;;  %v7398_v16 = vor.u32 %v8153_v29, %v7395_v26  ;;  %v7647_v29 = vld [vmem:[#allocation3 + $0x54] sm:$0xf0] }
 0x3d7   : > { %v4289_v25 = vpop.f32.mrf.mxu2  ;;  %v4872_v8 = vpop.f32.mrf.mxu0 }
 0x3d8   : > { %v4290_v7 = vadd.f32 %v4289_v25, %v9269_v14  ;;  %v7239_v14 = vld [vmem:[#allocation3 + $0x18c] sm:$0xf0]  ;;  %v7353_v25 = vld [vmem:[#allocation3 + $0x8] sm:$0xf] }
 0x3d9   : > { %v4380_v4 = vpop.f32.mrf.mxu3  ;;  %v7242_v31 = vor.u32 %v8258_v28, %v7239_v14  ;;  %v7354_v26 = vor.u32 %v8143_v21, %v7353_v25  ;;  %v7419_v14 = vld [vmem:[#allocation3 + $0x9c] sm:$0xf0]  ;;  %v8289_v28 = vld [vmem:[#allocation3 + $0x50] sm:$0xf0]  ;;  %v8291_v21 = vld [vmem:[#allocation3 + $0x64] sm:$0xf] }
 0x3da   : > { %v4379_v37 = vadd.f32 %v4378_v46, %v4290_v7  ;;  %4911 = vmatmul.bf16.gmra.mxu0 %v7526_v5 }
 0x3db   : > { %v9340_v43 = vpop.f32.mrf.mxu1 }
 0x3dc   : > { %v9343_v15 = vadd.f32 %v9325_v35, %v4379_v37  ;;  %v7635_v35 = vld [vmem:[#allocation3 + $0x3c] sm:$0xf0] }
 0x3dd   : > { %v7638_v47 = vor.u32 %v8285_v33, %v7635_v35  ;;  %v8352_v33 = vld [vmem:[#allocation9 + $0x218] sm:$0xff] }
 0x3de   : > { %4945 = vmatmul.bf16.gmra.mxu1 %v7398_v16  ;;  %4422 = vmatmul.bf16.gmra.mxu3 %v7246_v23  ;;  %v8288_v23 = vld [vmem:[#allocation3 + $0x4c] sm:$0xf] }
 0x3df   : > { %v4291_v57 = vpop.f32.mrf.mxu2  ;;  %v4874_v53 = vpop.f32.mrf.mxu0  ;;  %5790 = vmatpush.bf16.msra.mxu1 %v8352_v33 }
 0x3e0   : > { %v4292_v58 = vadd.f32 %v4291_v57, %v9275_v6  ;;  %v8286_v6 = vld [vmem:[#allocation3 + $0x38] sm:$0xf0]  ;;  %v7650_v57 = vor.u32 %v8288_v23, %v7647_v29  ;;  %v7657_v23 = vld [vmem:[#allocation3 + $0x60] sm:$0xf] }
 0x3e1   : > { %v4383_v63 = vpop.f32.mrf.mxu3  ;;  %v7634_v40 = vor.u32 %v8286_v6, %v7633_v38 }
 0x3e2   : > { %v4381_v56 = vadd.f32 %v4380_v4, %v4292_v58 }
 0x3e3   : > { %v9346_v19 = vpop.f32.mrf.mxu1 }
 0x3e4   : > { %4333 = vmatmul.bf16.gmra.mxu2 %v7242_v31  ;;  %v9348_v59 = vadd.f32 %v4869_v39, %v4381_v56  ;;  %v8159_v56 = vld [vmem:[#allocation3 + $0x94] sm:$0xf]  ;;  %v7645_v31 = vld [vmem:[#allocation3 + $0x48] sm:$0xf] }
 0x3e5   : > { %v7422_v35 = vor.u32 %v8159_v56, %v7419_v14 }
 0x3e7   : > { %v4294_v9 = vpop.f32.mrf.mxu2  ;;  %v4877_v36 = vpop.f32.mrf.mxu0 }
 0x3e8   : > { %v4295_v0 = vadd.f32 %v4294_v9, %v9281_v44  ;;  %v7646_v9 = vor.u32 %v8289_v28, %v7645_v31  ;;  %v8149_v28 = vld [vmem:[#allocation3 + $0x40] sm:$0xf0] }
 0x3e9   : > { %v4385_v46 = vpop.f32.mrf.mxu3 }
 0x3ea   : > { %v4384_v52 = vadd.f32 %v4383_v63, %v4295_v0  ;;  %5705 = vmatmul.bf16.vlgmr.msra.gmra.mxu0 %v7638_v47  ;;  %v7365_v47 = vld [vmem:[#allocation3 + $0x20] sm:$0xf] }
 0x3eb   : > { %v9351_v3 = vpop.f32.mrf.mxu1 }
 0x3ec   : > { %v9353_v39 = vadd.f32 %v4872_v8, %v4384_v52 }
 0x3ee   : > { %4950 = vmatmul.bf16.gmra.mxu1 %v7410_v61  ;;  %5616 = vmatmul.bf16.vlgmr.msra.gmra.mxu3 %v7634_v40 }
 0x3ef   : > { %v4296_v7 = vpop.f32.mrf.mxu2  ;;  %v4879_v44 = vpop.f32.mrf.mxu0 }
 0x3f0   : > { %v4297_v5 = vadd.f32 %v4296_v7, %v9287_v54 }
 0x3f1   : > { %v4388_v4 = vpop.f32.mrf.mxu3 }
 0x3f2   : > { %v4386_v17 = vadd.f32 %v4385_v46, %v4297_v5 }
 0x3f3   : > { %v9356_v41 = vpop.f32.mrf.mxu1 }
 0x3f4   : > { %5014 = vmatmul.bf16.vlgmr.msra.gmra.mxu2 %v7354_v26  ;;  %v9358_v37 = vadd.f32 %v4874_v53, %v4386_v17  ;;  %v7431_v26 = vld [vmem:[#allocation3 + $0xb4] sm:$0xf0]  ;;  %v8292_v17 = vld [vmem:[#allocation3 + $0x68] sm:$0xf0] }
 0x3f7   : > { %v4299_v16 = vpop.f32.mrf.mxu2  ;;  %v4882_v8 = vpop.f32.mrf.mxu0 }
 0x3f8   : > { %v4300_v48 = vadd.f32 %v4299_v16, %v9292_v60  ;;  %v8146_v60 = vld [vmem:[#allocation3 + $0x28] sm:$0xf0] }
 0x3f9   : > { %v4390_v58 = vpop.f32.mrf.mxu3  ;;  %v7366_v32 = vor.u32 %v8146_v60, %v7365_v47  ;;  %v8162_v16 = vld [vmem:[#allocation3 + $0xac] sm:$0xf]  ;;  %v8294_v60 = vld [vmem:[#allocation3 + $0x7c] sm:$0xf] }
 0x3fa   : > { %v4389_v63 = vadd.f32 %v4388_v4, %v4300_v48  ;;  %5710 = vmatmul.bf16.gmra.mxu0 %v7650_v57  ;;  %v7434_v48 = vor.u32 %v8162_v16, %v7431_v26  ;;  %v7658_v57 = vor.u32 %v8292_v17, %v7657_v23  ;;  %v8351_v17 = vld [vmem:[#allocation9 + $0x210] sm:$0xff]  ;;  %v8152_v16 = vld [vmem:[#allocation3 + $0x58] sm:$0xf0] }
 0x3fb   : > { %v9361_v54 = vpop.f32.mrf.mxu1  ;;  %5791 = vmatpush.bf16.msra.mxu1 %v8351_v17 }
 0x3fc   : > { %v9363_v53 = vadd.f32 %v4877_v36, %v4389_v63  ;;  %v7659_v36 = vld [vmem:[#allocation3 + $0x6c] sm:$0xf0] }
 0x3fd   : > { %v7662_v5 = vor.u32 %v8291_v21, %v7659_v36  ;;  %v8295_v36 = vld [vmem:[#allocation3 + $0x80] sm:$0xf0] }
 0x3fe   : > { %4955 = vmatmul.bf16.gmra.mxu1 %v7422_v35  ;;  %5621 = vmatmul.bf16.gmra.mxu3 %v7646_v9  ;;  %v8165_v21 = vld [vmem:[#allocation3 + $0xc4] sm:$0xf] }
 0x3ff   : > { %v4301_v0 = vpop.f32.mrf.mxu2  ;;  %v4884_v1 = vpop.f32.mrf.mxu0 }
 0x400   : > { %v4302_v46 = vadd.f32 %v4301_v0, %v9297_v55  ;;  %v7671_v0 = vld [vmem:[#allocation3 + $0x84] sm:$0xf0] }
 0x401   : > { %v4393_v6 = vpop.f32.mrf.mxu3 }
 0x402   : > { %v4391_v52 = vadd.f32 %v4390_v58, %v4302_v46  ;;  %v7377_v58 = vld [vmem:[#allocation3 + $0x38] sm:$0xf] }
 0x403   : > { %v9366_v38 = vpop.f32.mrf.mxu1  ;;  %v7378_v35 = vor.u32 %v8149_v28, %v7377_v58 }
 0x404   : > { %5019 = vmatmul.bf16.gmra.mxu2 %v7366_v32  ;;  %v9368_v61 = vadd.f32 %v4879_v44, %v4391_v52  ;;  %v7443_v52 = vld [vmem:[#allocation3 + $0xcc] sm:$0xf0] }
 0x407   : > { %v4304_v40 = vpop.f32.mrf.mxu2  ;;  %v4887_v25 = vpop.f32.mrf.mxu0 }
 0x408   : > { %v4305_v7 = vadd.f32 %v4304_v40, %v9302_v20 }
 0x409   : > { %v4395_v4 = vpop.f32.mrf.mxu3 }
 0x40a   : > { %v4394_v55 = vadd.f32 %v4393_v6, %v4305_v7  ;;  %5715 = vmatmul.bf16.gmra.mxu0 %v7662_v5  ;;  %v7674_v6 = vor.u32 %v8294_v60, %v7671_v0  ;;  %v7669_v7 = vld [vmem:[#allocation3 + $0x78] sm:$0xf]  ;;  %v7455_v60 = vld [vmem:[#allocation3 + $0xe4] sm:$0xf0] }
 0x40b   : > { %v9371_v29 = vpop.f32.mrf.mxu1  ;;  %v7670_v26 = vor.u32 %v8295_v36, %v7669_v7  ;;  %v7681_v36 = vld [vmem:[#allocation3 + $0x90] sm:$0xf]  ;;  %v8155_v7 = vld [vmem:[#allocation3 + $0x70] sm:$0xf0] }
 0x40c   : > { %v9373_v44 = vadd.f32 %v4882_v8, %v4394_v55  ;;  %v7389_v55 = vld [vmem:[#allocation3 + $0x50] sm:$0xf] }
 0x40d   : > { %v7390_v58 = vor.u32 %v8152_v16, %v7389_v55 }
 0x40e   : > { %4960 = vmatmul.bf16.gmra.mxu1 %v7434_v48  ;;  %5626 = vmatmul.bf16.gmra.mxu3 %v7658_v57 }
 0x40f   : > { %v4306_v14 = vpop.f32.mrf.mxu2  ;;  %v4889_v20 = vpop.f32.mrf.mxu0 }
 0x410   : > { %v4307_v63 = vadd.f32 %v4306_v14, %v9307_v49 }
 0x411   : > { %v4398_v56 = vpop.f32.mrf.mxu3 }
 0x412   : > { %v4396_v31 = vadd.f32 %v4395_v4, %v4307_v63  ;;  %v7683_v63 = vld [vmem:[#allocation3 + $0x9c] sm:$0xf0] }
 0x413   : > { %v9376_v9 = vpop.f32.mrf.mxu1 }
 0x414   : > { %5024 = vmatmul.bf16.gmra.mxu2 %v7378_v35  ;;  %v9378_v33 = vadd.f32 %v4884_v1, %v4396_v31  ;;  %v7446_v1 = vor.u32 %v8165_v21, %v7443_v52  ;;  %v8297_v35 = vld [vmem:[#allocation3 + $0x94] sm:$0xf] }
 0x417   : > { %v4309_v47 = vpop.f32.mrf.mxu2  ;;  %v4892_v8 = vpop.f32.mrf.mxu0 }
 0x418   : > { %v4310_v46 = vadd.f32 %v4309_v47, %v9314_v12  ;;  %v7686_v47 = vor.u32 %v8297_v35, %v7683_v63 }
 0x419   : > { %v4400_v32 = vpop.f32.mrf.mxu3 }
 0x41a   : > { %v4399_v40 = vadd.f32 %v4398_v56, %v4310_v46  ;;  %5720 = vmatmul.bf16.gmra.mxu0 %v7674_v6  ;;  %v8298_v46 = vld [vmem:[#allocation3 + $0x98] sm:$0xf0] }
 0x41b   : > { %v4926_v49 = vpop.f32.mrf.mxu1 }
 0x41c   : > { %v9382_v5 = vadd.f32 %v4926_v49, %v9272_v10  ;;  %v9384_v4 = vadd.f32 %v4887_v25, %v4399_v40  ;;  %v7682_v40 = vor.u32 %v8298_v46, %v7681_v36  ;;  %v8158_v36 = vld [vmem:[#allocation3 + $0x88] sm:$0xf0] }
 0x41e   : > { %4965 = vmatmul.bf16.gmra.mxu1 %v7446_v1  ;;  %5631 = vmatmul.bf16.gmra.mxu3 %v7670_v26 }
 0x41f   : > { %v4311_v12 = vpop.f32.mrf.mxu2  ;;  %v4894_v23 = vpop.f32.mrf.mxu0 }
 0x420   : > { %v4312_v48 = vadd.f32 %v4311_v12, %v9321_v18 }
 0x421   : > { %v4403_v57 = vpop.f32.mrf.mxu3 }
 0x422   : > { %v4401_v14 = vadd.f32 %v4400_v32, %v4312_v48  ;;  %v8168_v32 = vld [vmem:[#allocation3 + $0xdc] sm:$0xf] }
 0x423   : > { %v4928_v28 = vpop.f32.mrf.mxu1 }
 0x424   : > { %v9388_v10 = vadd.f32 %v4928_v28, %v9278_v62  ;;  %5029 = vmatmul.bf16.gmra.mxu2 %v7390_v58  ;;  %v9390_v25 = vadd.f32 %v4889_v20, %v4401_v14  ;;  %v7458_v20 = vor.u32 %v8168_v32, %v7455_v60  ;;  %v8300_v58 = vld [vmem:[#allocation3 + $0xac] sm:$0xf]  ;;  %v8171_v60 = vld [vmem:[#allocation3 + $0xf4] sm:$0xf]  ;;  %v7413_v32 = vld [vmem:[#allocation3 + $0x80] sm:$0xf] }
 0x427   : > { %v4314_v56 = vpop.f32.mrf.mxu2  ;;  %v4897_v31 = vpop.f32.mrf.mxu0 }
 0x428   : > { %v4315_v0 = vadd.f32 %v4314_v56, %v9328_v45  ;;  %v7401_v45 = vld [vmem:[#allocation3 + $0x68] sm:$0xf]  ;;  %v7467_v56 = vld [vmem:[#allocation3 + $0xfc] sm:$0xf0] }
 0x429   : > { %v4405_v18 = vpop.f32.mrf.mxu3  ;;  %v7402_v55 = vor.u32 %v8155_v7, %v7401_v45  ;;  %v7414_v7 = vor.u32 %v8158_v36, %v7413_v32 }
 0x42a   : > { %v4404_v6 = vadd.f32 %v4403_v57, %v4315_v0  ;;  %5725 = vmatmul.bf16.gmra.mxu0 %v7686_v47 }
 0x42b   : > { %v4931_v52 = vpop.f32.mrf.mxu1 }
 0x42c   : > { %v9394_v62 = vadd.f32 %v4931_v52, %v9284_v22  ;;  %v9396_v49 = vadd.f32 %v4892_v8, %v4404_v6  ;;  %v7695_v8 = vld [vmem:[#allocation3 + $0xb4] sm:$0xf0] }
 0x42d   : > { %v7698_v63 = vor.u32 %v8300_v58, %v7695_v8  ;;  %v8350_v52 = vld [vmem:[#allocation9 + $0x208] sm:$0xff] }
 0x42e   : > { %4970 = vmatmul.bf16.gmra.mxu1 %v7458_v20  ;;  %5636 = vmatmul.bf16.gmra.mxu3 %v7682_v40  ;;  %v7479_v58 = vld [vmem:[#allocation3 + $0x114] sm:$0xf0] }
 0x42f   : > { %v4316_v21 = vpop.f32.mrf.mxu2  ;;  %v4899_v1 = vpop.f32.mrf.mxu0  ;;  %5792 = vmatpush.bf16.msra.mxu1 %v8350_v52 }
 0x430   : > { %v4317_v26 = vadd.f32 %v4316_v21, %v9334_v11  ;;  %v8301_v11 = vld [vmem:[#allocation3 + $0xb0] sm:$0xf0] }
 0x431   : > { %v4408_v17 = vpop.f32.mrf.mxu3 }
 0x432   : > { %v4406_v12 = vadd.f32 %v4405_v18, %v4317_v26  ;;  %v7693_v18 = vld [vmem:[#allocation3 + $0xa8] sm:$0xf] }
 0x433   : > { %v4933_v16 = vpop.f32.mrf.mxu1  ;;  %v7694_v46 = vor.u32 %v8301_v11, %v7693_v18  ;;  %v7705_v11 = vld [vmem:[#allocation3 + $0xc0] sm:$0xf]  ;;  %v8161_v18 = vld [vmem:[#allocation3 + $0xa0] sm:$0xf0] }
 0x434   : > { %v9400_v48 = vadd.f32 %v4933_v16, %v9289_v30  ;;  %5034 = vmatmul.bf16.gmra.mxu2 %v7402_v55  ;;  %v9402_v22 = vadd.f32 %v4894_v23, %v4406_v12  ;;  %v7470_v23 = vor.u32 %v8171_v60, %v7467_v56  ;;  %v8303_v16 = vld [vmem:[#allocation3 + $0xc4] sm:$0xf] }
 0x437   : > { %v4319_v57 = vpop.f32.mrf.mxu2  ;;  %v4902_v14 = vpop.f32.mrf.mxu0 }
 0x438   : > { %v4320_v28 = vadd.f32 %v4319_v57, %v9340_v43 }
 0x439   : > { %v4410_v35 = vpop.f32.mrf.mxu3 }
 0x43a   : > { %v4409_v0 = vadd.f32 %v4408_v17, %v4320_v28  ;;  %5730 = vmatmul.bf16.gmra.mxu0 %v7698_v63  ;;  %v7707_v17 = vld [vmem:[#allocation3 + $0xcc] sm:$0xf0]  ;;  %v8304_v28 = vld [vmem:[#allocation3 + $0xc8] sm:$0xf0] }
 0x43b   : > { %v4936_v47 = vpop.f32.mrf.mxu1  ;;  %v7710_v57 = vor.u32 %v8303_v16, %v7707_v17 }
 0x43c   : > { %v9406_v30 = vadd.f32 %v4936_v47, %v9294_v27  ;;  %v9408_v6 = vadd.f32 %v4897_v31, %v4409_v0  ;;  %v7706_v0 = vor.u32 %v8304_v28, %v7705_v11  ;;  %v8164_v11 = vld [vmem:[#allocation3 + $0xb8] sm:$0xf0] }
 0x43e   : > { %4975 = vmatmul.bf16.gmra.mxu1 %v7470_v23  ;;  %5641 = vmatmul.bf16.gmra.mxu3 %v7694_v46 }
 0x43f   : > { %v4321_v43 = vpop.f32.mrf.mxu2  ;;  %v4904_v20 = vpop.f32.mrf.mxu0 }
 0x440   : > { %v4322_v40 = vadd.f32 %v4321_v43, %v9346_v19 }
 0x441   : > { %v4413_v21 = vpop.f32.mrf.mxu3 }
 0x442   : > { %v4411_v45 = vadd.f32 %v4410_v35, %v4322_v40  ;;  %v8174_v35 = vld [vmem:[#allocation3 + $0x10c] sm:$0xf] }
 0x443   : > { %v4938_v26 = vpop.f32.mrf.mxu1 }
 0x444   : > { %v9412_v27 = vadd.f32 %v4938_v26, %v9299_v34  ;;  %5039 = vmatmul.bf16.gmra.mxu2 %v7414_v7  ;;  %v9414_v31 = vadd.f32 %v4899_v1, %v4411_v45  ;;  %v7482_v1 = vor.u32 %v8174_v35, %v7479_v58  ;;  %v8306_v7 = vld [vmem:[#allocation3 + $0xdc] sm:$0xf]  ;;  %v8177_v58 = vld [vmem:[#allocation3 + $0x124] sm:$0xf]  ;;  %v7437_v35 = vld [vmem:[#allocation3 + $0xb0] sm:$0xf] }
 0x447   : > { %v4324_v12 = vpop.f32.mrf.mxu2  ;;  %v4907_v55 = vpop.f32.mrf.mxu0 }
 0x448   : > { %v4325_v8 = vadd.f32 %v4324_v12, %v9351_v3  ;;  %v7425_v3 = vld [vmem:[#allocation3 + $0x98] sm:$0xf]  ;;  %v7491_v12 = vld [vmem:[#allocation3 + $0x12c] sm:$0xf0] }
 0x449   : > { %v4415_v19 = vpop.f32.mrf.mxu3  ;;  %v7426_v32 = vor.u32 %v8161_v18, %v7425_v3  ;;  %v7438_v18 = vor.u32 %v8164_v11, %v7437_v35 }
 0x44a   : > { %v4414_v63 = vadd.f32 %v4413_v21, %v4325_v8  ;;  %5735 = vmatmul.bf16.gmra.mxu0 %v7710_v57 }
 0x44b   : > { %v4941_v56 = vpop.f32.mrf.mxu1 }
 0x44c   : > { %v9418_v34 = vadd.f32 %v4941_v56, %v9304_v50  ;;  %v9420_v47 = vadd.f32 %v4902_v14, %v4414_v63  ;;  %v7719_v14 = vld [vmem:[#allocation3 + $0xe4] sm:$0xf0]  ;;  %v8349_v56 = vld [vmem:[#allocation9 + $0x200] sm:$0xff] }
 0x44d   : > { %v7722_v17 = vor.u32 %v8306_v7, %v7719_v14  ;;  %5793 = vmatpush.bf16.msra.mxu1 %v8349_v56  ;;  %v7503_v7 = vld [vmem:[#allocation3 + $0x144] sm:$0xf0] }
 0x44e   : > { %4980 = vmatmul.bf16.gmra.mxu1 %v7482_v1  ;;  %5646 = vmatmul.bf16.gmra.mxu3 %v7706_v0 }
 0x44f   : > { %v4326_v60 = vpop.f32.mrf.mxu2  ;;  %v4909_v23 = vpop.f32.mrf.mxu0 }
 0x450   : > { %v4327_v46 = vadd.f32 %v4326_v60, %v9356_v41  ;;  %v8307_v41 = vld [vmem:[#allocation3 + $0xe0] sm:$0xf0] }
 0x451   : > { %v4418_v52 = vpop.f32.mrf.mxu3 }
 0x452   : > { %v4416_v43 = vadd.f32 %v4415_v19, %v4327_v46  ;;  %v7717_v19 = vld [vmem:[#allocation3 + $0xd8] sm:$0xf] }
 0x453   : > { %v4943_v36 = vpop.f32.mrf.mxu1  ;;  %v7718_v28 = vor.u32 %v8307_v41, %v7717_v19  ;;  %v7729_v41 = vld [vmem:[#allocation3 + $0xf0] sm:$0xf]  ;;  %v8167_v19 = vld [vmem:[#allocation3 + $0xd0] sm:$0xf0] }
 0x454   : > { %v9424_v40 = vadd.f32 %v4943_v36, %v9309_v42  ;;  %5044 = vmatmul.bf16.gmra.mxu2 %v7426_v32  ;;  %v9426_v50 = vadd.f32 %v4904_v20, %v4416_v43  ;;  %v7494_v20 = vor.u32 %v8177_v58, %v7491_v12  ;;  %v8309_v36 = vld [vmem:[#allocation3 + $0xf4] sm:$0xf] }
 0x457   : > { %v4329_v21 = vpop.f32.mrf.mxu2  ;;  %v4912_v45 = vpop.f32.mrf.mxu0 }
 0x458   : > { %v4330_v26 = vadd.f32 %v4329_v21, %v9361_v54 }
 0x459   : > { %v4420_v16 = vpop.f32.mrf.mxu3 }
 0x45a   : > { %v4419_v8 = vadd.f32 %v4418_v52, %v4330_v26  ;;  %5740 = vmatmul.bf16.gmra.mxu0 %v7722_v17  ;;  %v7731_v52 = vld [vmem:[#allocation3 + $0xfc] sm:$0xf0]  ;;  %v8310_v26 = vld [vmem:[#allocation3 + $0xf8] sm:$0xf0] }
 0x45b   : > { %v4946_v57 = vpop.f32.mrf.mxu1  ;;  %v7734_v21 = vor.u32 %v8309_v36, %v7731_v52  ;;  %v7515_v52 = vld [vmem:[#allocation3 + $0x15c] sm:$0xf0]  ;;  %v8313_v36 = vld [vmem:[#allocation3 + $0x110] sm:$0xf0] }
 0x45c   : > { %v9430_v42 = vadd.f32 %v4946_v57, %v9316_v51  ;;  %v9432_v63 = vadd.f32 %v4907_v55, %v4419_v8  ;;  %v7730_v8 = vor.u32 %v8310_v26, %v7729_v41 }
 0x45e   : > { %4985 = vmatmul.bf16.gmra.mxu1 %v7494_v20  ;;  %5651 = vmatmul.bf16.gmra.mxu3 %v7718_v28 }
 0x45f   : > { %v4331_v54 = vpop.f32.mrf.mxu2  ;;  %v4914_v1 = vpop.f32.mrf.mxu0 }
 0x460   : > { %v4332_v0 = vadd.f32 %v4331_v54, %v9366_v38 }
 0x461   : > { %v4423_v60 = vpop.f32.mrf.mxu3 }
 0x462   : > { %v4421_v3 = vadd.f32 %v4420_v16, %v4332_v0  ;;  %v8180_v16 = vld [vmem:[#allocation3 + $0x13c] sm:$0xf] }
 0x463   : > { %v4948_v46 = vpop.f32.mrf.mxu1 }
 0x464   : > { %v9436_v51 = vadd.f32 %v4948_v46, %v9323_v2  ;;  %5049 = vmatmul.bf16.gmra.mxu2 %v7438_v18  ;;  %v9438_v55 = vadd.f32 %v4909_v23, %v4421_v3  ;;  %v7506_v23 = vor.u32 %v8180_v16, %v7503_v7  ;;  %v8312_v18 = vld [vmem:[#allocation3 + $0x10c] sm:$0xf]  ;;  %v7741_v7 = vld [vmem:[#allocation3 + $0x108] sm:$0xf] }
 0x465   : > { %v7742_v26 = vor.u32 %v8313_v36, %v7741_v7 }
 0x467   : > { %v4334_v43 = vpop.f32.mrf.mxu2  ;;  %v5706_v32 = vpop.f32.mrf.mxu0 }
 0x468   : > { %v4335_v14 = vadd.f32 %v4334_v43, %v9371_v29  ;;  %v7449_v29 = vld [vmem:[#allocation3 + $0xc8] sm:$0xf] }
 0x469   : > { %v4425_v38 = vpop.f32.mrf.mxu3  ;;  %v7450_v35 = vor.u32 %v8167_v19, %v7449_v29  ;;  %v7755_v19 = vld [vmem:[#allocation3 + $0x12c] sm:$0xf0] }
 0x46a   : > { %v4424_v17 = vadd.f32 %v4423_v60, %v4335_v14  ;;  %5745 = vmatmul.bf16.gmra.mxu0 %v7734_v21  ;;  %v7743_v60 = vld [vmem:[#allocation3 + $0x114] sm:$0xf0]  ;;  %v8183_v21 = vld [vmem:[#allocation3 + $0x154] sm:$0xf] }
 0x46b   : > { %v4951_v12 = vpop.f32.mrf.mxu1 }
 0x46c   : > { %v9442_v2 = vadd.f32 %v4951_v12, %v9331_v24  ;;  %v9444_v57 = vadd.f32 %v4912_v45, %v4424_v17  ;;  %v7461_v17 = vld [vmem:[#allocation3 + $0xe0] sm:$0xf]  ;;  %v8170_v12 = vld [vmem:[#allocation3 + $0xe8] sm:$0xf0] }
 0x46e   : > { %4990 = vmatmul.bf16.gmra.mxu1 %v7506_v23  ;;  %5656 = vmatmul.bf16.gmra.mxu3 %v7730_v8  ;;  %v7462_v23 = vor.u32 %v8170_v12, %v7461_v17 }
 0x46f   : > { %v4336_v58 = vpop.f32.mrf.mxu2  ;;  %v5708_v56 = vpop.f32.mrf.mxu0 }
 0x470   : > { %v4337_v20 = vadd.f32 %v4336_v58, %v9376_v9  ;;  %v7746_v9 = vor.u32 %v8312_v18, %v7743_v60  ;;  %v8186_v18 = vld [vmem:[#allocation3 + $0x16c] sm:$0xf] }
 0x471   : > { %v5617_v28 = vpop.f32.mrf.mxu3 }
 0x472   : > { %v4426_v54 = vadd.f32 %v4425_v38, %v4337_v20  ;;  %v9447_v11 = vadd.f32 %v5706_v32, %v5617_v28  ;;  %v7518_v38 = vor.u32 %v8183_v21, %v7515_v52  ;;  %v8315_v28 = vld [vmem:[#allocation3 + $0x124] sm:$0xf] }
 0x473   : > { %v4953_v0 = vpop.f32.mrf.mxu1  ;;  %v8173_v21 = vld [vmem:[#allocation3 + $0x100] sm:$0xf0] }
 0x474   : > { %v9450_v24 = vadd.f32 %v4953_v0, %v9337_v13  ;;  %5054 = vmatmul.bf16.gmra.mxu2 %v7450_v35  ;;  %v9452_v45 = vadd.f32 %v4914_v1, %v4426_v54  ;;  %v7758_v54 = vor.u32 %v8315_v28, %v7755_v19  ;;  %v7527_v35 = vld [vmem:[#allocation3 + $0x174] sm:$0xf0]  ;;  %v8316_v0 = vld [vmem:[#allocation3 + $0x128] sm:$0xf0]  ;;  %v8319_v28 = vld [vmem:[#allocation3 + $0x140] sm:$0xf0] }
 0x475   : > { %v7530_v52 = vor.u32 %v8186_v18, %v7527_v35  ;;  %v7641_v19 = vld [vmem:[#allocation3 + $0x38] sm:$0xf]  ;;  %v7485_v18 = vld [vmem:[#allocation3 + $0x110] sm:$0xf] }
 0x477   : > { %v5015_v3 = vpop.f32.mrf.mxu2  ;;  %v5711_v13 = vpop.f32.mrf.mxu0 }
 0x478   : > { %v9455_v46 = vadd.f32 %v5015_v3, %v9382_v5 }
 0x479   : > { %v5619_v43 = vpop.f32.mrf.mxu3 }
 0x47a   : > { %v9457_v14 = vadd.f32 %v5708_v56, %v5619_v43  ;;  %5750 = vmatmul.bf16.gmra.mxu0 %v7746_v9  ;;  %v7753_v9 = vld [vmem:[#allocation3 + $0x120] sm:$0xf] }
 0x47b   : > { %v4956_v32 = vpop.f32.mrf.mxu1  ;;  %v7754_v43 = vor.u32 %v8316_v0, %v7753_v9  ;;  %v8176_v9 = vld [vmem:[#allocation3 + $0x118] sm:$0xf0] }
 0x47c   : > { %v9460_v1 = vadd.f32 %v4956_v32, %v9343_v15  ;;  %v7473_v32 = vld [vmem:[#allocation3 + $0xf8] sm:$0xf] }
 0x47e   : > { %4995 = vmatmul.bf16.gmra.mxu1 %v7518_v38  ;;  %5661 = vmatmul.bf16.gmra.mxu3 %v7742_v26  ;;  %v7474_v38 = vor.u32 %v8173_v21, %v7473_v32  ;;  %v7779_v32 = vld [vmem:[#allocation3 + $0x15c] sm:$0xf0] }
 0x47f   : > { %v5017_v5 = vpop.f32.mrf.mxu2  ;;  %v5713_v15 = vpop.f32.mrf.mxu0 }
 0x480   : > { %v9463_v16 = vadd.f32 %v5017_v5, %v9388_v10 }
 0x481   : > { %v5622_v41 = vpop.f32.mrf.mxu3 }
 0x482   : > { %v9465_v8 = vadd.f32 %v5711_v13, %v5622_v41  ;;  %v8318_v41 = vld [vmem:[#allocation3 + $0x13c] sm:$0xf] }
 0x483   : > { %v4958_v58 = vpop.f32.mrf.mxu1 }
 0x484   : > { %v9468_v29 = vadd.f32 %v4958_v58, %v9348_v59  ;;  %5059 = vmatmul.bf16.gmra.mxu2 %v7462_v23 }
 0x487   : > { %v5020_v20 = vpop.f32.mrf.mxu2 }
 0x488   : > { %v9471_v56 = vadd.f32 %v5020_v20, %v9394_v62  ;;  %v5716_v62 = vpop.f32.mrf.mxu0 }
 0x489   : > { %v5624_v10 = vpop.f32.mrf.mxu3 }
 0x48a   : > { %v9473_v60 = vadd.f32 %v5713_v15, %v5624_v10  ;;  %5755 = vmatmul.bf16.gmra.mxu0 %v7758_v54  ;;  %v7765_v10 = vld [vmem:[#allocation3 + $0x138] sm:$0xf] }
 0x48b   : > { %v4961_v3 = vpop.f32.mrf.mxu1 }
 0x48c   : > { %v9476_v59 = vadd.f32 %v4961_v3, %v9353_v39  ;;  %v7767_v39 = vld [vmem:[#allocation3 + $0x144] sm:$0xf0]  ;;  %v7766_v3 = vor.u32 %v8319_v28, %v7765_v10 }
 0x48d   : > { %v7770_v58 = vor.u32 %v8318_v41, %v7767_v39  ;;  %v8290_v39 = vld [vmem:[#allocation3 + $0x58] sm:$0xf0] }
 0x48e   : > { %5000 = vmatmul.bf16.gmra.mxu1 %v7530_v52  ;;  %5666 = vmatmul.bf16.gmra.mxu3 %v7754_v43  ;;  %v7486_v43 = vor.u32 %v8176_v9, %v7485_v18  ;;  %v8293_v18 = vld [vmem:[#allocation3 + $0x70] sm:$0xf0] }
 0x48f   : > { %v5022_v36 = vpop.f32.mrf.mxu2  ;;  %v8325_v9 = vld [vmem:[#allocation3 + $0x170] sm:$0xf0] }
 0x490   : > { %v9479_v13 = vadd.f32 %v5022_v36, %v9400_v48  ;;  %v5718_v15 = vpop.f32.mrf.mxu0  ;;  %v8287_v48 = vld [vmem:[#allocation3 + $0x40] sm:$0xf0] }
 0x491   : > { %v5627_v7 = vpop.f32.mrf.mxu3  ;;  %v7642_v0 = vor.u32 %v8287_v48, %v7641_v19  ;;  %v7497_v48 = vld [vmem:[#allocation3 + $0x128] sm:$0xf] }
 0x492   : > { %v9481_v26 = vadd.f32 %v5716_v62, %v5627_v7 }
 0x493   : > { %v4963_v5 = vpop.f32.mrf.mxu1 }
 0x494   : > { %v9484_v17 = vadd.f32 %v4963_v5, %v9358_v37  ;;  %5064 = vmatmul.bf16.gmra.mxu2 %v7474_v38  ;;  %v7653_v5 = vld [vmem:[#allocation3 + $0x50] sm:$0xf] }
 0x497   : > { %v5025_v12 = vpop.f32.mrf.mxu2 }
 0x498   : > { %v9487_v23 = vadd.f32 %v5025_v12, %v9406_v30  ;;  %v8322_v12 = vld [vmem:[#allocation3 + $0x158] sm:$0xf0] }
 0x499   : > { %v5629_v20 = vpop.f32.mrf.mxu3 }
 0x49a   : > { %v9489_v54 = vadd.f32 %v5718_v15, %v5629_v20  ;;  %5760 = vmatmul.bf16.gmra.mxu0 %v7770_v58  ;;  %v7654_v15 = vor.u32 %v8290_v39, %v7653_v5  ;;  %v8179_v20 = vld [vmem:[#allocation3 + $0x130] sm:$0xf0] }
 0x49b   : > { %v4966_v35 = vpop.f32.mrf.mxu1  ;;  %v7498_v28 = vor.u32 %v8179_v20, %v7497_v48  ;;  %v7801_v48 = vld [vmem:[#allocation3 + $0x180] sm:$0xf] }
 0x49c   : > { %v9492_v37 = vadd.f32 %v4966_v35, %v9363_v53  ;;  %v8321_v53 = vld [vmem:[#allocation3 + $0x154] sm:$0xf] }
 0x49d   : > { %v7782_v38 = vor.u32 %v8321_v53, %v7779_v32  ;;  %v7509_v53 = vld [vmem:[#allocation3 + $0x140] sm:$0xf] }
 0x49e   : > { %5794 = vmatmul.bf16.vlgmr.msra.gmra.mxu1 %v7642_v0  ;;  %5671 = vmatmul.bf16.gmra.mxu3 %v7766_v3  ;;  %v7791_v0 = vld [vmem:[#allocation3 + $0x174] sm:$0xf0]  ;;  %v8324_v3 = vld [vmem:[#allocation3 + $0x16c] sm:$0xf] }
 0x49f   : > { %v5027_v30 = vpop.f32.mrf.mxu2 }
 0x4a0   : > { %v9495_v52 = vadd.f32 %v5027_v30, %v9412_v27  ;;  %v7777_v27 = vld [vmem:[#allocation3 + $0x150] sm:$0xf]  ;;  %v7665_v30 = vld [vmem:[#allocation3 + $0x68] sm:$0xf] }
 0x4a3   : > { %v4968_v36 = vpop.f32.mrf.mxu1 }
 0x4a4   : > { %v9498_v62 = vadd.f32 %v4968_v36, %v9368_v61  ;;  %5069 = vmatmul.bf16.gmra.mxu2 %v7486_v43  ;;  %v7778_v61 = vor.u32 %v8322_v12, %v7777_v27  ;;  %v7789_v36 = vld [vmem:[#allocation3 + $0x168] sm:$0xf]  ;;  %v7803_v12 = vld [vmem:[#allocation3 + $0x18c] sm:$0xf0] }
 0x4a7   : > { %v5030_v21 = vpop.f32.mrf.mxu2 }
 0x4a8   : > { %v9501_v7 = vadd.f32 %v5030_v21, %v9418_v34  ;;  %v7790_v21 = vor.u32 %v8325_v9, %v7789_v36  ;;  %v8299_v9 = vld [vmem:[#allocation3 + $0xa0] sm:$0xf0] }
 0x4aa   : > { %5765 = vmatmul.bf16.gmra.mxu0 %v7782_v38 }
 0x4ab   : > { %v4971_v41 = vpop.f32.mrf.mxu1 }
 0x4ac   : > { %v9504_v58 = vadd.f32 %v4971_v41, %v9373_v44  ;;  %v7794_v44 = vor.u32 %v8324_v3, %v7791_v0  ;;  %v8327_v41 = vld [vmem:[#allocation3 + $0x184] sm:$0xf]  ;;  %v7521_v0 = vld [vmem:[#allocation3 + $0x158] sm:$0xf] }
 0x4ad   : > { %v7806_v27 = vor.u32 %v8327_v41, %v7803_v12 }
 0x4ae   : > { %5799 = vmatmul.bf16.gmra.mxu1 %v7654_v15  ;;  %5676 = vmatmul.bf16.gmra.mxu3 %v7778_v61  ;;  %v7677_v15 = vld [vmem:[#allocation3 + $0x80] sm:$0xf]  ;;  %v8296_v61 = vld [vmem:[#allocation3 + $0x88] sm:$0xf0] }
 0x4af   : > { %v5032_v19 = vpop.f32.mrf.mxu2 }
 0x4b0   : > { %v9507_v34 = vadd.f32 %v5032_v19, %v9424_v40  ;;  %v7666_v40 = vor.u32 %v8293_v18, %v7665_v30  ;;  %v8328_v19 = vld [vmem:[#allocation3 + $0x188] sm:$0xf0]  ;;  %v7689_v18 = vld [vmem:[#allocation3 + $0x98] sm:$0xf] }
 0x4b3   : > { %v4973_v35 = vpop.f32.mrf.mxu1 }
 0x4b4   : > { %v9510_v10 = vadd.f32 %v4973_v35, %v9378_v33  ;;  %5074 = vmatmul.bf16.gmra.mxu2 %v7498_v28  ;;  %v8182_v33 = vld [vmem:[#allocation3 + $0x148] sm:$0xf0]  ;;  %v7678_v28 = vor.u32 %v8296_v61, %v7677_v15  ;;  %v7802_v35 = vor.u32 %v8328_v19, %v7801_v48  ;;  %v7713_v61 = vld [vmem:[#allocation3 + $0xc8] sm:$0xf]  ;;  %v8305_v19 = vld [vmem:[#allocation3 + $0xd0] sm:$0xf0] }
 0x4b5   : > { %v7510_v38 = vor.u32 %v8182_v33, %v7509_v53 }
 0x4ba   : > { %5770 = vmatmul.bf16.gmra.mxu0 %v7794_v44 }
 0x4bb   : > { %v4976_v43 = vpop.f32.mrf.mxu1 }
 0x4bc   : > { %v9513_v32 = vadd.f32 %v4976_v43, %v9384_v4 }
 0x4be   : > { %5804 = vmatmul.bf16.gmra.mxu1 %v7666_v40  ;;  %5681 = vmatmul.bf16.gmra.mxu3 %v7790_v21  ;;  %v7533_v40 = vld [vmem:[#allocation3 + $0x170] sm:$0xf]  ;;  %v8188_v21 = vld [vmem:[#allocation3 + $0x178] sm:$0xf0] }
 0x4bf   : > { %v7534_v53 = vor.u32 %v8188_v21, %v7533_v40  ;;  %v5942_v40 = vld [vmem:[%s8756_s16] sm:$0xff] }
 0x4c3   : > { %v4978_v5 = vpop.f32.mrf.mxu1 }
 0x4c4   : > { %v9516_v39 = vadd.f32 %v4978_v5, %v9390_v25  ;;  %5079 = vmatmul.bf16.gmra.mxu2 %v7510_v38  ;;  %v8185_v25 = vld [vmem:[#allocation3 + $0x160] sm:$0xf0]  ;;  %v7701_v5 = vld [vmem:[#allocation3 + $0xb0] sm:$0xf] }
 0x4c5   : > { %v7522_v3 = vor.u32 %v8185_v25, %v7521_v0  ;;  %v8308_v0 = vld [vmem:[#allocation3 + $0xe8] sm:$0xf0] }
 0x4ca   : > { %5775 = vmatmul.bf16.gmra.mxu0 %v7806_v27 }
 0x4cb   : > { %v4981_v4 = vpop.f32.mrf.mxu1 }
 0x4cc   : > { %v9519_v20 = vadd.f32 %v4981_v4, %v9396_v49  ;;  %v7690_v49 = vor.u32 %v8299_v9, %v7689_v18  ;;  %v9550_v9 = vpop.f32.mrf.mxu3 }
 0x4ce   : > { %5809 = vmatmul.bf16.gmra.mxu1 %v7678_v28  ;;  %5686 = vmatmul.bf16.gmra.mxu3 %v7802_v35 }
 0x4d3   : > { %v4983_v44 = vpop.f32.mrf.mxu1 }
 0x4d4   : > { %v9522_v30 = vadd.f32 %v4983_v44, %v9402_v22  ;;  %5084 = vmatmul.bf16.gmra.mxu2 %v7522_v3  ;;  %v8302_v22 = vld [vmem:[#allocation3 + $0xb8] sm:$0xf0] }
 0x4d5   : > { %v7702_v27 = vor.u32 %v8302_v22, %v7701_v5  ;;  %v9562_v22 = vpop.f32.mrf.mxu3 }
 0x4db   : > { %v4986_v43 = vpop.f32.mrf.mxu1 }
 0x4dc   : > { %v9525_v36 = vadd.f32 %v4986_v43, %v9408_v6  ;;  %v7737_v43 = vld [vmem:[#allocation3 + $0xf8] sm:$0xf] }
 0x4de   : > { %5814 = vmatmul.bf16.gmra.mxu1 %v7690_v49 }
 0x4e3   : > { %v4988_v33 = vpop.f32.mrf.mxu1 }
 0x4e4   : > { %v9528_v38 = vadd.f32 %v4988_v33, %v9414_v31  ;;  %5089 = vmatmul.bf16.gmra.mxu2 %v7534_v53  ;;  %v7714_v31 = vor.u32 %v8305_v19, %v7713_v61  ;;  %v5974_v33 = vmax.f32 %v5942_v40, 0.0 }
 0x4eb   : > { %v4991_v12 = vpop.f32.mrf.mxu1 }
 0x4ec   : > { %v9531_v41 = vadd.f32 %v4991_v12, %v9420_v47  ;;  %v7725_v47 = vld [vmem:[#allocation3 + $0xe0] sm:$0xf] }
 0x4ee   : > { %5819 = vmatmul.bf16.gmra.mxu1 %v7702_v27 }
 0x4f3   : > { %v4993_v6 = vpop.f32.mrf.mxu1 }
 0x4f4   : > { %v9534_v15 = vadd.f32 %v4993_v6, %v9426_v50  ;;  %v7726_v50 = vor.u32 %v8308_v0, %v7725_v47  ;;  %v9576_v0 = vpop.f32.mrf.mxu3 }
 0x4fb   : > { %v4996_v4 = vpop.f32.mrf.mxu1 }
 0x4fc   : > { %v9537_v48 = vadd.f32 %v4996_v4, %v9432_v63  ;;  %v9548_v63 = vpop.f32.mrf.mxu0 }
 0x4fe   : > { %5824 = vmatmul.bf16.gmra.mxu1 %v7714_v31  ;;  %v7749_v31 = vld [vmem:[#allocation3 + $0x110] sm:$0xf] }
 0x503   : > { %v4998_v28 = vpop.f32.mrf.mxu1 }
 0x504   : > { %v9540_v35 = vadd.f32 %v4998_v28, %v9438_v55  ;;  %v8311_v55 = vld [vmem:[#allocation3 + $0x100] sm:$0xf0]  ;;  %v9560_v5 = vpop.f32.mrf.mxu0  ;;  %v8314_v28 = vld [vmem:[#allocation3 + $0x118] sm:$0xf0] }
 0x505   : > { %v7738_v53 = vor.u32 %v8311_v55, %v7737_v43  ;;  %v5944_v43 = vld [vmem:[%s8756_s16 + $0x10] sm:$0xff] }
 0x50b   : > { %v5001_v25 = vpop.f32.mrf.mxu1 }
 0x50c   : > { %v9543_v3 = vadd.f32 %v5001_v25, %v9444_v57  ;;  %v9557_v57 = vld [vmem:[%s9804_s4] ss:$0 sm:$0xff]  ;;  %v9574_v47 = vpop.f32.mrf.mxu0 }
 0x50e   : > { %5829 = vmatmul.bf16.gmra.mxu1 %v7726_v50  ;;  %v9578_v50 = vpop.f32.mrf.mxu2 }
 0x513   : > { %v5003_v44 = vpop.f32.mrf.mxu1 }
 0x514   : > { %v9546_v18 = vadd.f32 %v5003_v44, %v9452_v45 }
 0x51b   : > { %v5795_v49 = vpop.f32.mrf.mxu1 }
 0x51c   : > { %v5796_v21 = vadd.f32 %v5795_v49, %v9447_v11  ;;  %v5943_v11 = vld [vmem:[%s8756_s16 + $0x8] sm:$0xff]  ;;  %v5976_v49 = vmax.f32 %v5944_v43, 0.0 }
 0x51d   : > { %v5975_v19 = vmax.f32 %v5943_v11, 0.0 }
 0x51e   : > { %v5875_v45 = vadd.f32 %v5796_v21, %v9455_v46  ;;  %5834 = vmatmul.bf16.gmra.mxu1 %v7738_v53 }
 0x520   : > { %v5910_v12 = vadd.f32 %v9557_v57, %v5875_v45  ;;  %v5945_v45 = vld [vmem:[%s8756_s16 + $0x18] sm:$0xff] }
 0x522   : > { %v6006_v27 = vadd.f32 %v5974_v33, %v5910_v12  ;;  %v9586_v33 = vpop.f32.mrf.mxu0  ;;  %v9588_v12 = vpop.f32.mrf.mxu3 }
 0x523   : > { %v5797_v6 = vpop.f32.mrf.mxu1 }
 0x524   : > { %6038 = vst [vmem:[%s9568_s27] sm:$0xff] %v6006_v27  ;;  %v5798_v46 = vadd.f32 %v5797_v6, %v9457_v14  ;;  %v5977_v6 = vmax.f32 %v5945_v45, 0.0 }
 0x526   : > { %v5876_v61 = vadd.f32 %v5798_v46, %v9463_v16  ;;  %v7750_v16 = vor.u32 %v8314_v28, %v7749_v31  ;;  %v7761_v46 = vld [vmem:[#allocation3 + $0x128] sm:$0xf]  ;;  %v5946_v31 = vld [vmem:[%s8756_s16 + $0x20] sm:$0xff] }
 0x527   : > { %v5978_v43 = vmax.f32 %v5946_v31, 0.0 }
 0x528   : > { %v5911_v4 = vadd.f32 %v9557_v57, %v5876_v61  ;;  %v8317_v61 = vld [vmem:[#allocation3 + $0x130] sm:$0xf0] }
 0x52a   : > { %v6007_v25 = vadd.f32 %v5975_v19, %v5911_v4 }
 0x52b   : > { %v5800_v44 = vpop.f32.mrf.mxu1 }
 0x52c   : > { %6039 = vst [vmem:[%s9568_s27 + $0x8] sm:$0xff] %v6007_v25  ;;  %v5801_v14 = vadd.f32 %v5800_v44, %v9465_v8  ;;  %v9592_v8 = vpop.f32.mrf.mxu2  ;;  %v7762_v25 = vor.u32 %v8317_v61, %v7761_v46  ;;  %v9599_v44 = vpop.f32.mrf.mxu0  ;;  %v5722_v46 = vadd.f32 %v9548_v63, %v9550_v9 }
 0x52e   : > { %v5877_v55 = vadd.f32 %v5801_v14, %v9471_v56  ;;  %5839 = vmatmul.bf16.gmra.mxu1 %v7750_v16 }
 0x530   : > { %v5912_v40 = vadd.f32 %v9557_v57, %v5877_v55 }
 0x532   : > { %v6008_v21 = vadd.f32 %v5976_v49, %v5912_v40  ;;  %v5947_v40 = vld [vmem:[%s8756_s16 + $0x28] sm:$0xff] }
 0x533   : > { %v5802_v53 = vpop.f32.mrf.mxu1 }
 0x534   : > { %6040 = vst [vmem:[%s9568_s27 + $0x10] sm:$0xff] %v6008_v21  ;;  %v5803_v27 = vadd.f32 %v5802_v53, %v9473_v60  ;;  %v9601_v60 = vpop.f32.mrf.mxu3  ;;  %v9604_v14 = vpop.f32.mrf.mxu2  ;;  %v5979_v53 = vmax.f32 %v5947_v40, 0.0 }
 0x535   : > { %v9611_v45 = vpop.f32.mrf.mxu0 }
 0x536   : > { %v5878_v56 = vadd.f32 %v5803_v27, %v9479_v13 }
 0x538   : > { %v5913_v11 = vadd.f32 %v9557_v57, %v5878_v56 }
 0x53a   : > { %v6009_v19 = vadd.f32 %v5977_v6, %v5913_v11  ;;  %v7773_v6 = vld [vmem:[#allocation3 + $0x140] sm:$0xf]  ;;  %v8320_v11 = vld [vmem:[#allocation3 + $0x148] sm:$0xf0] }
 0x53b   : > { %v5805_v4 = vpop.f32.mrf.mxu1 }
 0x53c   : > { %6041 = vst [vmem:[%s9568_s27 + $0x18] sm:$0xff] %v6009_v19  ;;  %v5806_v28 = vadd.f32 %v5805_v4, %v9481_v26  ;;  %v9616_v56 = vpop.f32.mrf.mxu2  ;;  %v7774_v4 = vor.u32 %v8320_v11, %v7773_v6  ;;  %v5950_v11 = vld [vmem:[%s8756_s16 + $0x40] sm:$0xff] }
 0x53e   : > { %v5879_v13 = vadd.f32 %v5806_v28, %v9487_v23  ;;  %5844 = vmatmul.bf16.gmra.mxu1 %v7762_v25  ;;  %v9613_v23 = vpop.f32.mrf.mxu3 }
 0x540   : > { %v5914_v16 = vadd.f32 %v9557_v57, %v5879_v13  ;;  %v5724_v13 = vadd.f32 %v9560_v5, %v9562_v22  ;;  %v8323_v5 = vld [vmem:[#allocation3 + $0x160] sm:$0xf0]  ;;  %v5727_v22 = vadd.f32 %v9574_v47, %v9576_v0  ;;  %v5729_v0 = vadd.f32 %v9586_v33, %v9588_v12 }
 0x542   : > { %v6010_v55 = vadd.f32 %v5978_v43, %v5914_v16  ;;  %v9626_v43 = vpop.f32.mrf.mxu0 }
 0x543   : > { %v5807_v49 = vpop.f32.mrf.mxu1 }
 0x544   : > { %6042 = vst [vmem:[%s9568_s27 + $0x20] sm:$0xff] %v6010_v55  ;;  %v5808_v26 = vadd.f32 %v5807_v49, %v9489_v54  ;;  %v5948_v54 = vld [vmem:[%s8756_s16 + $0x30] sm:$0xff]  ;;  %v9630_v16 = vpop.f32.mrf.mxu2  ;;  %v5949_v49 = vld [vmem:[%s8756_s16 + $0x38] sm:$0xff] }
 0x545   : > { %v5980_v28 = vmax.f32 %v5948_v54, 0.0 }
 0x546   : > { %v5880_v21 = vadd.f32 %v5808_v26, %v9495_v52  ;;  %v9628_v63 = vpop.f32.mrf.mxu3  ;;  %v5981_v26 = vmax.f32 %v5949_v49, 0.0 }
 0x548   : > { %v5915_v27 = vadd.f32 %v9557_v57, %v5880_v21 }
 0x54a   : > { %v6011_v61 = vadd.f32 %v5979_v53, %v5915_v27  ;;  %v7785_v53 = vld [vmem:[#allocation3 + $0x158] sm:$0xf] }
 0x54b   : > { %v5810_v19 = vpop.f32.mrf.mxu1  ;;  %v7786_v54 = vor.u32 %v8323_v5, %v7785_v53  ;;  %v7797_v53 = vld [vmem:[#allocation3 + $0x170] sm:$0xf] }
 0x54c   : > { %6043 = vst [vmem:[%s9568_s27 + $0x28] sm:$0xff] %v6011_v61  ;;  %v5811_v52 = vadd.f32 %v5810_v19, %v5722_v46  ;;  %v5036_v46 = vadd.f32 %v9578_v50, %v9430_v42  ;;  %v9641_v61 = vpop.f32.mrf.mxu0  ;;  %v5951_v50 = vld [vmem:[%s8756_s16 + $0x48] sm:$0xff] }
 0x54e   : > { %v5881_v31 = vadd.f32 %v5811_v52, %v9501_v7  ;;  %5849 = vmatmul.bf16.gmra.mxu1 %v7774_v4  ;;  %v9643_v19 = vpop.f32.mrf.mxu3  ;;  %v9646_v52 = vpop.f32.mrf.mxu2 }
 0x550   : > { %v5916_v25 = vadd.f32 %v9557_v57, %v5881_v31  ;;  %v5982_v31 = vmax.f32 %v5950_v11, 0.0 }
 0x552   : > { %v6012_v9 = vadd.f32 %v5980_v28, %v5916_v25  ;;  %v5038_v25 = vadd.f32 %v9592_v8, %v9436_v51  ;;  %v8326_v51 = vld [vmem:[#allocation3 + $0x178] sm:$0xf0]  ;;  %v5732_v8 = vadd.f32 %v9599_v44, %v9601_v60 }
 0x553   : > { %v5812_v55 = vpop.f32.mrf.mxu1 }
 0x554   : > { %6044 = vst [vmem:[%s9568_s27 + $0x30] sm:$0xff] %v6012_v9  ;;  %v5813_v7 = vadd.f32 %v5812_v55, %v5724_v13  ;;  %v7813_v9 = vld [vmem:[#allocation3 + $0x198] sm:$0xf]  ;;  %v8331_v55 = vld [vmem:[#allocation3 + $0x1a0] sm:$0xf0] }
 0x555   : > { %v7814_v49 = vor.u32 %v8331_v55, %v7813_v9 }
 0x556   : > { %v5882_v40 = vadd.f32 %v5813_v7, %v9507_v34  ;;  %v9655_v7 = vpop.f32.mrf.mxu0  ;;  %v9659_v33 = vpop.f32.mrf.mxu2 }
 0x557   : > { %5691 = vmatmul.bf16.gmra.mxu3 %v7814_v49 }
 0x558   : > { %v5917_v21 = vadd.f32 %v9557_v57, %v5882_v40  ;;  %v9657_v40 = vpop.f32.mrf.mxu3 }
 0x55a   : > { %v6013_v27 = vadd.f32 %v5981_v26, %v5917_v21  ;;  %v5983_v21 = vmax.f32 %v5951_v50, 0.0  ;;  %v5953_v50 = vld [vmem:[%s8756_s16 + $0x58] sm:$0xff] }
 0x55b   : > { %v5815_v6 = vpop.f32.mrf.mxu1  ;;  %v5985_v55 = vmax.f32 %v5953_v50, 0.0 }
 0x55c   : > { %6045 = vst [vmem:[%s9568_s27 + $0x38] sm:$0xff] %v6013_v27  ;;  %v5816_v34 = vadd.f32 %v5815_v6, %v5727_v22  ;;  %v5952_v27 = vld [vmem:[%s8756_s16 + $0x50] sm:$0xff]  ;;  %v5041_v6 = vadd.f32 %v9604_v14, %v9442_v2  ;;  %v5734_v2 = vadd.f32 %v9611_v45, %v9613_v23 }
 0x55e   : > { %v5883_v4 = vadd.f32 %v5816_v34, %v5036_v46  ;;  %5854 = vmatmul.bf16.gmra.mxu1 %v7786_v54  ;;  %v7798_v46 = vor.u32 %v8326_v51, %v7797_v53  ;;  %v8330_v34 = vld [vmem:[#allocation3 + $0x19c] sm:$0xf]  ;;  %v7815_v54 = vld [vmem:[#allocation3 + $0x1a4] sm:$0xf0] }
 0x560   : > { %v5918_v47 = vadd.f32 %v9557_v57, %v5883_v4  ;;  %v7818_v4 = vor.u32 %v8330_v34, %v7815_v54  ;;  %v5654_v44 = vpop.f32.mrf.mxu3  ;;  %v5955_v34 = vld [vmem:[%s8756_s16 + $0x68] sm:$0xff]  ;;  %v5048_v54 = vadd.f32 %v9646_v52, %v9468_v29  ;;  %v5956_v29 = vld [vmem:[%s8756_s16 + $0x70] sm:$0xff]  ;;  %v5051_v52 = vadd.f32 %v9659_v33, %v9476_v59 }
 0x562   : > { %v6014_v28 = vadd.f32 %v5982_v31, %v5918_v47  ;;  %v5984_v47 = vmax.f32 %v5952_v27, 0.0  ;;  %5780 = vmatmul.bf16.gmra.mxu0 %v7818_v4 }
 0x563   : > { %v5817_v42 = vpop.f32.mrf.mxu1 }
 0x564   : > { %6046 = vst [vmem:[%s9568_s27 + $0x40] sm:$0xff] %v6014_v28  ;;  %v5818_v13 = vadd.f32 %v5817_v42, %v5729_v0  ;;  %v5743_v0 = vpop.f32.mrf.mxu0  ;;  %v5052_v28 = vpop.f32.mrf.mxu2 }
 0x566   : > { %v5884_v26 = vadd.f32 %v5818_v13, %v5038_v25  ;;  %v5043_v25 = vadd.f32 %v9616_v56, %v9450_v24  ;;  %v5046_v24 = vadd.f32 %v9630_v16, %v9460_v1 }
 0x568   : > { %v5919_v12 = vadd.f32 %v9557_v57, %v5884_v26  ;;  %v7809_v26 = vld [vmem:[#allocation3 + $0x188] sm:$0xf]  ;;  %v5657_v23 = vpop.f32.mrf.mxu3 }
 0x56a   : > { %v6015_v5 = vadd.f32 %v5983_v21, %v5919_v12  ;;  %v8329_v21 = vld [vmem:[#allocation3 + $0x190] sm:$0xf0]  ;;  %v5737_v12 = vadd.f32 %v9626_v43, %v9628_v63  ;;  %v5739_v43 = vadd.f32 %v9641_v61, %v9643_v19  ;;  %v5742_v61 = vadd.f32 %v9655_v7, %v9657_v40 }
 0x56b   : > { %v5820_v22 = vpop.f32.mrf.mxu1  ;;  %v5744_v7 = vadd.f32 %v5743_v0, %v5654_v44  ;;  %v5958_v44 = vld [vmem:[%s8756_s16 + $0x80] sm:$0xff] }
 0x56c   : > { %6047 = vst [vmem:[%s9568_s27 + $0x48] sm:$0xff] %v6015_v5  ;;  %v5821_v11 = vadd.f32 %v5820_v22, %v5732_v8  ;;  %v5746_v45 = vpop.f32.mrf.mxu0  ;;  %v5055_v51 = vpop.f32.mrf.mxu2  ;;  %v5954_v5 = vld [vmem:[%s8756_s16 + $0x60] sm:$0xff]  ;;  %v7810_v22 = vor.u32 %v8329_v21, %v7809_v26  ;;  %v5988_v26 = vmax.f32 %v5956_v29, 0.0 }
 0x56e   : > { %v5885_v31 = vadd.f32 %v5821_v11, %v5041_v6  ;;  %5859 = vmatmul.bf16.gmra.mxu1 %v7798_v46  ;;  %v5986_v6 = vmax.f32 %v5954_v5, 0.0  ;;  %v5053_v5 = vadd.f32 %v5052_v28, %v9484_v17  ;;  %v5990_v28 = vmax.f32 %v5958_v44, 0.0 }
 0x570   : > { %v5920_v60 = vadd.f32 %v9557_v57, %v5885_v31  ;;  %v5659_v1 = vpop.f32.mrf.mxu3 }
 0x572   : > { %v6016_v14 = vadd.f32 %v5984_v47, %v5920_v60  ;;  %v5987_v60 = vmax.f32 %v5955_v34, 0.0 }
 0x573   : > { %v5822_v42 = vpop.f32.mrf.mxu1 }
 0x574   : > { %6048 = vst [vmem:[%s9568_s27 + $0x50] sm:$0xff] %v6016_v14  ;;  %v5823_v13 = vadd.f32 %v5822_v42, %v5734_v2  ;;  %v5748_v4 = vpop.f32.mrf.mxu0  ;;  %v5057_v31 = vpop.f32.mrf.mxu2  ;;  %v7821_v2 = vld [vmem:[#allocation3 + $0x1a0] sm:$0xf]  ;;  %v8332_v14 = vld [vmem:[#allocation3 + $0x1a8] sm:$0xf0] }
 0x575   : > { %v7822_v50 = vor.u32 %v8332_v14, %v7821_v2  ;;  %v5058_v14 = vadd.f32 %v5057_v31, %v9498_v62 }
 0x576   : > { %v5886_v9 = vadd.f32 %v5823_v13, %v5043_v25 }
 0x578   : > { %v5921_v49 = vadd.f32 %v9557_v57, %v5886_v9 }
 0x57a   : > { %v6017_v53 = vadd.f32 %v5985_v55, %v5921_v49  ;;  %v5662_v55 = vpop.f32.mrf.mxu3 }
 0x57b   : > { %v5825_v8 = vpop.f32.mrf.mxu1 }
 0x57c   : > { %6049 = vst [vmem:[%s9568_s27 + $0x58] sm:$0xff] %v6017_v53  ;;  %v5826_v56 = vadd.f32 %v5825_v8, %v5737_v12  ;;  %v5751_v9 = vpop.f32.mrf.mxu0  ;;  %v5060_v21 = vpop.f32.mrf.mxu2  ;;  %v5957_v8 = vld [vmem:[%s8756_s16 + $0x78] sm:$0xff] }
 0x57e   : > { %v5887_v27 = vadd.f32 %v5826_v56, %v5046_v24  ;;  %5864 = vmatmul.bf16.gmra.mxu1 %v7810_v22  ;;  %v5989_v24 = vmax.f32 %v5957_v8, 0.0 }
 0x580   : > { %v5922_v11 = vadd.f32 %v9557_v57, %v5887_v27 }
 0x582   : > { %v6018_v63 = vadd.f32 %v5986_v6, %v5922_v11  ;;  %v5664_v22 = vpop.f32.mrf.mxu3  ;;  %v5747_v11 = vadd.f32 %v5746_v45, %v5657_v23  ;;  %v5959_v23 = vld [vmem:[%s8756_s16 + $0x88] sm:$0xff] }
 0x583   : > { %v5827_v46 = vpop.f32.mrf.mxu1 }
 0x584   : > { %6050 = vst [vmem:[%s9568_s27 + $0x60] sm:$0xff] %v6018_v63  ;;  %v5828_v16 = vadd.f32 %v5827_v46, %v5739_v43  ;;  %v5753_v56 = vpop.f32.mrf.mxu0  ;;  %v5062_v6 = vpop.f32.mrf.mxu2  ;;  %v5056_v63 = vadd.f32 %v5055_v51, %v9492_v37  ;;  %v5991_v51 = vmax.f32 %v5959_v23, 0.0 }
 0x586   : > { %v5888_v47 = vadd.f32 %v5828_v16, %v5048_v54  ;;  %v5749_v54 = vadd.f32 %v5748_v4, %v5659_v1  ;;  %v5960_v1 = vld [vmem:[%s8756_s16 + $0x90] sm:$0xff] }
 0x587   : > { %v5992_v31 = vmax.f32 %v5960_v1, 0.0 }
 0x588   : > { %v5923_v42 = vadd.f32 %v9557_v57, %v5888_v47 }
 0x58a   : > { %v6019_v19 = vadd.f32 %v5987_v60, %v5923_v42  ;;  %v5667_v47 = vpop.f32.mrf.mxu3 }
 0x58b   : > { %v5830_v25 = vpop.f32.mrf.mxu1 }
 0x58c   : > { %6051 = vst [vmem:[%s9568_s27 + $0x68] sm:$0xff] %v6019_v19  ;;  %v5831_v13 = vadd.f32 %v5830_v25, %v5742_v61  ;;  %v5756_v16 = vpop.f32.mrf.mxu0  ;;  %v5065_v2 = vpop.f32.mrf.mxu2  ;;  %v5752_v19 = vadd.f32 %v5751_v9, %v5662_v55  ;;  %v5061_v25 = vadd.f32 %v5060_v21, %v9504_v58  ;;  %v5961_v55 = vld [vmem:[%s8756_s16 + $0x98] sm:$0xff] }
 0x58e   : > { %v5889_v49 = vadd.f32 %v5831_v13, %v5051_v52  ;;  %5869 = vmatmul.bf16.gmra.mxu1 %v7822_v50 }
 0x590   : > { %v5924_v12 = vadd.f32 %v9557_v57, %v5889_v49 }
 0x592   : > { %v6020_v40 = vadd.f32 %v5988_v26, %v5924_v12  ;;  %v5669_v52 = vpop.f32.mrf.mxu3  ;;  %v5754_v12 = vadd.f32 %v5753_v56, %v5664_v22  ;;  %v5962_v22 = vld [vmem:[%s8756_s16 + $0xa0] sm:$0xff] }
 0x593   : > { %v5832_v53 = vpop.f32.mrf.mxu1 }
 0x594   : > { %6052 = vst [vmem:[%s9568_s27 + $0x70] sm:$0xff] %v6020_v40  ;;  %v5833_v59 = vadd.f32 %v5832_v53, %v5744_v7  ;;  %v5758_v29 = vpop.f32.mrf.mxu0  ;;  %v5067_v49 = vpop.f32.mrf.mxu2  ;;  %v5063_v40 = vadd.f32 %v5062_v6, %v9510_v10  ;;  %v5994_v6 = vmax.f32 %v5962_v22, 0.0 }
 0x596   : > { %v5890_v33 = vadd.f32 %v5833_v59, %v5053_v5  ;;  %v5993_v5 = vmax.f32 %v5961_v55, 0.0 }
 0x598   : > { %v5925_v27 = vadd.f32 %v9557_v57, %v5890_v33 }
 0x59a   : > { %v6021_v43 = vadd.f32 %v5989_v24, %v5925_v27  ;;  %v5672_v21 = vpop.f32.mrf.mxu3  ;;  %v5757_v24 = vadd.f32 %v5756_v16, %v5667_v47  ;;  %v5068_v16 = vadd.f32 %v5067_v49, %v9516_v39 }
 0x59b   : > { %v5835_v0 = vpop.f32.mrf.mxu1 }
 0x59c   : > { %6053 = vst [vmem:[%s9568_s27 + $0x78] sm:$0xff] %v6021_v43  ;;  %v5836_v46 = vadd.f32 %v5835_v0, %v5747_v11  ;;  %v5761_v58 = vpop.f32.mrf.mxu0  ;;  %v5070_v59 = vpop.f32.mrf.mxu2  ;;  %v5066_v11 = vadd.f32 %v5065_v2, %v9513_v32 }
 0x59e   : > { %v5891_v17 = vadd.f32 %v5836_v46, %v5056_v63 }
 0x5a0   : > { %v5926_v34 = vadd.f32 %v9557_v57, %v5891_v17  ;;  %v5759_v17 = vadd.f32 %v5758_v29, %v5669_v52 }
 0x5a2   : > { %v6022_v60 = vadd.f32 %v5990_v28, %v5926_v34  ;;  %v5674_v44 = vpop.f32.mrf.mxu3 }
 0x5a3   : > { %v5837_v45 = vpop.f32.mrf.mxu1 }
 0x5a4   : > { %6054 = vst [vmem:[%s9568_s27 + $0x80] sm:$0xff] %v6022_v60  ;;  %v5838_v42 = vadd.f32 %v5837_v45, %v5749_v54  ;;  %v5763_v0 = vpop.f32.mrf.mxu0  ;;  %v5072_v46 = vpop.f32.mrf.mxu2  ;;  %v5963_v54 = vld [vmem:[%s8756_s16 + $0xa8] sm:$0xff]  ;;  %v5762_v45 = vadd.f32 %v5761_v58, %v5672_v21  ;;  %v5966_v58 = vld [vmem:[%s8756_s16 + $0xc0] sm:$0xff] }
 0x5a5   : > { %v5995_v60 = vmax.f32 %v5963_v54, 0.0  ;;  %v5073_v49 = vadd.f32 %v5072_v46, %v9522_v30 }
 0x5a6   : > { %v5892_v37 = vadd.f32 %v5838_v42, %v5058_v14 }
 0x5a8   : > { %v5927_v61 = vadd.f32 %v9557_v57, %v5892_v37 }
 0x5aa   : > { %v6023_v50 = vadd.f32 %v5991_v51, %v5927_v61  ;;  %v5677_v14 = vpop.f32.mrf.mxu3  ;;  %v5964_v61 = vld [vmem:[%s8756_s16 + $0xb0] sm:$0xff] }
 0x5ab   : > { %v5840_v4 = vpop.f32.mrf.mxu1 }
 0x5ac   : > { %6055 = vst [vmem:[%s9568_s27 + $0x88] sm:$0xff] %v6023_v50  ;;  %v5841_v13 = vadd.f32 %v5840_v4, %v5752_v19  ;;  %v5766_v23 = vpop.f32.mrf.mxu0  ;;  %v5075_v37 = vpop.f32.mrf.mxu2  ;;  %v5071_v19 = vadd.f32 %v5070_v59, %v9519_v20  ;;  %v5996_v4 = vmax.f32 %v5964_v61, 0.0  ;;  %v5969_v61 = vld [vmem:[%s8756_s16 + $0xd8] sm:$0xff] }
 0x5ad   : > { %v5767_v55 = vadd.f32 %v5766_v23, %v5677_v14  ;;  %v5076_v21 = vadd.f32 %v5075_v37, %v9525_v36 }
 0x5ae   : > { %v5893_v62 = vadd.f32 %v5841_v13, %v5061_v25  ;;  %v5764_v25 = vadd.f32 %v5763_v0, %v5674_v44  ;;  %v5965_v13 = vld [vmem:[%s8756_s16 + $0xb8] sm:$0xff] }
 0x5b0   : > { %v5928_v26 = vadd.f32 %v9557_v57, %v5893_v62 }
 0x5b2   : > { %v6024_v7 = vadd.f32 %v5992_v31, %v5928_v26  ;;  %v5679_v31 = vpop.f32.mrf.mxu3 }
 0x5b3   : > { %v5842_v9 = vpop.f32.mrf.mxu1 }
 0x5b4   : > { %6056 = vst [vmem:[%s9568_s27 + $0x90] sm:$0xff] %v6024_v7  ;;  %v5843_v53 = vadd.f32 %v5842_v9, %v5754_v12  ;;  %v5768_v62 = vpop.f32.mrf.mxu0  ;;  %v5077_v12 = vpop.f32.mrf.mxu2  ;;  %v5997_v7 = vmax.f32 %v5965_v13, 0.0 }
 0x5b6   : > { %v5894_v8 = vadd.f32 %v5843_v53, %v5063_v40 }
 0x5b8   : > { %v5929_v33 = vadd.f32 %v9557_v57, %v5894_v8 }
 0x5ba   : > { %v6025_v27 = vadd.f32 %v5993_v5, %v5929_v33  ;;  %v5682_v5 = vpop.f32.mrf.mxu3  ;;  %v5998_v33 = vmax.f32 %v5966_v58, 0.0 }
 0x5bb   : > { %v5845_v56 = vpop.f32.mrf.mxu1 }
 0x5bc   : > { %6057 = vst [vmem:[%s9568_s27 + $0x98] sm:$0xff] %v6025_v27  ;;  %v5846_v43 = vadd.f32 %v5845_v56, %v5757_v24  ;;  %v5771_v30 = vpop.f32.mrf.mxu0  ;;  %v5080_v24 = vpop.f32.mrf.mxu2  ;;  %v5769_v56 = vadd.f32 %v5768_v62, %v5679_v31 }
 0x5be   : > { %v5895_v10 = vadd.f32 %v5846_v43, %v5066_v11  ;;  %v5967_v43 = vld [vmem:[%s8756_s16 + $0xc8] sm:$0xff] }
 0x5bf   : > { %v5999_v0 = vmax.f32 %v5967_v43, 0.0 }
 0x5c0   : > { %v5930_v63 = vadd.f32 %v9557_v57, %v5895_v10  ;;  %v5078_v10 = vadd.f32 %v5077_v12, %v9528_v38 }
 0x5c2   : > { %v6026_v28 = vadd.f32 %v5994_v6, %v5930_v63  ;;  %v5684_v63 = vpop.f32.mrf.mxu3 }
 0x5c3   : > { %v5847_v34 = vpop.f32.mrf.mxu1 }
 0x5c4   : > { %6058 = vst [vmem:[%s9568_s27 + $0xa0] sm:$0xff] %v6026_v28  ;;  %v5848_v47 = vadd.f32 %v5847_v34, %v5759_v17  ;;  %v5773_v44 = vpop.f32.mrf.mxu0  ;;  %v5082_v17 = vpop.f32.mrf.mxu2  ;;  %v5772_v28 = vadd.f32 %v5771_v30, %v5682_v5 }
 0x5c6   : > { %v5896_v32 = vadd.f32 %v5848_v47, %v5068_v16  ;;  %v5968_v16 = vld [vmem:[%s8756_s16 + $0xd0] sm:$0xff]  ;;  %v5081_v47 = vadd.f32 %v5080_v24, %v9531_v41 }
 0x5c8   : > { %v5931_v2 = vadd.f32 %v9557_v57, %v5896_v32 }
 0x5ca   : > { %v6027_v42 = vadd.f32 %v5995_v60, %v5931_v2  ;;  %v6000_v60 = vmax.f32 %v5968_v16, 0.0  ;;  %v5687_v14 = vpop.f32.mrf.mxu3 }
 0x5cb   : > { %v5850_v51 = vpop.f32.mrf.mxu1 }
 0x5cc   : > { %6059 = vst [vmem:[%s9568_s27 + $0xa8] sm:$0xff] %v6027_v42  ;;  %v5851_v50 = vadd.f32 %v5850_v51, %v5762_v45  ;;  %v5774_v45 = vadd.f32 %v5773_v44, %v5684_v63  ;;  %v5776_v23 = vpop.f32.mrf.mxu0  ;;  %v5085_v37 = vpop.f32.mrf.mxu2 }
 0x5cd   : > { %v5086_v13 = vadd.f32 %v5085_v37, %v9537_v48 }
 0x5ce   : > { %v5897_v39 = vadd.f32 %v5851_v50, %v5071_v19  ;;  %v5083_v19 = vadd.f32 %v5082_v17, %v9534_v15  ;;  %v5973_v17 = vld [vmem:[%s8756_s16 + $0xf8] sm:$0xff] }
 0x5d0   : > { %v5932_v1 = vadd.f32 %v9557_v57, %v5897_v39  ;;  %v6001_v39 = vmax.f32 %v5969_v61, 0.0 }
 0x5d2   : > { %v6028_v29 = vadd.f32 %v5996_v4, %v5932_v1  ;;  %v5777_v1 = vadd.f32 %v5776_v23, %v5687_v14 }
 0x5d3   : > { %v5852_v52 = vpop.f32.mrf.mxu1 }
 0x5d4   : > { %6060 = vst [vmem:[%s9568_s27 + $0xb0] sm:$0xff] %v6028_v29  ;;  %v5853_v26 = vadd.f32 %v5852_v52, %v5764_v25  ;;  %v5970_v52 = vld [vmem:[%s8756_s16 + $0xe0] sm:$0xff]  ;;  %v5087_v31 = vpop.f32.mrf.mxu2 }
 0x5d5   : > { %v6002_v12 = vmax.f32 %v5970_v52, 0.0 }
 0x5d6   : > { %v5898_v20 = vadd.f32 %v5853_v26, %v5073_v49  ;;  %v5778_v49 = vpop.f32.mrf.mxu0  ;;  %v5689_v26 = vpop.f32.mrf.mxu3 }
 0x5d8   : > { %v5933_v9 = vadd.f32 %v9557_v57, %v5898_v20 }
 0x5da   : > { %v6029_v40 = vadd.f32 %v5997_v7, %v5933_v9  ;;  %v5779_v7 = vadd.f32 %v5778_v49, %v5689_v26 }
 0x5db   : > { %v5855_v53 = vpop.f32.mrf.mxu1 }
 0x5dc   : > { %6061 = vst [vmem:[%s9568_s27 + $0xb8] sm:$0xff] %v6029_v40  ;;  %v5856_v8 = vadd.f32 %v5855_v53, %v5767_v55  ;;  %v5971_v40 = vld [vmem:[%s8756_s16 + $0xe8] sm:$0xff]  ;;  %v5088_v53 = vadd.f32 %v5087_v31, %v9540_v35  ;;  %v5090_v5 = vpop.f32.mrf.mxu2 }
 0x5dd   : > { %v6003_v30 = vmax.f32 %v5971_v40, 0.0 }
 0x5de   : > { %v5899_v59 = vadd.f32 %v5856_v8, %v5076_v21  ;;  %v5692_v48 = vpop.f32.mrf.mxu3 }
 0x5df   : > { %v5781_v21 = vpop.f32.mrf.mxu0 }
 0x5e0   : > { %v5934_v27 = vadd.f32 %v9557_v57, %v5899_v59  ;;  %v5782_v59 = vadd.f32 %v5781_v21, %v5692_v48 }
 0x5e2   : > { %v6030_v22 = vadd.f32 %v5998_v33, %v5934_v27 }
 0x5e3   : > { %v5857_v11 = vpop.f32.mrf.mxu1 }
 0x5e4   : > { %6062 = vst [vmem:[%s9568_s27 + $0xc0] sm:$0xff] %v6030_v22  ;;  %v5858_v6 = vadd.f32 %v5857_v11, %v5769_v56  ;;  %v5972_v56 = vld [vmem:[%s8756_s16 + $0xf0] sm:$0xff]  ;;  %v5091_v22 = vadd.f32 %v5090_v5, %v9543_v3  ;;  %s8558_s16 = scalar_lea.hbm %s8557_s15, 256 }
 0x5e5   : > { %v6004_v43 = vmax.f32 %v5972_v56, 0.0  ;;  %p8559_p1 = scmp.ne.s32.totalorder %s8557_s15, %s8558_s16  ;;  %p8564_p2 = scmp.lt.s32.totalorder %s8562_s9, %s8558_s16 }
 0x5e6   : > { %v5900_v36 = vadd.f32 %v5858_v6, %v5078_v10  ;;  %v5694_v10 = vpop.f32.mrf.mxu3 }
 0x5e7   : > { %v5783_v6 = vpop.f32.mrf.mxu0  ;;  %p8560_p4 = pnand %p8559_p1, %p8720_p3  ;;  %p8565_p9 = por %p8564_p2, %p8563_p11 }
 0x5e8   : > { %v5935_v46 = vadd.f32 %v9557_v57, %v5900_v36  ;;  %v5784_v44 = vadd.f32 %v5783_v6, %v5694_v10 }
 0x5e9   : > { %p8561_p8 = pneg %p8560_p4 }
 0x5ea   : > { %v6031_v34 = vadd.f32 %v5999_v0, %v5935_v46  ;;  %v5092_v0 = vpop.f32.mrf.mxu2 }
 0x5eb   : > { %v5860_v54 = vpop.f32.mrf.mxu1  ;;  %v5093_v3 = vadd.f32 %v5092_v0, %v9546_v18  ;;  %p8566_p10 = pnand %p8565_p9, %p8561_p8 }
 0x5ec   : > { %6063 = vst [vmem:[%s9568_s27 + $0xc8] sm:$0xff] %v6031_v34  ;;  %v5861_v32 = vadd.f32 %v5860_v54, %v5772_v28  ;;  %v6005_v54 = vmax.f32 %v5973_v17, 0.0 }
 0x5ee   : > { %v5901_v38 = vadd.f32 %v5861_v32, %v5081_v47 }
 0x5f0   : > { %v5936_v2 = vadd.f32 %v9557_v57, %v5901_v38 }
 0x5f2   : > { %v6032_v42 = vadd.f32 %v6000_v60, %v5936_v2 }
 0x5f3   : > { %v5862_v51 = vpop.f32.mrf.mxu1 }
 0x5f4   : > { %6064 = vst [vmem:[%s9568_s27 + $0xd0] sm:$0xff] %v6032_v42  ;;  %v5863_v50 = vadd.f32 %v5862_v51, %v5774_v45 }
 0x5f6   : > { %v5902_v41 = vadd.f32 %v5863_v50, %v5083_v19 }
 0x5f8   : > { %v5937_v4 = vadd.f32 %v9557_v57, %v5902_v41 }
 0x5fa   : > { %v6033_v25 = vadd.f32 %v6001_v39, %v5937_v4 }
 0x5fb   : > { %v5865_v29 = vpop.f32.mrf.mxu1 }
 0x5fc   : > { %6065 = vst [vmem:[%s9568_s27 + $0xd8] sm:$0xff] %v6033_v25  ;;  %v5866_v62 = vadd.f32 %v5865_v29, %v5777_v1 }
 0x5fe   : > { %v5903_v15 = vadd.f32 %v5866_v62, %v5086_v13 }
 0x600   : > { %v5938_v20 = vadd.f32 %v9557_v57, %v5903_v15 }
 0x602   : > { %v6034_v9 = vadd.f32 %v6002_v12, %v5938_v20 }
 0x603   : > { %v5867_v55 = vpop.f32.mrf.mxu1 }
 0x604   : > { %6066 = vst [vmem:[%s9568_s27 + $0xe0] sm:$0xff] %v6034_v9  ;;  %v5868_v58 = vadd.f32 %v5867_v55, %v5779_v7 }
 0x606   : > { %v5904_v8 = vadd.f32 %v5868_v58, %v5088_v53 }
 0x608   : > { %v5939_v33 = vadd.f32 %v9557_v57, %v5904_v8 }
 0x60a   : > { %v6035_v24 = vadd.f32 %v6003_v30, %v5939_v33 }
 0x60b   : > { %v5870_v27 = vpop.f32.mrf.mxu1 }
 0x60c   : > { %6067 = vst [vmem:[%s9568_s27 + $0xe8] sm:$0xff] %v6035_v24  ;;  %v5871_v35 = vadd.f32 %v5870_v27, %v5782_v59 }
 0x60e   : > { %v5905_v11 = vadd.f32 %v5871_v35, %v5091_v22 }
 0x610   : > { %v5940_v36 = vadd.f32 %v9557_v57, %v5905_v11 }
 0x612   : > { %v6036_v63 = vadd.f32 %v6004_v43, %v5940_v36 }
 0x613   : > { %v5872_v46 = vpop.f32.mrf.mxu1 }
 0x614   : > { %6068 = vst [vmem:[%s9568_s27 + $0xf0] sm:$0xff] %v6036_v63  ;;  %v5873_v28 = vadd.f32 %v5872_v46, %v5784_v44 }
 0x616   : > { %v5906_v34 = vadd.f32 %v5873_v28, %v5093_v3 }
 0x618   : > { %v5941_v16 = vadd.f32 %v9557_v57, %v5906_v34 }
 0x61a   : > { %v6037_v47 = vadd.f32 %v6005_v54, %v5941_v16 }
 0x61c   : > { %6069 = vst [vmem:[%s9568_s27 + $0xf8] sm:$0xff] %v6037_v47 }
 0x61d   : > { %8569 = shalt.err (!%p8566_p10)
}
 0x61e   : > { %s8622_s8 = smov 128   ;;  %s8623_s12 = smov 8  }
 0x61f   : > { %8384 = dma.vmem_to_hbm [thread:$0]  (%p8720_p3), %s6084_s7, 4096, %s6086_s22, %s6071_s13, %s8622_s8, %s8622_s8, %s8623_s12  }
 0x620 PF: > { %s6100_s27 = sand.u32 1, %s8600_s18   ;;  %p9817_p12 = scmp.ge.s32.totalorder %s8612_s21, 2 }
 0x621   : > { %s6101_s28 = scalar_lea.sflag [#allocation6], %s6100_s27 }
 0x622   : > { %p8398_p13 = pnand %p9817_p12, %p8689_p6 }
 0x624   : > { %p8399_p0 = pneg %p8398_p13 }
 0x626   : > { %8595 = dma.done.wait (%p8399_p0), %s6101_s28, 4096  }
 0x627   : > { %8597 = vsyncadd (%p8399_p0), %s6101_s28, 4294963200  ;;  %p19_p5 = scmp.ge.s32.totalorder %s8710_s14, 4   ;;  %s9818_s18 = smov %s8604_s19 }
 0x628   : > { %s9819_s19 = smov %s8608_s20  ;;  %s9820_s20 = smov %s8726_s23 }
 0x629   : > { %s9821_s21 = smov %s8710_s14  ;;  %21 = sbr.rel (!%p19_p5) target bundleno = 6 (0x6), region = 101 }
 0x62e   :  { %6107 = vsyncpa [#allocation5], 1 }
 0x62f   :  { %6109 = vsyncpa [#allocation5 + $0x1], 1 }
 0x630   :  { %6110 = vsyncpa [#allocation8], 1 }
 0x631   :  { %6111 = vsyncpa [#allocation6], 1 }
 0x632   :  { %6113 = vsyncpa [#allocation6 + $0x1], 1 }

</bundles_post_ra>
